<compile_context>
chip_gen: v7x
topology: tpu7x:2x2x1
jax: 0.10.0
libtpu: 0.0.40
codegen_flags: <defaults>
</compile_context>

<pallas_src>
import jax
import jax.numpy as jnp
from jax import lax
from jax.experimental import pallas as pl
from jax.experimental.pallas import tpu as pltpu

# ---- tiny synthetic Llama config -------------------------------------------
VOCAB = 64
D_MODEL = 32
N_HEADS = 4
HEAD_DIM = D_MODEL // N_HEADS
D_FF = 64
N_LAYERS = 2
N_CAT = 4
RMS_EPS = 1e-5
SLOT = 128                  # lane-aligned slot width for fused-projection sub-blocks
HEAD_OUT_PAD = 128          # lane-dense padded output width (real logit = col 0)
NEG_INF = -1e9


def _rmsnorm(x, w):
    var = jnp.mean(x * x, axis=-1, keepdims=True)
    return x * lax.rsqrt(var + RMS_EPS) * w


# ---- single fused kernel: all layers + final norm + head --------------------
def fused_llama_kernel(x_ref, mask_ref, cos_ref, sin_ref, cat_ref,
                       ln1_ref, wqkv_ref, wo_ref, ln2_ref, wgu_ref, wd_ref,
                       lnf_ref, w1a_ref, w1b_ref, b1_ref, w2_ref, b2_ref,
                       w3_ref, b3_ref, o_ref):
    D = D_MODEL
    S = x_ref.shape[1]

    # Causal + key-padding additive bias, built in-kernel (O(S) DMA, not O(S^2)).
    q_idx = lax.broadcasted_iota(jnp.int32, (S, S), 0)
    k_idx = lax.broadcasted_iota(jnp.int32, (S, S), 1)
    key_ok = mask_ref[0] > 0.5                                  # (1, S)
    allowed = (q_idx >= k_idx) & key_ok                         # (S, S)
    bias = jnp.where(allowed, 0.0, NEG_INF).astype(jnp.float32)

    cos = cos_ref[...]                                          # (S, D) f32
    sin = sin_ref[...]                                          # (S, D) f32
    scale = 1.0 / (HEAD_DIM ** 0.5)

    def layer_body(l, x):
        # ---------------- attention block ----------------
        h = _rmsnorm(x, ln1_ref[l])                             # (S, D) f32
        # Fused [Wq | Wk | Wv | Wq@R | Wk@R] projection; each sub-block is
        # padded to a 128-lane slot so slices below start at lane 0.
        qkvr = jnp.dot(h.astype(jnp.bfloat16), wqkv_ref[l],
                       preferred_element_type=jnp.float32)      # (S, 5*SLOT)
        q = qkvr[:, 0 * SLOT:0 * SLOT + D] * cos + qkvr[:, 3 * SLOT:3 * SLOT + D] * sin
        k = qkvr[:, 1 * SLOT:1 * SLOT + D] * cos + qkvr[:, 4 * SLOT:4 * SLOT + D] * sin
        v = qkvr[:, 2 * SLOT:2 * SLOT + D]

        qh = q.reshape(S, N_HEADS, HEAD_DIM)
        kh = k.reshape(S, N_HEADS, HEAD_DIM)
        vh = v.reshape(S, N_HEADS, HEAD_DIM)

        scores = jnp.einsum('qhd,khd->hqk',
                            qh.astype(jnp.bfloat16), kh.astype(jnp.bfloat16),
                            preferred_element_type=jnp.float32) * scale
        scores = scores + bias[None, :, :]
        scores = scores - jnp.max(scores, axis=-1, keepdims=True)
        p = jnp.exp(scores)
        p = p * pl.reciprocal(jnp.sum(p, axis=-1, keepdims=True), approx=True)

        ctx = jnp.einsum('hqk,khd->qhd',
                         p.astype(jnp.bfloat16), vh.astype(jnp.bfloat16),
                         preferred_element_type=jnp.float32)    # (S, H, hd)
        attn = jnp.dot(ctx.reshape(S, D).astype(jnp.bfloat16), wo_ref[l],
                       preferred_element_type=jnp.float32)      # (S, D)
        x = x + attn

        # ---------------- SwiGLU MLP block ----------------
        h2 = _rmsnorm(x, ln2_ref[l])
        gu = jnp.dot(h2.astype(jnp.bfloat16), wgu_ref[l],
                     preferred_element_type=jnp.float32)        # (S, 2*SLOT)
        gate = gu[:, 0:D_FF]                                    # lane-0 aligned
        up = gu[:, SLOT:SLOT + D_FF]                            # lane-0 aligned
        silu = gate * pl.reciprocal(1.0 + jnp.exp(-gate), approx=True)
        mlp = jnp.dot((silu * up).astype(jnp.bfloat16), wd_ref[l],
                      preferred_element_type=jnp.float32)       # (S, D)
        return x + mlp

    x = lax.fori_loop(0, N_LAYERS, layer_body, x_ref[0], unroll=True)

    # ---- final RMSNorm on token 0 + head MLP (concat-free, lane-dense) ------
    h0 = _rmsnorm(x[0:1, :], lnf_ref[...])                      # (1, D)
    # nn.Dropout(0.1): inference mode -> identity.
    z1 = (jnp.dot(h0.astype(jnp.bfloat16), w1a_ref[...],
                  preferred_element_type=jnp.float32)
          + jnp.dot(cat_ref[0].astype(jnp.bfloat16), w1b_ref[...],
                    preferred_element_type=jnp.float32)
          + b1_ref[...])
    z1 = jnp.maximum(z1, 0.0)
    z2 = jnp.maximum(
        jnp.dot(z1.astype(jnp.bfloat16), w2_ref[...],
                preferred_element_type=jnp.float32) + b2_ref[...], 0.0)
    out = jnp.dot(z2.astype(jnp.bfloat16), w3_ref[...],
                  preferred_element_type=jnp.float32) + b3_ref[...]   # (1, 128)
    o_ref[0] = out.astype(o_ref.dtype)


# ---- deterministic parameter init (fused / stacked / lane-padded layout) ----
def init_params(key):
    def w(k, shape, scale=0.02):
        return scale * jax.random.normal(k, shape, jnp.float32)

    # Block-diagonal rotate_half matrix: (q @ R)[..., i] == rotate_half(q)[..., i]
    h = HEAD_DIM // 2
    idx = jnp.arange(h)
    r = jnp.zeros((HEAD_DIM, HEAD_DIM), jnp.float32)
    r = r.at[idx + h, idx].set(-1.0)    # out[i<h]  = -x[i+h]
    r = r.at[idx, idx + h].set(1.0)     # out[i>=h] =  x[i-h]
    r_full = jnp.kron(jnp.eye(N_HEADS, dtype=jnp.float32), r)   # (D, D)

    def pad_slot(m):                    # place submatrix in a 128-lane slot
        return jnp.pad(m, ((0, 0), (0, SLOT - m.shape[1])))

    keys = jax.random.split(key, 2 + N_LAYERS)
    params = {'embed': w(keys[0], (VOCAB, D_MODEL))}

    wqkvr, wo, wgu, wd = [], [], [], []
    for i in range(N_LAYERS):
        lk = jax.random.split(keys[1 + i], 7)
        Wq = w(lk[0], (D_MODEL, D_MODEL))
        Wk = w(lk[1], (D_MODEL, D_MODEL))
        Wv = w(lk[2], (D_MODEL, D_MODEL))
        Wo = w(lk[3], (D_MODEL, D_MODEL))
        Wg = w(lk[4], (D_MODEL, D_FF))
        Wu = w(lk[5], (D_MODEL, D_FF))
        Wd = w(lk[6], (D_FF, D_MODEL))
        # Fused, lane-slot-padded projection: [Wq | Wk | Wv | Wq@R | Wk@R]
        wqkvr.append(jnp.concatenate(
            [pad_slot(Wq), pad_slot(Wk), pad_slot(Wv),
             pad_slot(Wq @ r_full), pad_slot(Wk @ r_full)], axis=1))   # (D, 5*SLOT)
        wo.append(Wo)
        wgu.append(jnp.concatenate([pad_slot(Wg), pad_slot(Wu)], axis=1))  # (D, 2*SLOT)
        wd.append(Wd)

    params['w_qkvr'] = jnp.stack(wqkvr).astype(jnp.bfloat16)     # (L, D, 5*SLOT)
    params['w_o'] = jnp.stack(wo).astype(jnp.bfloat16)           # (L, D, D)
    params['w_gu'] = jnp.stack(wgu).astype(jnp.bfloat16)         # (L, D, 2*SLOT)
    params['w_d'] = jnp.stack(wd).astype(jnp.bfloat16)           # (L, F, D)
    params['ln1'] = jnp.ones((N_LAYERS, 1, D_MODEL), jnp.float32)
    params['ln2'] = jnp.ones((N_LAYERS, 1, D_MODEL), jnp.float32)
    params['lnf'] = jnp.ones((1, D_MODEL), jnp.float32)

    hk = jax.random.split(keys[1 + N_LAYERS], 3)
    w1 = w(hk[0], (D_MODEL + N_CAT, 128))
    params['w1a'] = w1[:D_MODEL].astype(jnp.bfloat16)            # (D, 128)
    params['w1b'] = w1[D_MODEL:].astype(jnp.bfloat16)            # (N_CAT, 128)
    params['b1'] = jnp.zeros((1, 128), jnp.float32)
    params['w2'] = w(hk[1], (128, 64)).astype(jnp.bfloat16)
    params['b2'] = jnp.zeros((1, 64), jnp.float32)
    w3 = w(hk[2], (64, 1))
    # Lane-dense padded output head: only column 0 is the real logit.
    params['w3p'] = jnp.pad(w3, ((0, 0), (0, HEAD_OUT_PAD - 1))).astype(jnp.bfloat16)
    params['b3p'] = jnp.zeros((1, HEAD_OUT_PAD), jnp.float32)
    return params


# ---- full forward -----------------------------------------------------------
def forward(params, input_ids, attention_mask, categorical_features):
    B, S = input_ids.shape
    D = D_MODEL
    L = N_LAYERS

    # Glue (no clean tiny-Pallas equivalent): embedding gather and O(S*D)
    # RoPE tables built once in JAX and fed to the fused kernel.
    x = jnp.take(params['embed'], input_ids, axis=0)              # (B, S, D)
    mask_f = attention_mask.astype(jnp.float32).reshape(B, 1, S)  # (B, 1, S)

    inv_freq = 1.0 / (10000.0 ** (jnp.arange(0, HEAD_DIM, 2, dtype=jnp.float32)
                                  / HEAD_DIM))
    t = jnp.arange(S, dtype=jnp.float32)
    freqs = jnp.outer(t, inv_freq)                                # (S, hd/2)
    emb = jnp.concatenate([freqs, freqs], axis=-1)                # (S, hd)
    cos_f = jnp.tile(jnp.cos(emb), (1, N_HEADS))                  # (S, D) head-major
    sin_f = jnp.tile(jnp.sin(emb), (1, N_HEADS))                  # (S, D)

    cat3 = categorical_features.reshape(B, 1, N_CAT)

    out = pl.pallas_call(
        fused_llama_kernel,
        out_shape=jax.ShapeDtypeStruct((B, 1, HEAD_OUT_PAD), jnp.float32),
        grid_spec=pltpu.PrefetchScalarGridSpec(
            num_scalar_prefetch=0,
            grid=(B,),
            in_specs=[
                pl.BlockSpec((1, S, D), lambda b: (b, 0, 0)),             # x_emb
                pl.BlockSpec((1, 1, S), lambda b: (b, 0, 0)),             # key mask
                pl.BlockSpec((S, D), lambda b: (0, 0)),                   # cos
                pl.BlockSpec((S, D), lambda b: (0, 0)),                   # sin
                pl.BlockSpec((1, 1, N_CAT), lambda b: (b, 0, 0)),         # cat
                pl.BlockSpec((L, 1, D), lambda b: (0, 0, 0)),             # ln1 (all layers)
                pl.BlockSpec((L, D, 5 * SLOT), lambda b: (0, 0, 0)),      # w_qkvr
                pl.BlockSpec((L, D, D), lambda b: (0, 0, 0)),             # w_o
                pl.BlockSpec((L, 1, D), lambda b: (0, 0, 0)),             # ln2
                pl.BlockSpec((L, D, 2 * SLOT), lambda b: (0, 0, 0)),      # w_gu
                pl.BlockSpec((L, D_FF, D), lambda b: (0, 0, 0)),          # w_d
                pl.BlockSpec((1, D), lambda b: (0, 0)),                   # lnf
                pl.BlockSpec((D, 128), lambda b: (0, 0)),                 # w1a
                pl.BlockSpec((N_CAT, 128), lambda b: (0, 0)),             # w1b
                pl.BlockSpec((1, 128), lambda b: (0, 0)),                 # b1
                pl.BlockSpec((128, 64), lambda b: (0, 0)),                # w2
                pl.BlockSpec((1, 64), lambda b: (0, 0)),                  # b2
                pl.BlockSpec((64, HEAD_OUT_PAD), lambda b: (0, 0)),       # w3p
                pl.BlockSpec((1, HEAD_OUT_PAD), lambda b: (0, 0)),        # b3p
            ],
            out_specs=pl.BlockSpec((1, 1, HEAD_OUT_PAD), lambda b: (b, 0, 0)),
        ),
        compiler_params=pltpu.CompilerParams(
            # TODO(synk): use pltpu.CORE_PARALLEL here on v7x (2 TCs) once
            # targeting that generation; "parallel" is safe on 1-TC chips.
            dimension_semantics=("parallel",),
            vmem_limit_bytes=32 * 1024 * 1024,
        ),
    )(x, mask_f, cos_f, sin_f, cat3,
      params['ln1'], params['w_qkvr'], params['w_o'],
      params['ln2'], params['w_gu'], params['w_d'],
      params['lnf'],
      params['w1a'], params['w1b'], params['b1'],
      params['w2'], params['b2'], params['w3p'], params['b3p'])

    return out[:, 0, :1]                                          # (B, 1)


forward = jax.jit(forward)


if __name__ == "__main__":
    key = jax.random.PRNGKey(0)
    k_params, k_ids, k_cat = jax.random.split(key, 3)

    B, S = 2, 8
    params = init_params(k_params)
    input_ids = jax.random.randint(k_ids, (B, S), 0, VOCAB, dtype=jnp.int32)
    # second sequence has two padding positions at the end
    attention_mask = jnp.array([[1] * S, [1] * (S - 2) + [0, 0]], dtype=jnp.int32)
    categorical_features = jax.random.normal(k_cat, (B, N_CAT), jnp.float32)

    out = forward(params, input_ids, attention_mask, categorical_features)
    out = jax.block_until_ready(out)
    assert out.shape == (B, 1) and out.dtype == jnp.float32
    assert bool(jnp.all(jnp.isfinite(out)))
    print("KERNEL_OK")
</pallas_src>

<mosaic_0001>
module attributes {stable_mosaic.version = 11 : i64} {
  func.func @fused_llama_kernel(%arg0: i32, %arg1: memref<1x8x32xf32, #tpu.memory_space<vmem>>, %arg2: memref<1x1x8xf32, #tpu.memory_space<vmem>>, %arg3: memref<8x32xf32, #tpu.memory_space<vmem>>, %arg4: memref<8x32xf32, #tpu.memory_space<vmem>>, %arg5: memref<1x1x4xf32, #tpu.memory_space<vmem>>, %arg6: memref<2x1x32xf32, #tpu.memory_space<vmem>>, %arg7: memref<2x32x640xbf16, #tpu.memory_space<vmem>>, %arg8: memref<2x32x32xbf16, #tpu.memory_space<vmem>>, %arg9: memref<2x1x32xf32, #tpu.memory_space<vmem>>, %arg10: memref<2x32x256xbf16, #tpu.memory_space<vmem>>, %arg11: memref<2x64x32xbf16, #tpu.memory_space<vmem>>, %arg12: memref<1x32xf32, #tpu.memory_space<vmem>>, %arg13: memref<32x128xbf16, #tpu.memory_space<vmem>>, %arg14: memref<4x128xbf16, #tpu.memory_space<vmem>>, %arg15: memref<1x128xf32, #tpu.memory_space<vmem>>, %arg16: memref<128x64xbf16, #tpu.memory_space<vmem>>, %arg17: memref<1x64xf32, #tpu.memory_space<vmem>>, %arg18: memref<64x128xbf16, #tpu.memory_space<vmem>>, %arg19: memref<1x128xf32, #tpu.memory_space<vmem>>, %arg20: memref<1x1x128xf32, #tpu.memory_space<vmem>>) attributes {dimension_semantics = [#tpu.dimension_semantics<parallel>], iteration_bounds = array<i64: 2>, scalar_prefetch = 0 : i64, scratch_operands = 0 : i64, tpu.core_type = #tpu.core_type<tc>, window_params = [{transform_indices = @transform_0, window_bounds = array<i64: 1, 8, 32>}, {transform_indices = @transform_1, window_bounds = array<i64: 1, 1, 8>}, {pipeline_mode = #tpu.pipeline_mode<synchronous>, transform_indices = @transform_2, window_bounds = array<i64: 8, 32>}, {pipeline_mode = #tpu.pipeline_mode<synchronous>, transform_indices = @transform_3, window_bounds = array<i64: 8, 32>}, {transform_indices = @transform_4, window_bounds = array<i64: 1, 1, 4>}, {pipeline_mode = #tpu.pipeline_mode<synchronous>, transform_indices = @transform_5, window_bounds = array<i64: 2, 1, 32>}, {pipeline_mode = #tpu.pipeline_mode<synchronous>, transform_indices = @transform_6, window_bounds = array<i64: 2, 32, 640>}, {pipeline_mode = #tpu.pipeline_mode<synchronous>, transform_indices = @transform_7, window_bounds = array<i64: 2, 32, 32>}, {pipeline_mode = #tpu.pipeline_mode<synchronous>, transform_indices = @transform_8, window_bounds = array<i64: 2, 1, 32>}, {pipeline_mode = #tpu.pipeline_mode<synchronous>, transform_indices = @transform_9, window_bounds = array<i64: 2, 32, 256>}, {pipeline_mode = #tpu.pipeline_mode<synchronous>, transform_indices = @transform_10, window_bounds = array<i64: 2, 64, 32>}, {pipeline_mode = #tpu.pipeline_mode<synchronous>, transform_indices = @transform_11, window_bounds = array<i64: 1, 32>}, {pipeline_mode = #tpu.pipeline_mode<synchronous>, transform_indices = @transform_12, window_bounds = array<i64: 32, 128>}, {pipeline_mode = #tpu.pipeline_mode<synchronous>, transform_indices = @transform_13, window_bounds = array<i64: 4, 128>}, {pipeline_mode = #tpu.pipeline_mode<synchronous>, transform_indices = @transform_14, window_bounds = array<i64: 1, 128>}, {pipeline_mode = #tpu.pipeline_mode<synchronous>, transform_indices = @transform_15, window_bounds = array<i64: 128, 64>}, {pipeline_mode = #tpu.pipeline_mode<synchronous>, transform_indices = @transform_16, window_bounds = array<i64: 1, 64>}, {pipeline_mode = #tpu.pipeline_mode<synchronous>, transform_indices = @transform_17, window_bounds = array<i64: 64, 128>}, {pipeline_mode = #tpu.pipeline_mode<synchronous>, transform_indices = @transform_18, window_bounds = array<i64: 1, 128>}, {transform_indices = @transform_19, window_bounds = array<i64: 1, 1, 128>}]} {
    %0 = tpu.iota {dimensions = array<i32: 0>} : vector<8x8xi32>
    %1 = tpu.iota {dimensions = array<i32: 1>} : vector<8x8xi32>
    %c0 = arith.constant 0 : index
    %c0_0 = arith.constant 0 : index
    %c0_1 = arith.constant 0 : index
    %2 = vector.load %arg2[%c0, %c0_0, %c0_1] : memref<1x1x8xf32, #tpu.memory_space<vmem>>, vector<1x1x8xf32>
    %3 = vector.shape_cast %2 : vector<1x1x8xf32> to vector<1x8xf32>
    %cst = arith.constant 5.000000e-01 : f32
    %4 = vector.broadcast %cst : f32 to vector<1x8xf32>
    %5 = arith.cmpf ogt, %3, %4 : vector<1x8xf32>
    %6 = arith.cmpi sge, %0, %1 : vector<8x8xi32>
    %7 = vector.broadcast %5 : vector<1x8xi1> to vector<8x8xi1>
    %8 = arith.andi %6, %7 : vector<8x8xi1>
    %cst_2 = arith.constant 0.000000e+00 : f32
    %cst_3 = arith.constant -1.000000e+09 : f32
    %9 = vector.broadcast %cst_2 : f32 to vector<8x8xf32>
    %10 = vector.broadcast %cst_3 : f32 to vector<8x8xf32>
    %11 = arith.select %8, %9, %10 : vector<8x8xi1>, vector<8x8xf32>
    %c0_4 = arith.constant 0 : index
    %c0_5 = arith.constant 0 : index
    %12 = vector.load %arg3[%c0_4, %c0_5] : memref<8x32xf32, #tpu.memory_space<vmem>>, vector<8x32xf32>
    %c0_6 = arith.constant 0 : index
    %c0_7 = arith.constant 0 : index
    %13 = vector.load %arg4[%c0_6, %c0_7] : memref<8x32xf32, #tpu.memory_space<vmem>>, vector<8x32xf32>
    %c0_8 = arith.constant 0 : index
    %c0_9 = arith.constant 0 : index
    %c0_10 = arith.constant 0 : index
    %14 = vector.load %arg1[%c0_8, %c0_9, %c0_10] : memref<1x8x32xf32, #tpu.memory_space<vmem>>, vector<1x8x32xf32>
    %15 = vector.shape_cast %14 : vector<1x8x32xf32> to vector<8x32xf32>
    %c0_i32 = arith.constant 0 : i32
    %16 = arith.index_cast %c0_i32 : i32 to index
    %c0_11 = arith.constant 0 : index
    %c0_12 = arith.constant 0 : index
    %17 = vector.load %arg6[%16, %c0_11, %c0_12] : memref<2x1x32xf32, #tpu.memory_space<vmem>>, vector<1x1x32xf32>
    %18 = vector.shape_cast %17 : vector<1x1x32xf32> to vector<1x32xf32>
    %19 = arith.mulf %15, %15 : vector<8x32xf32>
    %cst_13 = arith.constant dense<0.000000e+00> : vector<8xf32>
    %20 = vector.multi_reduction <add>, %19, %cst_13 [1] : vector<8x32xf32> to vector<8xf32>
    %21 = vector.shape_cast %20 : vector<8xf32> to vector<8x1xf32>
    %cst_14 = arith.constant 3.200000e+01 : f32
    %22 = vector.broadcast %cst_14 : f32 to vector<8x1xf32>
    %23 = arith.divf %21, %22 : vector<8x1xf32>
    %cst_15 = arith.constant 9.99999974E-6 : f32
    %24 = vector.broadcast %cst_15 : f32 to vector<8x1xf32>
    %25 = arith.addf %23, %24 : vector<8x1xf32>
    %26 = math.rsqrt %25 : vector<8x1xf32>
    %27 = vector.broadcast %26 : vector<8x1xf32> to vector<8x32xf32>
    %28 = arith.mulf %15, %27 : vector<8x32xf32>
    %29 = vector.broadcast %18 : vector<1x32xf32> to vector<8x32xf32>
    %30 = arith.mulf %28, %29 : vector<8x32xf32>
    %31 = arith.truncf %30 : vector<8x32xf32> to vector<8x32xbf16>
    %32 = arith.index_cast %c0_i32 : i32 to index
    %c0_16 = arith.constant 0 : index
    %c0_17 = arith.constant 0 : index
    %33 = vector.load %arg7[%32, %c0_16, %c0_17] : memref<2x32x640xbf16, #tpu.memory_space<vmem>>, vector<1x32x640xbf16>
    %34 = vector.shape_cast %33 : vector<1x32x640xbf16> to vector<32x640xbf16>
    %cst_18 = arith.constant dense<0.000000e+00> : vector<8x640xf32>
    %35 = tpu.matmul %31, %34, %cst_18 {dimension_numbers = #tpu.dot_dimension_numbers<[1], [0], [0], [1], [0, 0, 1, 1], [], []>} : vector<8x32xbf16>, vector<32x640xbf16>, vector<8x640xf32> -> vector<8x640xf32>
    %36 = vector.extract_strided_slice %35 {offsets = [0, 0], sizes = [8, 32], strides = [1, 1]} : vector<8x640xf32> to vector<8x32xf32>
    %37 = arith.mulf %36, %12 : vector<8x32xf32>
    %38 = vector.extract_strided_slice %35 {offsets = [0, 384], sizes = [8, 32], strides = [1, 1]} : vector<8x640xf32> to vector<8x32xf32>
    %39 = arith.mulf %38, %13 : vector<8x32xf32>
    %40 = arith.addf %37, %39 : vector<8x32xf32>
    %41 = vector.extract_strided_slice %35 {offsets = [0, 128], sizes = [8, 32], strides = [1, 1]} : vector<8x640xf32> to vector<8x32xf32>
    %42 = arith.mulf %41, %12 : vector<8x32xf32>
    %43 = vector.extract_strided_slice %35 {offsets = [0, 512], sizes = [8, 32], strides = [1, 1]} : vector<8x640xf32> to vector<8x32xf32>
    %44 = arith.mulf %43, %13 : vector<8x32xf32>
    %45 = arith.addf %42, %44 : vector<8x32xf32>
    %46 = vector.extract_strided_slice %35 {offsets = [0, 256], sizes = [8, 32], strides = [1, 1]} : vector<8x640xf32> to vector<8x32xf32>
    %47 = vector.shape_cast %40 : vector<8x32xf32> to vector<8x4x8xf32>
    %48 = vector.shape_cast %45 : vector<8x32xf32> to vector<8x4x8xf32>
    %49 = vector.shape_cast %46 : vector<8x32xf32> to vector<8x4x8xf32>
    %50 = arith.truncf %47 : vector<8x4x8xf32> to vector<8x4x8xbf16>
    %51 = arith.truncf %48 : vector<8x4x8xf32> to vector<8x4x8xbf16>
    "tpu.trace_start"() <{level = 10 : i32, message = "qhd,khd->hqk"}> : () -> ()
    %cst_19 = arith.constant dense<0.000000e+00> : vector<4x8x8xf32>
    %52 = tpu.matmul %50, %51, %cst_19 {dimension_numbers = #tpu.dot_dimension_numbers<[2], [2], [0], [0], [0, 1, 0, 0, 1, 0], [1], [1]>} : vector<8x4x8xbf16>, vector<8x4x8xbf16>, vector<4x8x8xf32> -> vector<4x8x8xf32>
    "tpu.trace_stop"() : () -> ()
    %cst_20 = arith.constant 0.353553385 : f32
    %53 = vector.broadcast %cst_20 : f32 to vector<4x8x8xf32>
    %54 = arith.mulf %52, %53 : vector<4x8x8xf32>
    %55 = vector.shape_cast %11 : vector<8x8xf32> to vector<1x8x8xf32>
    %56 = vector.broadcast %55 : vector<1x8x8xf32> to vector<4x8x8xf32>
    %57 = arith.addf %54, %56 : vector<4x8x8xf32>
    %cst_21 = arith.constant dense<0xFF800000> : vector<4x8xf32>
    %58 = vector.multi_reduction <maximumf>, %57, %cst_21 [2] : vector<4x8x8xf32> to vector<4x8xf32>
    %59 = vector.shape_cast %58 : vector<4x8xf32> to vector<4x8x1xf32>
    %60 = vector.broadcast %59 : vector<4x8x1xf32> to vector<4x8x8xf32>
    %61 = arith.subf %57, %60 : vector<4x8x8xf32>
    %62 = math.exp %61 : vector<4x8x8xf32>
    %cst_22 = arith.constant dense<0.000000e+00> : vector<4x8xf32>
    %63 = vector.multi_reduction <add>, %62, %cst_22 [2] : vector<4x8x8xf32> to vector<4x8xf32>
    %64 = vector.shape_cast %63 : vector<4x8xf32> to vector<4x8x1xf32>
    %65 = tpu.reciprocal %64 {approx = true} : vector<4x8x1xf32> -> vector<4x8x1xf32>
    %66 = vector.broadcast %65 : vector<4x8x1xf32> to vector<4x8x8xf32>
    %67 = arith.mulf %62, %66 : vector<4x8x8xf32>
    %68 = arith.truncf %67 : vector<4x8x8xf32> to vector<4x8x8xbf16>
    %69 = arith.truncf %49 : vector<8x4x8xf32> to vector<8x4x8xbf16>
    "tpu.trace_start"() <{level = 10 : i32, message = "hqk,khd->qhd"}> : () -> ()
    %cst_23 = arith.constant dense<0.000000e+00> : vector<4x8x8xf32>
    %70 = tpu.matmul %69, %68, %cst_23 {dimension_numbers = #tpu.dot_dimension_numbers<[0], [2], [2], [1], [0, 1, 0, 2, 1, 1], [1], [0]>} : vector<8x4x8xbf16>, vector<4x8x8xbf16>, vector<4x8x8xf32> -> vector<4x8x8xf32>
    %71 = tpu.transpose %70, [2, 0, 1] : vector<4x8x8xf32> -> vector<8x4x8xf32>
    "tpu.trace_stop"() : () -> ()
    %72 = vector.shape_cast %71 : vector<8x4x8xf32> to vector<8x32xf32>
    %73 = arith.truncf %72 : vector<8x32xf32> to vector<8x32xbf16>
    %74 = arith.index_cast %c0_i32 : i32 to index
    %c0_24 = arith.constant 0 : index
    %c0_25 = arith.constant 0 : index
    %75 = vector.load %arg8[%74, %c0_24, %c0_25] : memref<2x32x32xbf16, #tpu.memory_space<vmem>>, vector<1x32x32xbf16>
    %76 = vector.shape_cast %75 : vector<1x32x32xbf16> to vector<32x32xbf16>
    %cst_26 = arith.constant dense<0.000000e+00> : vector<8x32xf32>
    %77 = tpu.matmul %73, %76, %cst_26 {dimension_numbers = #tpu.dot_dimension_numbers<[1], [0], [0], [1], [0, 0, 1, 1], [], []>} : vector<8x32xbf16>, vector<32x32xbf16>, vector<8x32xf32> -> vector<8x32xf32>
    %78 = arith.addf %15, %77 : vector<8x32xf32>
    %79 = arith.index_cast %c0_i32 : i32 to index
    %c0_27 = arith.constant 0 : index
    %c0_28 = arith.constant 0 : index
    %80 = vector.load %arg9[%79, %c0_27, %c0_28] : memref<2x1x32xf32, #tpu.memory_space<vmem>>, vector<1x1x32xf32>
    %81 = vector.shape_cast %80 : vector<1x1x32xf32> to vector<1x32xf32>
    %82 = arith.mulf %78, %78 : vector<8x32xf32>
    %cst_29 = arith.constant dense<0.000000e+00> : vector<8xf32>
    %83 = vector.multi_reduction <add>, %82, %cst_29 [1] : vector<8x32xf32> to vector<8xf32>
    %84 = vector.shape_cast %83 : vector<8xf32> to vector<8x1xf32>
    %cst_30 = arith.constant 3.200000e+01 : f32
    %85 = vector.broadcast %cst_30 : f32 to vector<8x1xf32>
    %86 = arith.divf %84, %85 : vector<8x1xf32>
    %cst_31 = arith.constant 9.99999974E-6 : f32
    %87 = vector.broadcast %cst_31 : f32 to vector<8x1xf32>
    %88 = arith.addf %86, %87 : vector<8x1xf32>
    %89 = math.rsqrt %88 : vector<8x1xf32>
    %90 = vector.broadcast %89 : vector<8x1xf32> to vector<8x32xf32>
    %91 = arith.mulf %78, %90 : vector<8x32xf32>
    %92 = vector.broadcast %81 : vector<1x32xf32> to vector<8x32xf32>
    %93 = arith.mulf %91, %92 : vector<8x32xf32>
    %94 = arith.truncf %93 : vector<8x32xf32> to vector<8x32xbf16>
    %95 = arith.index_cast %c0_i32 : i32 to index
    %c0_32 = arith.constant 0 : index
    %c0_33 = arith.constant 0 : index
    %96 = vector.load %arg10[%95, %c0_32, %c0_33] : memref<2x32x256xbf16, #tpu.memory_space<vmem>>, vector<1x32x256xbf16>
    %97 = vector.shape_cast %96 : vector<1x32x256xbf16> to vector<32x256xbf16>
    %cst_34 = arith.constant dense<0.000000e+00> : vector<8x256xf32>
    %98 = tpu.matmul %94, %97, %cst_34 {dimension_numbers = #tpu.dot_dimension_numbers<[1], [0], [0], [1], [0, 0, 1, 1], [], []>} : vector<8x32xbf16>, vector<32x256xbf16>, vector<8x256xf32> -> vector<8x256xf32>
    %99 = vector.extract_strided_slice %98 {offsets = [0, 0], sizes = [8, 64], strides = [1, 1]} : vector<8x256xf32> to vector<8x64xf32>
    %100 = vector.extract_strided_slice %98 {offsets = [0, 128], sizes = [8, 64], strides = [1, 1]} : vector<8x256xf32> to vector<8x64xf32>
    %cst_35 = arith.constant 0.000000e+00 : f32
    %101 = vector.broadcast %cst_35 : f32 to vector<8x64xf32>
    %102 = arith.subf %101, %99 : vector<8x64xf32>
    %103 = math.exp %102 : vector<8x64xf32>
    %cst_36 = arith.constant 1.000000e+00 : f32
    %104 = vector.broadcast %cst_36 : f32 to vector<8x64xf32>
    %105 = arith.addf %104, %103 : vector<8x64xf32>
    %106 = tpu.reciprocal %105 {approx = true} : vector<8x64xf32> -> vector<8x64xf32>
    %107 = arith.mulf %99, %106 : vector<8x64xf32>
    %108 = arith.mulf %107, %100 : vector<8x64xf32>
    %109 = arith.truncf %108 : vector<8x64xf32> to vector<8x64xbf16>
    %110 = arith.index_cast %c0_i32 : i32 to index
    %c0_37 = arith.constant 0 : index
    %c0_38 = arith.constant 0 : index
    %111 = vector.load %arg11[%110, %c0_37, %c0_38] : memref<2x64x32xbf16, #tpu.memory_space<vmem>>, vector<1x64x32xbf16>
    %112 = vector.shape_cast %111 : vector<1x64x32xbf16> to vector<64x32xbf16>
    %cst_39 = arith.constant dense<0.000000e+00> : vector<8x32xf32>
    %113 = tpu.matmul %109, %112, %cst_39 {dimension_numbers = #tpu.dot_dimension_numbers<[1], [0], [0], [1], [0, 0, 1, 1], [], []>} : vector<8x64xbf16>, vector<64x32xbf16>, vector<8x32xf32> -> vector<8x32xf32>
    %114 = arith.addf %78, %113 : vector<8x32xf32>
    %c1_i32 = arith.constant 1 : i32
    %115 = arith.index_cast %c1_i32 : i32 to index
    %c0_40 = arith.constant 0 : index
    %c0_41 = arith.constant 0 : index
    %116 = vector.load %arg6[%115, %c0_40, %c0_41] : memref<2x1x32xf32, #tpu.memory_space<vmem>>, vector<1x1x32xf32>
    %117 = vector.shape_cast %116 : vector<1x1x32xf32> to vector<1x32xf32>
    %118 = arith.mulf %114, %114 : vector<8x32xf32>
    %cst_42 = arith.constant dense<0.000000e+00> : vector<8xf32>
    %119 = vector.multi_reduction <add>, %118, %cst_42 [1] : vector<8x32xf32> to vector<8xf32>
    %120 = vector.shape_cast %119 : vector<8xf32> to vector<8x1xf32>
    %cst_43 = arith.constant 3.200000e+01 : f32
    %121 = vector.broadcast %cst_43 : f32 to vector<8x1xf32>
    %122 = arith.divf %120, %121 : vector<8x1xf32>
    %cst_44 = arith.constant 9.99999974E-6 : f32
    %123 = vector.broadcast %cst_44 : f32 to vector<8x1xf32>
    %124 = arith.addf %122, %123 : vector<8x1xf32>
    %125 = math.rsqrt %124 : vector<8x1xf32>
    %126 = vector.broadcast %125 : vector<8x1xf32> to vector<8x32xf32>
    %127 = arith.mulf %114, %126 : vector<8x32xf32>
    %128 = vector.broadcast %117 : vector<1x32xf32> to vector<8x32xf32>
    %129 = arith.mulf %127, %128 : vector<8x32xf32>
    %130 = arith.truncf %129 : vector<8x32xf32> to vector<8x32xbf16>
    %131 = arith.index_cast %c1_i32 : i32 to index
    %c0_45 = arith.constant 0 : index
    %c0_46 = arith.constant 0 : index
    %132 = vector.load %arg7[%131, %c0_45, %c0_46] : memref<2x32x640xbf16, #tpu.memory_space<vmem>>, vector<1x32x640xbf16>
    %133 = vector.shape_cast %132 : vector<1x32x640xbf16> to vector<32x640xbf16>
    %cst_47 = arith.constant dense<0.000000e+00> : vector<8x640xf32>
    %134 = tpu.matmul %130, %133, %cst_47 {dimension_numbers = #tpu.dot_dimension_numbers<[1], [0], [0], [1], [0, 0, 1, 1], [], []>} : vector<8x32xbf16>, vector<32x640xbf16>, vector<8x640xf32> -> vector<8x640xf32>
    %135 = vector.extract_strided_slice %134 {offsets = [0, 0], sizes = [8, 32], strides = [1, 1]} : vector<8x640xf32> to vector<8x32xf32>
    %136 = arith.mulf %135, %12 : vector<8x32xf32>
    %137 = vector.extract_strided_slice %134 {offsets = [0, 384], sizes = [8, 32], strides = [1, 1]} : vector<8x640xf32> to vector<8x32xf32>
    %138 = arith.mulf %137, %13 : vector<8x32xf32>
    %139 = arith.addf %136, %138 : vector<8x32xf32>
    %140 = vector.extract_strided_slice %134 {offsets = [0, 128], sizes = [8, 32], strides = [1, 1]} : vector<8x640xf32> to vector<8x32xf32>
    %141 = arith.mulf %140, %12 : vector<8x32xf32>
    %142 = vector.extract_strided_slice %134 {offsets = [0, 512], sizes = [8, 32], strides = [1, 1]} : vector<8x640xf32> to vector<8x32xf32>
    %143 = arith.mulf %142, %13 : vector<8x32xf32>
    %144 = arith.addf %141, %143 : vector<8x32xf32>
    %145 = vector.extract_strided_slice %134 {offsets = [0, 256], sizes = [8, 32], strides = [1, 1]} : vector<8x640xf32> to vector<8x32xf32>
    %146 = vector.shape_cast %139 : vector<8x32xf32> to vector<8x4x8xf32>
    %147 = vector.shape_cast %144 : vector<8x32xf32> to vector<8x4x8xf32>
    %148 = vector.shape_cast %145 : vector<8x32xf32> to vector<8x4x8xf32>
    %149 = arith.truncf %146 : vector<8x4x8xf32> to vector<8x4x8xbf16>
    %150 = arith.truncf %147 : vector<8x4x8xf32> to vector<8x4x8xbf16>
    "tpu.trace_start"() <{level = 10 : i32, message = "qhd,khd->hqk"}> : () -> ()
    %cst_48 = arith.constant dense<0.000000e+00> : vector<4x8x8xf32>
    %151 = tpu.matmul %149, %150, %cst_48 {dimension_numbers = #tpu.dot_dimension_numbers<[2], [2], [0], [0], [0, 1, 0, 0, 1, 0], [1], [1]>} : vector<8x4x8xbf16>, vector<8x4x8xbf16>, vector<4x8x8xf32> -> vector<4x8x8xf32>
    "tpu.trace_stop"() : () -> ()
    %cst_49 = arith.constant 0.353553385 : f32
    %152 = vector.broadcast %cst_49 : f32 to vector<4x8x8xf32>
    %153 = arith.mulf %151, %152 : vector<4x8x8xf32>
    %154 = vector.shape_cast %11 : vector<8x8xf32> to vector<1x8x8xf32>
    %155 = vector.broadcast %154 : vector<1x8x8xf32> to vector<4x8x8xf32>
    %156 = arith.addf %153, %155 : vector<4x8x8xf32>
    %cst_50 = arith.constant dense<0xFF800000> : vector<4x8xf32>
    %157 = vector.multi_reduction <maximumf>, %156, %cst_50 [2] : vector<4x8x8xf32> to vector<4x8xf32>
    %158 = vector.shape_cast %157 : vector<4x8xf32> to vector<4x8x1xf32>
    %159 = vector.broadcast %158 : vector<4x8x1xf32> to vector<4x8x8xf32>
    %160 = arith.subf %156, %159 : vector<4x8x8xf32>
    %161 = math.exp %160 : vector<4x8x8xf32>
    %cst_51 = arith.constant dense<0.000000e+00> : vector<4x8xf32>
    %162 = vector.multi_reduction <add>, %161, %cst_51 [2] : vector<4x8x8xf32> to vector<4x8xf32>
    %163 = vector.shape_cast %162 : vector<4x8xf32> to vector<4x8x1xf32>
    %164 = tpu.reciprocal %163 {approx = true} : vector<4x8x1xf32> -> vector<4x8x1xf32>
    %165 = vector.broadcast %164 : vector<4x8x1xf32> to vector<4x8x8xf32>
    %166 = arith.mulf %161, %165 : vector<4x8x8xf32>
    %167 = arith.truncf %166 : vector<4x8x8xf32> to vector<4x8x8xbf16>
    %168 = arith.truncf %148 : vector<8x4x8xf32> to vector<8x4x8xbf16>
    "tpu.trace_start"() <{level = 10 : i32, message = "hqk,khd->qhd"}> : () -> ()
    %cst_52 = arith.constant dense<0.000000e+00> : vector<4x8x8xf32>
    %169 = tpu.matmul %168, %167, %cst_52 {dimension_numbers = #tpu.dot_dimension_numbers<[0], [2], [2], [1], [0, 1, 0, 2, 1, 1], [1], [0]>} : vector<8x4x8xbf16>, vector<4x8x8xbf16>, vector<4x8x8xf32> -> vector<4x8x8xf32>
    %170 = tpu.transpose %169, [2, 0, 1] : vector<4x8x8xf32> -> vector<8x4x8xf32>
    "tpu.trace_stop"() : () -> ()
    %171 = vector.shape_cast %170 : vector<8x4x8xf32> to vector<8x32xf32>
    %172 = arith.truncf %171 : vector<8x32xf32> to vector<8x32xbf16>
    %173 = arith.index_cast %c1_i32 : i32 to index
    %c0_53 = arith.constant 0 : index
    %c0_54 = arith.constant 0 : index
    %174 = vector.load %arg8[%173, %c0_53, %c0_54] : memref<2x32x32xbf16, #tpu.memory_space<vmem>>, vector<1x32x32xbf16>
    %175 = vector.shape_cast %174 : vector<1x32x32xbf16> to vector<32x32xbf16>
    %cst_55 = arith.constant dense<0.000000e+00> : vector<8x32xf32>
    %176 = tpu.matmul %172, %175, %cst_55 {dimension_numbers = #tpu.dot_dimension_numbers<[1], [0], [0], [1], [0, 0, 1, 1], [], []>} : vector<8x32xbf16>, vector<32x32xbf16>, vector<8x32xf32> -> vector<8x32xf32>
    %177 = arith.addf %114, %176 : vector<8x32xf32>
    %178 = arith.index_cast %c1_i32 : i32 to index
    %c0_56 = arith.constant 0 : index
    %c0_57 = arith.constant 0 : index
    %179 = vector.load %arg9[%178, %c0_56, %c0_57] : memref<2x1x32xf32, #tpu.memory_space<vmem>>, vector<1x1x32xf32>
    %180 = vector.shape_cast %179 : vector<1x1x32xf32> to vector<1x32xf32>
    %181 = arith.mulf %177, %177 : vector<8x32xf32>
    %cst_58 = arith.constant dense<0.000000e+00> : vector<8xf32>
    %182 = vector.multi_reduction <add>, %181, %cst_58 [1] : vector<8x32xf32> to vector<8xf32>
    %183 = vector.shape_cast %182 : vector<8xf32> to vector<8x1xf32>
    %cst_59 = arith.constant 3.200000e+01 : f32
    %184 = vector.broadcast %cst_59 : f32 to vector<8x1xf32>
    %185 = arith.divf %183, %184 : vector<8x1xf32>
    %cst_60 = arith.constant 9.99999974E-6 : f32
    %186 = vector.broadcast %cst_60 : f32 to vector<8x1xf32>
    %187 = arith.addf %185, %186 : vector<8x1xf32>
    %188 = math.rsqrt %187 : vector<8x1xf32>
    %189 = vector.broadcast %188 : vector<8x1xf32> to vector<8x32xf32>
    %190 = arith.mulf %177, %189 : vector<8x32xf32>
    %191 = vector.broadcast %180 : vector<1x32xf32> to vector<8x32xf32>
    %192 = arith.mulf %190, %191 : vector<8x32xf32>
    %193 = arith.truncf %192 : vector<8x32xf32> to vector<8x32xbf16>
    %194 = arith.index_cast %c1_i32 : i32 to index
    %c0_61 = arith.constant 0 : index
    %c0_62 = arith.constant 0 : index
    %195 = vector.load %arg10[%194, %c0_61, %c0_62] : memref<2x32x256xbf16, #tpu.memory_space<vmem>>, vector<1x32x256xbf16>
    %196 = vector.shape_cast %195 : vector<1x32x256xbf16> to vector<32x256xbf16>
    %cst_63 = arith.constant dense<0.000000e+00> : vector<8x256xf32>
    %197 = tpu.matmul %193, %196, %cst_63 {dimension_numbers = #tpu.dot_dimension_numbers<[1], [0], [0], [1], [0, 0, 1, 1], [], []>} : vector<8x32xbf16>, vector<32x256xbf16>, vector<8x256xf32> -> vector<8x256xf32>
    %198 = vector.extract_strided_slice %197 {offsets = [0, 0], sizes = [8, 64], strides = [1, 1]} : vector<8x256xf32> to vector<8x64xf32>
    %199 = vector.extract_strided_slice %197 {offsets = [0, 128], sizes = [8, 64], strides = [1, 1]} : vector<8x256xf32> to vector<8x64xf32>
    %cst_64 = arith.constant 0.000000e+00 : f32
    %200 = vector.broadcast %cst_64 : f32 to vector<8x64xf32>
    %201 = arith.subf %200, %198 : vector<8x64xf32>
    %202 = math.exp %201 : vector<8x64xf32>
    %cst_65 = arith.constant 1.000000e+00 : f32
    %203 = vector.broadcast %cst_65 : f32 to vector<8x64xf32>
    %204 = arith.addf %203, %202 : vector<8x64xf32>
    %205 = tpu.reciprocal %204 {approx = true} : vector<8x64xf32> -> vector<8x64xf32>
    %206 = arith.mulf %198, %205 : vector<8x64xf32>
    %207 = arith.mulf %206, %199 : vector<8x64xf32>
    %208 = arith.truncf %207 : vector<8x64xf32> to vector<8x64xbf16>
    %209 = arith.index_cast %c1_i32 : i32 to index
    %c0_66 = arith.constant 0 : index
    %c0_67 = arith.constant 0 : index
    %210 = vector.load %arg11[%209, %c0_66, %c0_67] : memref<2x64x32xbf16, #tpu.memory_space<vmem>>, vector<1x64x32xbf16>
    %211 = vector.shape_cast %210 : vector<1x64x32xbf16> to vector<64x32xbf16>
    %cst_68 = arith.constant dense<0.000000e+00> : vector<8x32xf32>
    %212 = tpu.matmul %208, %211, %cst_68 {dimension_numbers = #tpu.dot_dimension_numbers<[1], [0], [0], [1], [0, 0, 1, 1], [], []>} : vector<8x64xbf16>, vector<64x32xbf16>, vector<8x32xf32> -> vector<8x32xf32>
    %213 = arith.addf %177, %212 : vector<8x32xf32>
    %c2_i32 = arith.constant 2 : i32
    %214 = vector.extract_strided_slice %213 {offsets = [0, 0], sizes = [1, 32], strides = [1, 1]} : vector<8x32xf32> to vector<1x32xf32>
    %c0_69 = arith.constant 0 : index
    %c0_70 = arith.constant 0 : index
    %215 = vector.load %arg12[%c0_69, %c0_70] : memref<1x32xf32, #tpu.memory_space<vmem>>, vector<1x32xf32>
    %216 = arith.mulf %214, %214 : vector<1x32xf32>
    %cst_71 = arith.constant dense<0.000000e+00> : vector<1xf32>
    %217 = vector.multi_reduction <add>, %216, %cst_71 [1] : vector<1x32xf32> to vector<1xf32>
    %218 = vector.shape_cast %217 : vector<1xf32> to vector<1x1xf32>
    %cst_72 = arith.constant 3.200000e+01 : f32
    %219 = vector.broadcast %cst_72 : f32 to vector<1x1xf32>
    %220 = arith.divf %218, %219 : vector<1x1xf32>
    %cst_73 = arith.constant 9.99999974E-6 : f32
    %221 = vector.broadcast %cst_73 : f32 to vector<1x1xf32>
    %222 = arith.addf %220, %221 : vector<1x1xf32>
    %223 = math.rsqrt %222 : vector<1x1xf32>
    %224 = vector.broadcast %223 : vector<1x1xf32> to vector<1x32xf32>
    %225 = arith.mulf %214, %224 : vector<1x32xf32>
    %226 = arith.mulf %225, %215 : vector<1x32xf32>
    %227 = arith.truncf %226 : vector<1x32xf32> to vector<1x32xbf16>
    %c0_74 = arith.constant 0 : index
    %c0_75 = arith.constant 0 : index
    %228 = vector.load %arg13[%c0_74, %c0_75] : memref<32x128xbf16, #tpu.memory_space<vmem>>, vector<32x128xbf16>
    %cst_76 = arith.constant dense<0.000000e+00> : vector<1x128xf32>
    %229 = tpu.matmul %227, %228, %cst_76 {dimension_numbers = #tpu.dot_dimension_numbers<[1], [0], [0], [1], [0, 0, 1, 1], [], []>} : vector<1x32xbf16>, vector<32x128xbf16>, vector<1x128xf32> -> vector<1x128xf32>
    %c0_77 = arith.constant 0 : index
    %c0_78 = arith.constant 0 : index
    %c0_79 = arith.constant 0 : index
    %230 = vector.load %arg5[%c0_77, %c0_78, %c0_79] : memref<1x1x4xf32, #tpu.memory_space<vmem>>, vector<1x1x4xf32>
    %231 = vector.shape_cast %230 : vector<1x1x4xf32> to vector<1x4xf32>
    %232 = arith.truncf %231 : vector<1x4xf32> to vector<1x4xbf16>
    %c0_80 = arith.constant 0 : index
    %c0_81 = arith.constant 0 : index
    %233 = vector.load %arg14[%c0_80, %c0_81] : memref<4x128xbf16, #tpu.memory_space<vmem>>, vector<4x128xbf16>
    %cst_82 = arith.constant dense<0.000000e+00> : vector<1x128xf32>
    %234 = tpu.matmul %232, %233, %cst_82 {dimension_numbers = #tpu.dot_dimension_numbers<[1], [0], [0], [1], [0, 0, 1, 1], [], []>} : vector<1x4xbf16>, vector<4x128xbf16>, vector<1x128xf32> -> vector<1x128xf32>
    %235 = arith.addf %229, %234 : vector<1x128xf32>
    %c0_83 = arith.constant 0 : index
    %c0_84 = arith.constant 0 : index
    %236 = vector.load %arg15[%c0_83, %c0_84] : memref<1x128xf32, #tpu.memory_space<vmem>>, vector<1x128xf32>
    %237 = arith.addf %235, %236 : vector<1x128xf32>
    %cst_85 = arith.constant 0.000000e+00 : f32
    %238 = vector.broadcast %cst_85 : f32 to vector<1x128xf32>
    %239 = arith.maximumf %237, %238 : vector<1x128xf32>
    %240 = arith.truncf %239 : vector<1x128xf32> to vector<1x128xbf16>
    %c0_86 = arith.constant 0 : index
    %c0_87 = arith.constant 0 : index
    %241 = vector.load %arg16[%c0_86, %c0_87] : memref<128x64xbf16, #tpu.memory_space<vmem>>, vector<128x64xbf16>
    %cst_88 = arith.constant dense<0.000000e+00> : vector<1x64xf32>
    %242 = tpu.matmul %240, %241, %cst_88 {dimension_numbers = #tpu.dot_dimension_numbers<[1], [0], [0], [1], [0, 0, 1, 1], [], []>} : vector<1x128xbf16>, vector<128x64xbf16>, vector<1x64xf32> -> vector<1x64xf32>
    %c0_89 = arith.constant 0 : index
    %c0_90 = arith.constant 0 : index
    %243 = vector.load %arg17[%c0_89, %c0_90] : memref<1x64xf32, #tpu.memory_space<vmem>>, vector<1x64xf32>
    %244 = arith.addf %242, %243 : vector<1x64xf32>
    %cst_91 = arith.constant 0.000000e+00 : f32
    %245 = vector.broadcast %cst_91 : f32 to vector<1x64xf32>
    %246 = arith.maximumf %244, %245 : vector<1x64xf32>
    %247 = arith.truncf %246 : vector<1x64xf32> to vector<1x64xbf16>
    %c0_92 = arith.constant 0 : index
    %c0_93 = arith.constant 0 : index
    %248 = vector.load %arg18[%c0_92, %c0_93] : memref<64x128xbf16, #tpu.memory_space<vmem>>, vector<64x128xbf16>
    %cst_94 = arith.constant dense<0.000000e+00> : vector<1x128xf32>
    %249 = tpu.matmul %247, %248, %cst_94 {dimension_numbers = #tpu.dot_dimension_numbers<[1], [0], [0], [1], [0, 0, 1, 1], [], []>} : vector<1x64xbf16>, vector<64x128xbf16>, vector<1x128xf32> -> vector<1x128xf32>
    %c0_95 = arith.constant 0 : index
    %c0_96 = arith.constant 0 : index
    %250 = vector.load %arg19[%c0_95, %c0_96] : memref<1x128xf32, #tpu.memory_space<vmem>>, vector<1x128xf32>
    %251 = arith.addf %249, %250 : vector<1x128xf32>
    %c0_97 = arith.constant 0 : index
    %c0_98 = arith.constant 0 : index
    %c0_99 = arith.constant 0 : index
    %252 = vector.load %arg20[%c0_97, %c0_98, %c0_99] : memref<1x1x128xf32, #tpu.memory_space<vmem>>, vector<1x1x128xf32>
    %253 = vector.shape_cast %252 : vector<1x1x128xf32> to vector<1x128xf32>
    %254 = vector.shape_cast %251 : vector<1x128xf32> to vector<1x1x128xf32>
    tpu.vector_store %arg20[%c0_97, %c0_98, %c0_99], %254 {strides = array<i32>} : memref<1x1x128xf32, #tpu.memory_space<vmem>>, vector<1x1x128xf32>,
    return
  }
  func.func @transform_0(%arg0: i32) -> (i32, i32, i32) {
    %c0_i32 = arith.constant 0 : i32
    %c0_i32_0 = arith.constant 0 : i32
    %c0_i32_1 = arith.constant 0 : i32
    return %arg0, %c0_i32, %c0_i32_0 : i32, i32, i32
  }
  func.func @transform_1(%arg0: i32) -> (i32, i32, i32) {
    %c0_i32 = arith.constant 0 : i32
    %c0_i32_0 = arith.constant 0 : i32
    %c0_i32_1 = arith.constant 0 : i32
    return %arg0, %c0_i32, %c0_i32_0 : i32, i32, i32
  }
  func.func @transform_2(%arg0: i32) -> (i32, i32) {
    %c0_i32 = arith.constant 0 : i32
    %c0_i32_0 = arith.constant 0 : i32
    %c0_i32_1 = arith.constant 0 : i32
    return %c0_i32, %c0_i32_0 : i32, i32
  }
  func.func @transform_3(%arg0: i32) -> (i32, i32) {
    %c0_i32 = arith.constant 0 : i32
    %c0_i32_0 = arith.constant 0 : i32
    %c0_i32_1 = arith.constant 0 : i32
    return %c0_i32, %c0_i32_0 : i32, i32
  }
  func.func @transform_4(%arg0: i32) -> (i32, i32, i32) {
    %c0_i32 = arith.constant 0 : i32
    %c0_i32_0 = arith.constant 0 : i32
    %c0_i32_1 = arith.constant 0 : i32
    return %arg0, %c0_i32, %c0_i32_0 : i32, i32, i32
  }
  func.func @transform_5(%arg0: i32) -> (i32, i32, i32) {
    %c0_i32 = arith.constant 0 : i32
    %c0_i32_0 = arith.constant 0 : i32
    %c0_i32_1 = arith.constant 0 : i32
    %c0_i32_2 = arith.constant 0 : i32
    return %c0_i32, %c0_i32_0, %c0_i32_1 : i32, i32, i32
  }
  func.func @transform_6(%arg0: i32) -> (i32, i32, i32) {
    %c0_i32 = arith.constant 0 : i32
    %c0_i32_0 = arith.constant 0 : i32
    %c0_i32_1 = arith.constant 0 : i32
    %c0_i32_2 = arith.constant 0 : i32
    return %c0_i32, %c0_i32_0, %c0_i32_1 : i32, i32, i32
  }
  func.func @transform_7(%arg0: i32) -> (i32, i32, i32) {
    %c0_i32 = arith.constant 0 : i32
    %c0_i32_0 = arith.constant 0 : i32
    %c0_i32_1 = arith.constant 0 : i32
    %c0_i32_2 = arith.constant 0 : i32
    return %c0_i32, %c0_i32_0, %c0_i32_1 : i32, i32, i32
  }
  func.func @transform_8(%arg0: i32) -> (i32, i32, i32) {
    %c0_i32 = arith.constant 0 : i32
    %c0_i32_0 = arith.constant 0 : i32
    %c0_i32_1 = arith.constant 0 : i32
    %c0_i32_2 = arith.constant 0 : i32
    return %c0_i32, %c0_i32_0, %c0_i32_1 : i32, i32, i32
  }
  func.func @transform_9(%arg0: i32) -> (i32, i32, i32) {
    %c0_i32 = arith.constant 0 : i32
    %c0_i32_0 = arith.constant 0 : i32
    %c0_i32_1 = arith.constant 0 : i32
    %c0_i32_2 = arith.constant 0 : i32
    return %c0_i32, %c0_i32_0, %c0_i32_1 : i32, i32, i32
  }
  func.func @transform_10(%arg0: i32) -> (i32, i32, i32) {
    %c0_i32 = arith.constant 0 : i32
    %c0_i32_0 = arith.constant 0 : i32
    %c0_i32_1 = arith.constant 0 : i32
    %c0_i32_2 = arith.constant 0 : i32
    return %c0_i32, %c0_i32_0, %c0_i32_1 : i32, i32, i32
  }
  func.func @transform_11(%arg0: i32) -> (i32, i32) {
    %c0_i32 = arith.constant 0 : i32
    %c0_i32_0 = arith.constant 0 : i32
    %c0_i32_1 = arith.constant 0 : i32
    return %c0_i32, %c0_i32_0 : i32, i32
  }
  func.func @transform_12(%arg0: i32) -> (i32, i32) {
    %c0_i32 = arith.constant 0 : i32
    %c0_i32_0 = arith.constant 0 : i32
    %c0_i32_1 = arith.constant 0 : i32
    return %c0_i32, %c0_i32_0 : i32, i32
  }
  func.func @transform_13(%arg0: i32) -> (i32, i32) {
    %c0_i32 = arith.constant 0 : i32
    %c0_i32_0 = arith.constant 0 : i32
    %c0_i32_1 = arith.constant 0 : i32
    return %c0_i32, %c0_i32_0 : i32, i32
  }
  func.func @transform_14(%arg0: i32) -> (i32, i32) {
    %c0_i32 = arith.constant 0 : i32
    %c0_i32_0 = arith.constant 0 : i32
    %c0_i32_1 = arith.constant 0 : i32
    return %c0_i32, %c0_i32_0 : i32, i32
  }
  func.func @transform_15(%arg0: i32) -> (i32, i32) {
    %c0_i32 = arith.constant 0 : i32
    %c0_i32_0 = arith.constant 0 : i32
    %c0_i32_1 = arith.constant 0 : i32
    return %c0_i32, %c0_i32_0 : i32, i32
  }
  func.func @transform_16(%arg0: i32) -> (i32, i32) {
    %c0_i32 = arith.constant 0 : i32
    %c0_i32_0 = arith.constant 0 : i32
    %c0_i32_1 = arith.constant 0 : i32
    return %c0_i32, %c0_i32_0 : i32, i32
  }
  func.func @transform_17(%arg0: i32) -> (i32, i32) {
    %c0_i32 = arith.constant 0 : i32
    %c0_i32_0 = arith.constant 0 : i32
    %c0_i32_1 = arith.constant 0 : i32
    return %c0_i32, %c0_i32_0 : i32, i32
  }
  func.func @transform_18(%arg0: i32) -> (i32, i32) {
    %c0_i32 = arith.constant 0 : i32
    %c0_i32_0 = arith.constant 0 : i32
    %c0_i32_1 = arith.constant 0 : i32
    return %c0_i32, %c0_i32_0 : i32, i32
  }
  func.func @transform_19(%arg0: i32) -> (i32, i32, i32) {
    %c0_i32 = arith.constant 0 : i32
    %c0_i32_0 = arith.constant 0 : i32
    %c0_i32_1 = arith.constant 0 : i32
    return %arg0, %c0_i32, %c0_i32_0 : i32, i32, i32
  }
}

</mosaic_0001>

<bundles_post_ra>
// kernel: tile.19
= control target key start
LH: loop header
LB: loop body
LE: loop exit
PB: predicated region body
PF: predicated region fallthrough
CT: control target
= control target key end

     0   :  { %vm42_vm0 = vcmask 1047556   ;;  %vm44_vm1 = vcmask 64512   ;;  %s93_s22 = smov 8   ;;  %s94_s25 = smov 16   ;;  %vm54_vm2 = vcmask 261312   ;;  %vm64_vm3 = vcmask 195712   ;;  %s146_s0 = inlined_call_operand.vmem [shape: f32[8,4,8], index: 0, kind: input, shape index: {}]   ;;  %s147_s1 = inlined_call_operand.vmem [shape: f32[8,32], index: 1, kind: output, shape index: {}]  }
   0x1   :  { %v82_v0 = vld [vmem:[%s146_s0 + $0x1c] sm:$0xf]  ;;  %v83_v1 = vld [vmem:[%s146_s0 + $0x18] sm:$0xf]  ;;  %v84_v2 = vld [vmem:[%s146_s0 + $0x14] sm:$0xf] }
   0x2   :  { %8 = vst [vmem:[#allocation0 + $0x38] sm:$0xf] %v82_v0  ;;  %13 = vst [vmem:[#allocation0 + $0x30] sm:$0xf] %v83_v1  ;;  %v85_v3 = vld [vmem:[%s146_s0 + $0x10] sm:$0xf] }
   0x3   :  { %18 = vst [vmem:[#allocation0 + $0x28] sm:$0xf] %v84_v2  ;;  %v86_v4 = vld [vmem:[%s146_s0 + $0xc] sm:$0xf]  ;;  %v87_v5 = vld [vmem:[%s146_s0 + $0x8] sm:$0xf] }
   0x4   :  { %23 = vst [vmem:[#allocation0 + $0x20] sm:$0xf] %v85_v3  ;;  %28 = vst [vmem:[#allocation0 + $0x18] sm:$0xf] %v86_v4  ;;  %v88_v6 = vld [vmem:[%s146_s0 + $0x4] sm:$0xf] }
   0x5   :  { %33 = vst [vmem:[#allocation0 + $0x10] sm:$0xf] %v87_v5  ;;  %v38_v7 = vld [vmem:[%s146_s0] sm:$0xf]  ;;  %37 = vst [vmem:[#allocation0 + $0x8] sm:$0xf] %v88_v6 }
   0x6   :  { %39 = vst [vmem:[#allocation0] sm:$0xf] %v38_v7  ;;  %s92_s0 = smov 24   ;;  %vm74_vm4 = vcmask 130112  }
   0xb   :  { %v49_v8 = vld [vmem:[#allocation0 + $0x3] ss:$8 sm:$0xf0]   ;;  %v59_v9 = vld [vmem:[#allocation0 + $0x2] ss:$8 sm:$0xf0]  }
   0xc   :  { %v69_v14 = vld [vmem:[#allocation0 + $0x1] ss:$8 sm:$0xf0]   ;;  %v41_v17 = vld [vmem:[#allocation0] ss:$8 sm:$0xf0]  }
   0xd   :  { %v47_v10 = vld [vmem:[#allocation0 + $0x3] ss:$8 sm:$0xf]   ;;  %v57_v11 = vld [vmem:[#allocation0 + $0x2] ss:$8 sm:$0xf]  }
   0xe   :  { %v51_v12 = vsel %vm42_vm0, %v49_v8, %v47_v10  ;;  %v67_v13 = vld [vmem:[#allocation0 + $0x1] ss:$8 sm:$0xf]   ;;  %v40_v16 = vld [vmem:[#allocation0] ss:$8 sm:$0xf]   ;;  %v61_v18 = vsel %vm42_vm0, %v59_v9, %v57_v11 }
   0xf   :  { %52 = vrot.lane.b32.xlu0 %v51_v12, %s92_s0  ;;  %v71_v15 = vsel %vm42_vm0, %v69_v14, %v67_v13  ;;  %v43_v19 = vsel %vm42_vm0, %v41_v17, %v40_v16 }
  0x10   :  { %72 = vrot.lane.b32.xlu1 %v71_v15, %s93_s22  ;;  %45 = vst.msk [vmem:[%s147_s1] sm:$0xff] %vm44_vm1, %v43_v19  }
  0x13   :  { %62 = vrot.lane.b32.xlu0 %v61_v18, %s94_s25 }
  0x81   :  { %v53_v20 = vpop.permute.xlu0 %52  }
  0x82   :  { %55 = vst.msk [vmem:[%s147_s1] sm:$0xff] %vm54_vm2, %v53_v20   ;;  %v73_v21 = vpop.permute.xlu1 %72  }
  0x85   :  { %v63_v22 = vpop.permute.xlu0 %62  }
  0x86   :  { %65 = vst.msk [vmem:[%s147_s1] sm:$0xff] %vm64_vm3, %v63_v22  }
  0x87   :  { %75 = vst.msk [vmem:[%s147_s1] sm:$0xff] %vm74_vm4, %v73_v21  }

// kernel: forward.1
= control target key start
LH: loop header
LB: loop body
LE: loop exit
PB: predicated region body
PF: predicated region fallthrough
CT: control target
= control target key end

     0   :  { %s7049_s0 = inlined_call_operand.vmem [shape: f32[2,8,32], index: 0, kind: input, shape index: {}]   ;;  %s7050_s1 = inlined_call_operand.vmem [shape: f32[2,1,8], index: 1, kind: input, shape index: {}]   ;;  %s7051_s2 = inlined_call_operand.vmem [shape: f32[8,32], index: 2, kind: input, shape index: {}]   ;;  %s7052_s3 = inlined_call_operand.vmem [shape: f32[8,32], index: 3, kind: input, shape index: {}]   ;;  %s7053_s4 = inlined_call_operand.vmem [shape: f32[2,1,4], index: 4, kind: input, shape index: {}]   ;;  %s7054_s5 = inlined_call_operand.vmem [shape: f32[2,1,32], index: 5, kind: input, shape index: {}]   ;;  %s7055_s6 = inlined_call_operand.vmem [shape: bf16[2,32,640], index: 6, kind: input, shape index: {}]   ;;  %s7056_s7 = inlined_call_operand.vmem [shape: bf16[2,32,32], index: 7, kind: input, shape index: {}]   ;;  %s7057_s8 = inlined_call_operand.vmem [shape: f32[2,1,32], index: 8, kind: input, shape index: {}]   ;;  %s7058_s9 = inlined_call_operand.vmem [shape: bf16[2,32,256], index: 9, kind: input, shape index: {}]   ;;  %s7059_s10 = inlined_call_operand.vmem [shape: bf16[2,64,32], index: 10, kind: input, shape index: {}]   ;;  %s7060_s11 = inlined_call_operand.vmem [shape: f32[1,32], index: 11, kind: input, shape index: {}]   ;;  %s7061_s12 = inlined_call_operand.vmem [shape: bf16[32,128], index: 12, kind: input, shape index: {}]   ;;  %s7062_s13 = inlined_call_operand.vmem [shape: bf16[4,128], index: 13, kind: input, shape index: {}]   ;;  %s7063_s14 = inlined_call_operand.vmem [shape: f32[1,128], index: 14, kind: input, shape index: {}]   ;;  %s7064_s15 = inlined_call_operand.vmem [shape: bf16[128,64], index: 15, kind: input, shape index: {}]   ;;  %s7065_s16 = inlined_call_operand.vmem [shape: f32[1,64], index: 16, kind: input, shape index: {}]   ;;  %s7066_s17 = inlined_call_operand.vmem [shape: bf16[64,128], index: 17, kind: input, shape index: {}]   ;;  %s7067_s18 = inlined_call_operand.vmem [shape: f32[1,128], index: 18, kind: input, shape index: {}]   ;;  %s7068_s19 = inlined_call_operand.vmem [shape: f32[2,1,128], index: 19, kind: output, shape index: {}]  }
   0x1   :  { %7078 = sst [smem:[#allocation2_spill]] %s7049_s0  ;;  %s6302_s0 = smov 0  }
   0x2   :  { %7079 = sst [smem:[#allocation3_spill]] %s7050_s1 }
   0x3   :  { %7080 = sst [smem:[#allocation4_spill]] %s7051_s2 }
   0x4   :  { %7081 = sst [smem:[#allocation5_spill]] %s7052_s3 }
   0x5 LB: > { %s5633_s30 = sadd.s32 4294967295, %s6188_s0   ;;  %p5637_p0 = scmp.ge.s32.totalorder %s6188_s0, 1  ;;  %s6188_s0 = sphi %s6302_s0, %s29_s0  }
   0x6   : > { %p552_p1 = scmp.lt.s32.totalorder %s6188_s0, 3 }
   0x8   : > { %p553_p2 = pnand %p5637_p0, %p552_p1 }
   0x9   : > { %p611_p3 = scmp.lt.s32.totalorder (!%p553_p2), %s5633_s30, 1  ;;  %s7082_s22 = sld [smem:[#allocation2_spill]] (!%p553_p2)  ;;  %vm645_vm0 = vcmask (!%p553_p2), 261120   ;;  %v6063_v3 = vld [vmem:[%s7055_s6 + $0x4] ss:$20 sps:$4 sm:$0xff] (!%p553_p2)   ;;  %v6190_v5 = vmov (!%p553_p2), 0.0   ;;  %v625_v43 = vlaneseq (!%p553_p2) }
   0xa   : > { %556 = sbr.rel (%p553_p2) target bundleno = 6312 (0x18a8), region = 96  ;;  %v6065_v4 = vld [vmem:[%s7055_s6] ss:$20 sps:$4 sm:$0xff] (!%p553_p2)   ;;  %5845 = vmatprep.subr.bf16.mxu0 (!%p553_p2), %v6190_v5  ;;  %v6066_v6 = vld [vmem:[%s7055_s6 + $0x10] ss:$20 sps:$4 sm:$0xff] (!%p553_p2)   ;;  %v6191_v8 = vmov (!%p553_p2), 0   ;;  %729 = vmatprep.subr.bf16.mxu1 (!%p553_p2), %v6063_v3 }
   0xb   : > { %v6067_v7 = vld [vmem:[%s7055_s6 + $0x2c] ss:$20 sps:$4 sm:$0xff] (!%p553_p2)   ;;  %761 = vmatprep.mubr.bf16.mxu1 (!%p553_p2), %v6191_v8  ;;  %v6069_v9 = vld [vmem:[%s7055_s6 + $0x28] ss:$20 sps:$4 sm:$0xff] (!%p553_p2)   ;;  %730 = vmatpush1.bf16.msra.mxu1 (!%p553_p2), %v6065_v4  ;;  %vm6192_vm1 = vmmov (!%p553_p2), 0   ;;  %s7083_s23 = sld [smem:[#allocation5_spill]] (!%p553_p2) }
   0xc   : > { %5846 = vmatpush3.bf16.msra.mxu0 (!%p553_p2), %v6066_v6  ;;  %v6070_v10 = vld [vmem:[%s7055_s6 + $0x38] ss:$20 sps:$4 sm:$0xff] (!%p553_p2)   ;;  %731 = vmatprep.subr.bf16.mxu1 (!%p553_p2), %v6067_v7  ;;  %v5639_v16 = vld [vmem:[%s7054_s5] ss:$0 sm:$0xff] (!%p553_p2)  ;;  %v6071_v19 = vld [vmem:[%s7055_s6 + $0x8] ss:$20 sps:$4 sm:$0xff] (!%p553_p2)  }
   0xd   : > { %5847 = vmatprep.subr.bf16.mxu0 (!%p553_p2), %v6190_v5  ;;  %5849 = vmatprep.mubr.msk.bf16.mxu0 (!%p553_p2), %vm6192_vm1, %v6190_v5  ;;  %v6073_v11 = vld [vmem:[%s7055_s6 + $0xc] ss:$20 sps:$4 sm:$0xff] (!%p553_p2)   ;;  %v6076_v21 = vld [vmem:[%s7055_s6 + $0x34] ss:$20 sps:$4 sm:$0xff] (!%p553_p2)   ;;  %v6074_v22 = vld [vmem:[%s7055_s6 + $0x30] ss:$20 sps:$4 sm:$0xff] (!%p553_p2)  }
   0xe   : > { %s7084_s3 = sld [smem:[#allocation4_spill]] (!%p553_p2)  ;;  %s6193_s26 = smov (!%p553_p2), 112   ;;  %v6196_v44 = vmov (!%p553_p2), 1983009808   ;;  %v6197_v46 = vmov (!%p553_p2), 1934713408  }
   0xf   : > { %732 = vmatpush1.bf16.msra.mxu1 (!%p553_p2), %v6069_v9  ;;  %s7076_s27 = smov (!%p553_p2), 120   ;;  %s7074_s28 = smov (!%p553_p2), 104   ;;  %v870_v45 = vunpack.c.l.s4 (!%p553_p2), %v6196_v44  ;;  %v902_v47 = vunpack.c.l.s4 (!%p553_p2), %v6197_v46  ;;  %v6382_v48 = vshrl.u32 (!%p553_p2), %v625_v43, 7  ;;  %vm1591_vm2 = vcmask (!%p553_p2), 1043456  }
  0x10   : > { %5848 = vmatpush3.bf16.msra.mxu0 (!%p553_p2), %v6070_v10  ;;  %770 = vmatprep.subr.bf16.mxu1 (!%p553_p2), %v6073_v11  ;;  %vm1587_vm3 = vcmask (!%p553_p2), 64512   ;;  %s7085_s21 = sld [smem:[#allocation3_spill]] (!%p553_p2)  ;;  %vm2716_vm8 = vcmask (!%p553_p2), 130048   ;;  %vm2718_vm9 = vcmask (!%p553_p2), 195584   ;;  %vm2906_vm10 = vcmask (!%p553_p2), 523264   ;;  %s7086_s29 = smov (!%p553_p2), 120  }
  0x11   : > { %s7092_s30 = smov (!%p611_p3, %s5633_s30), 1  ;;  %5859 = vmatprep.subr.bf16.mxu0 %v6190_v5  ;;  %v641_v23 = vld [vmem:[%s7083_s23] sm:$0xff]  ;;  %v871_v49 = vunpack.c.0.s8 %v870_v45  ;;  %v903_v51 = vunpack.c.0.s8 %v902_v47  ;;  %s7090_s25 = smov 24   ;;  %vm5260_vm11 = vcmask 253952   ;;  %vm5281_vm12 = vcmask 1041408  }
  0x12   : > { %s5638_s20 = sshll.u32 %s7092_s30, 3  ;;  %vm5277_vm13 = vcmask 31744   ;;  %s623_s24 = scalar_lea.vmem %s7068_s19, %s7092_s30 }
  0x13   : > { %s6316_s2 = scalar_lea.vmem %s7082_s22, %s5638_s20  ;;  %v6385_v52 = vsub.s32 %v871_v49, %v6382_v48  ;;  %v6388_v59 = vsub.s32 %v903_v51, %v6382_v48  ;;  %s7073_s20 = smov 16  }
  0x14   : > { %v642_v0 = vld [vmem:[%s6316_s2] sm:$0xff] }
  0x15   : > { %v644_v1 = vmul.f32 %v642_v0, %v642_v0  ;;  %v640_v24 = vld [vmem:[%s7084_s3] sm:$0xff] }
  0x16   : > { %s617_s1 = scalar_lea.vmem %s7085_s21, %s7092_s30  ;;  %s7072_s21 = smov 8  }
  0x17   : > { %v646_v2 = vsel %vm645_vm0, %v644_v1, 0.0 }
  0x18   : > { %647 = vadd.xlane.f32.xlu0 %v646_v2 }
  0xa5   : > { %v648_v12 = vpop.xlane.xlu0 %647 }
  0xa6   : > { %v650_v13 = vmul.f32 0.03125, %v648_v12 }
  0xa8   : > { %v651_v14 = vadd.f32 1e-05, %v650_v13 }
  0xaa   : > { %6129 = vrsqrt.f32 %v651_v14 }
  0xb4   : > { %v6130_v15 = vpop.eup %6129 }
  0xb5   : > { %v653_v17 = vmul.f32 %v6130_v15, %v642_v0 }
  0xb7   : > { %v660_v18 = vmul.f32 %v5639_v16, %v653_v17 }
  0xb9   : > { %v661_v20 = vpack.c.bf16 %v660_v18, %v660_v18 }
  0xbb   : > { %5650 = vmatmul.mubr.msk.bf16.vlgmr.msra.gmra.mrb[0].mxu1 %vm645_vm0, %v661_v20  ;;  %5850 = vmatmul.mubr.msk.bf16.vlgmr.msra.gmra.mrb[0].mxu0 %vm645_vm0, %v661_v20 }
  0xbc   : > { %771 = vmatpush1.bf16.msra.mxu1 %v6071_v19  ;;  %802 = vmatprep.mubr.bf16.mxu1 %v6191_v8 }
  0xbd   : > { %772 = vmatprep.subr.bf16.mxu1 %v6076_v21  ;;  %5861 = vmatprep.mubr.msk.bf16.mxu0 %vm6192_vm1, %v6190_v5 }
  0xc0   : > { %773 = vmatpush1.bf16.msra.mxu1 %v6074_v22 }
  0xc1   : > { %5853 = vmatprep.subr.bf16.mxu1 %v6190_v5 }
  0xc3   : > { %5651 = vmatmul.mubr.msk.bf16.vlgmr.msra.gmra.mrb[4].mxu1 %vm645_vm0, %v661_v20 }
  0xc4   : > { %5855 = vmatprep.mubr.msk.bf16.mxu1 %vm6192_vm1, %v6190_v5 }
 0x18e   : > { %v763_v25 = vpop.f32.mrb[0].mxu1  ;;  %v845_v26 = vpop.f32.mrb[0].mxu0 }
 0x18f   : > { %v855_v27 = vmul.f32 %v845_v26, %v641_v23  ;;  %v765_v28 = vpop.f32.mrb[1].mxu1  ;;  %v5851_v29 = vpop.f32.mrb[1].mxu0  ;;  %v851_v38 = vmul.f32 %v763_v25, %v640_v24 }
 0x190   : > { %v854_v30 = vmul.f32 %v765_v28, %v640_v24  ;;  %v767_v31 = vpop.f32.mrb[2].mxu1  ;;  %v848_v32 = vpop.f32.mrb[2].mxu0 }
 0x191   : > { %v768_v33 = vpop.f32.mrb[3].mxu1  ;;  %v5852_v34 = vpop.f32.mrb[3].mxu0 }
 0x192   : > { %v856_v35 = vadd.f32 %v855_v27, %v854_v30 }
 0x194   : > { %939 = vrot.lane.b32.xlu1 %v856_v35, %s6193_s26  ;;  %936 = vrot.lane.b32.xlu0 %v856_v35, %s7076_s27 }
 0x196   : > { %v6376_v36 = vpop.f32.mrb[4].mxu1 }
 0x197   : > { %v806_v37 = vpop.f32.mrb[5].mxu1 }
 0x198   : > { %v852_v39 = vmul.f32 %v806_v37, %v641_v23  ;;  %942 = vrot.lane.b32.xlu1 %v856_v35, %s7074_s28  ;;  %v808_v40 = vpop.f32.mrb[6].mxu1 }
 0x199   : > { %v809_v41 = vpop.f32.mrb[7].mxu1 }
 0x19a   : > { %v6379_v42 = vadd.f32 %v852_v39, %v851_v38 }
 0x206   : > { %v940_v50 = vpop.permute.xlu1 %939  ;;  %v937_v55 = vpop.permute.xlu0 %936 }
 0x207   : > { %v945_v53 = vcombine.low %v856_v35, %v940_v50  ;;  %v946_v54 = vcombine.high %v856_v35, %v940_v50 }
 0x209   : > { %v953_v60 = vrot.slane %v945_v53, %v6385_v52  ;;  %v960_v61 = vrot.slane %v946_v54, %v6385_v52 }
 0x20a   : > { %v943_v56 = vpop.permute.xlu1 %942 }
 0x20b   : > { %v961_v57 = vcombine.low %v937_v55, %v943_v56  ;;  %v962_v58 = vcombine.high %v937_v55, %v943_v56 }
 0x20d   : > { %v969_v62 = vrot.slane %v961_v57, %v6385_v52  ;;  %v976_v63 = vrot.slane %v962_v58, %v6385_v52 }
 0x20f   : > { %v994_v0 = vcombine.high %v960_v61, %v976_v63  ;;  %v977_v1 = vcombine.low %v953_v60, %v969_v62  ;;  %v978_v2 = vcombine.high %v953_v60, %v969_v62  ;;  %v993_v6 = vcombine.low %v960_v61, %v976_v63 }
 0x211   : > { %v1008_v3 = vrot.slane %v994_v0, %v6388_v59  ;;  %v985_v4 = vrot.slane %v977_v1, %v6388_v59  ;;  %v992_v10 = vrot.slane %v978_v2, %v6388_v59  ;;  %v1001_v14 = vrot.slane %v993_v6, %v6388_v59 }
 0x213   : > { %v1105_v7 = vpack.c.bf16 %v1008_v3, %v1008_v3  ;;  %v1099_v9 = vpack.c.bf16 %v985_v4, %v985_v4  ;;  %v1009_v11 = vcombine.high %v985_v4, %v6190_v5  ;;  %v1101_v12 = vpack.c.bf16 %v992_v10, %v992_v10 }
 0x214   : > { %v1103_v15 = vpack.c.bf16 %v1001_v14, %v1001_v14  ;;  %v1010_v16 = vcombine.high %v992_v10, %v6190_v5  ;;  %v1011_v18 = vcombine.high %v1001_v14, %v6190_v5  ;;  %v1012_v20 = vcombine.high %v1008_v3, %v6190_v5 }
 0x215   : > { %1265 = vxpose.xlu0.c.b16.start.end [1/1] (short) (narrow) %v1105_v7, 16  ;;  %1169 = vxpose.xlu1.c.b16.start.end [1/1] (short) (narrow) %v1099_v9, 16  ;;  %v1100_v13 = vpack.c.bf16 %v1009_v11, %v1009_v11 }
 0x216   : > { %v1102_v17 = vpack.c.bf16 %v1010_v16, %v1010_v16  ;;  %v1104_v19 = vpack.c.bf16 %v1011_v18, %v1011_v18  ;;  %v1106_v21 = vpack.c.bf16 %v1012_v20, %v1012_v20 }
 0x219   : > { %1201 = vxpose.xlu1.c.b16.start.end [1/1] (short) (narrow) %v1101_v12, 16  ;;  %1185 = vxpose.xlu0.c.b16.start.end [1/1] (short) (narrow) %v1100_v13, 16 }
 0x21d   : > { %1233 = vxpose.xlu1.c.b16.start.end [1/1] (short) (narrow) %v1103_v15, 16 }
 0x221   : > { %1217 = vxpose.xlu1.c.b16.start.end [1/1] (short) (narrow) %v1102_v17, 16 }
 0x222   : > { %858 = vrot.lane.b32.xlu0 %v6379_v42, %s7076_s27 }
 0x225   : > { %1249 = vxpose.xlu1.c.b16.start.end [1/1] (short) (narrow) %v1104_v19, 16 }
 0x229   : > { %1281 = vxpose.xlu1.c.b16.start.end [1/1] (short) (narrow) %v1106_v21, 16 }
 0x22d   : > { %861 = vrot.lane.b32.xlu1 %v6379_v42, %s6193_s26 }
 0x231   : > { %864 = vrot.lane.b32.xlu1 %v6379_v42, %s7074_s28 }
 0x27b   : > { %v1177_v22 = vpop.trf.xlu1  ;;  %v1273_v25 = vpop.trf.xlu0 }
 0x27f   : > { %v1209_v23 = vpop.trf.xlu1  ;;  %v1193_v29 = vpop.trf.xlu0 }
 0x280   : > { %v1305_v30 = vcombine.low %v1209_v23, %v1273_v25 }
 0x282   : > { %v1312_v34 = vrot.slane %v1305_v30, %v6385_v52 }
 0x283   : > { %v1241_v24 = vpop.trf.xlu1 }
 0x284   : > { %v1297_v27 = vcombine.low %v1177_v22, %v1241_v24 }
 0x286   : > { %v1304_v31 = vrot.slane %v1297_v27, %v6385_v52 }
 0x287   : > { %v1225_v26 = vpop.trf.xlu1 }
 0x288   : > { %v1313_v37 = vcombine.low %v1304_v31, %v1312_v34  ;;  %v1314_v38 = vcombine.high %v1304_v31, %v1312_v34 }
 0x28a   : > { %v1321_v45 = vrot.slane %v1313_v37, %v6388_v59  ;;  %v1328_v46 = vrot.slane %v1314_v38, %v6388_v59 }
 0x28b   : > { %v1257_v28 = vpop.trf.xlu1 }
 0x28c   : > { %v1331_v32 = vcombine.low %v1193_v29, %v1257_v28  ;;  %v1369_v55 = vshrl.u32 %v1321_v45, 16  ;;  %v1329_v56 = vcombine.high %v1321_v45, %v6191_v8  ;;  %v1330_v62 = vcombine.high %v1328_v46, %v6191_v8 }
 0x28d   : > { %v1385_v63 = vshrl.u32 %v1328_v46, 16 }
 0x28e   : > { %v1338_v39 = vrot.slane %v1331_v32, %v6385_v52  ;;  %v1377_v3 = vshrl.u32 %v1329_v56, 16  ;;  %v1393_v7 = vshrl.u32 %v1330_v62, 16 }
 0x28f   : > { %v1289_v33 = vpop.trf.xlu1 }
 0x290   : > { %v1339_v35 = vcombine.low %v1225_v26, %v1289_v33 }
 0x292   : > { %v1346_v40 = vrot.slane %v1339_v35, %v6385_v52 }
 0x294   : > { %v1347_v41 = vcombine.low %v1338_v39, %v1346_v40  ;;  %v1348_v44 = vcombine.high %v1338_v39, %v1346_v40  ;;  %v859_v12 = vpop.permute.xlu0 %858 }
 0x296   : > { %v1355_v47 = vrot.slane %v1347_v41, %v6388_v59  ;;  %v1362_v49 = vrot.slane %v1348_v44, %v6388_v59 }
 0x298   : > { %v1383_v50 = vpack.i.b16 %v1362_v49, %v1328_v46  ;;  %v1367_v51 = vpack.i.b16 %v1355_v47, %v1321_v45  ;;  %v1370_v53 = vshrl.u32 %v1355_v47, 16  ;;  %v1363_v54 = vcombine.high %v1355_v47, %v6191_v8 }
 0x299   : > { %v1364_v60 = vcombine.high %v1362_v49, %v6191_v8  ;;  %v1386_v61 = vshrl.u32 %v1362_v49, 16 }
 0x29a   : > { %1461 = vxpose.xlu1.c.b16.start.end [1/1] (short) (narrow) %v1383_v50, 16  ;;  %1397 = vxpose.xlu0.c.b16.start.end [1/1] (short) (narrow) %v1367_v51, 16  ;;  %v1371_v57 = vpack.i.b16 %v1370_v53, %v1369_v55  ;;  %v1375_v58 = vpack.i.b16 %v1363_v54, %v1329_v56  ;;  %v1378_v2 = vshrl.u32 %v1363_v54, 16 }
 0x29b   : > { %v1391_v0 = vpack.i.b16 %v1364_v60, %v1330_v62  ;;  %v1387_v1 = vpack.i.b16 %v1386_v61, %v1385_v63  ;;  %v1394_v6 = vshrl.u32 %v1364_v60, 16 }
 0x29c   : > { %v1379_v4 = vpack.i.b16 %v1378_v2, %v1377_v3 }
 0x29d   : > { %v1395_v9 = vpack.i.b16 %v1394_v6, %v1393_v7 }
 0x29e   : > { %1413 = vxpose.xlu1.c.b16.start.end [1/1] (short) (narrow) %v1371_v57, 16  ;;  %1429 = vxpose.xlu0.c.b16.start.end [1/1] (short) (narrow) %v1375_v58, 16 }
 0x29f   : > { %v862_v10 = vpop.permute.xlu1 %861 }
 0x2a0   : > { %v867_v15 = vcombine.low %v6379_v42, %v862_v10  ;;  %v868_v16 = vcombine.high %v6379_v42, %v862_v10 }
 0x2a2   : > { %1493 = vxpose.xlu1.c.b16.start.end [1/1] (short) (narrow) %v1391_v0, 16  ;;  %1477 = vxpose.xlu0.c.b16.start.end [1/1] (short) (narrow) %v1387_v1, 16  ;;  %v875_v19 = vrot.slane %v867_v15, %v6385_v52  ;;  %v882_v20 = vrot.slane %v868_v16, %v6385_v52 }
 0x2a3   : > { %v865_v11 = vpop.permute.xlu1 %864 }
 0x2a4   : > { %v883_v13 = vcombine.low %v859_v12, %v865_v11  ;;  %v884_v14 = vcombine.high %v859_v12, %v865_v11 }
 0x2a6   : > { %1014 = vrot.lane.b32.xlu1 %v6376_v36, %s7076_s27  ;;  %1445 = vxpose.xlu0.c.b16.start.end [1/1] (short) (narrow) %v1379_v4, 16  ;;  %v891_v17 = vrot.slane %v883_v13, %v6385_v52  ;;  %v898_v18 = vrot.slane %v884_v14, %v6385_v52  ;;  %s620_s27 = scalar_lea.vmem %s7053_s4, %s7092_s30 }
 0x2a8   : > { %v899_v21 = vcombine.low %v875_v19, %v891_v17  ;;  %v900_v22 = vcombine.high %v875_v19, %v891_v17  ;;  %v915_v23 = vcombine.low %v882_v20, %v898_v18  ;;  %v916_v24 = vcombine.high %v882_v20, %v898_v18 }
 0x2aa   : > { %1020 = vrot.lane.b32.xlu1 %v6376_v36, %s7074_s28  ;;  %1509 = vxpose.xlu0.c.b16.start.end [1/1] (short) (narrow) %v1395_v9, 16  ;;  %v907_v27 = vrot.slane %v899_v21, %v6388_v59  ;;  %v914_v28 = vrot.slane %v900_v22, %v6388_v59  ;;  %v923_v42 = vrot.slane %v915_v23, %v6388_v59 }
 0x2ab   : > { %v930_v29 = vrot.slane %v916_v24, %v6388_v59 }
 0x2ac   : > { %v931_v32 = vcombine.high %v907_v27, %v6190_v5  ;;  %v932_v33 = vcombine.high %v914_v28, %v6190_v5  ;;  %v933_v34 = vcombine.high %v923_v42, %v6190_v5  ;;  %v5653_v47 = vpack.c.bf16 %v923_v42, %v907_v27 }
 0x2ad   : > { %v934_v35 = vcombine.high %v930_v29, %v6190_v5  ;;  %v5654_v49 = vpack.c.bf16 %v930_v29, %v914_v28 }
 0x2ae   : > { %v5655_v41 = vpack.c.bf16 %v933_v34, %v931_v32  ;;  %v1114_v56 = vrot.slane %v5653_v47, %v6385_v52 }
 0x2af   : > { %v5656_v44 = vpack.c.bf16 %v934_v35, %v932_v33  ;;  %v1122_v57 = vrot.slane %v5654_v49, %v6385_v52 }
 0x2b0   : > { %v1139_v51 = vrot.slane %v5655_v41, %v6385_v52  ;;  %v629_v41 = vld [vmem:[%s617_s1] sm:$0x1]  ;;  %s7071_s1 = smov 24  }
 0x2b1   : > { %v1147_v53 = vrot.slane %v5656_v44, %v6385_v52  ;;  %v1123_v1 = vcombine.low %v1114_v56, %v1122_v57  ;;  %vm630_vm4 = vcmp.gt.f32.partialorder %v629_v41, 0.5  ;;  %v635_v44 = vsub.s32 0, %v6382_v48 }
 0x2b3   : > { %1017 = vrot.lane.b32.xlu0 %v6376_v36, %s6193_s26  ;;  %v1148_v61 = vcombine.low %v1139_v51, %v1147_v53  ;;  %v1130_v7 = vrot.slane %v1123_v1, %v6388_v59 }
 0x2b5   : > { %v1155_v3 = vrot.slane %v1148_v61, %v6388_v59  ;;  %v1160_v22 = vshrl.u32 %v1130_v7, 16  ;;  %v1131_v42 = vcombine.high %v1130_v7, %v6191_v8 }
 0x2b7   : > { %v1161_v13 = vshrl.u32 %v1155_v3, 16  ;;  %v1159_v21 = vpack.i.b16 %v1155_v3, %v1130_v7  ;;  %v1166_v33 = vshrl.u32 %v1131_v42, 16 }
 0x300   : > { %v1469_v25 = vpop.trf.xlu1  ;;  %v1405_v26 = vpop.trf.xlu0 }
 0x301   : > { %v1525_v39 = vcombine.low %v1405_v26, %v1469_v25  ;;  %v1162_v25 = vpack.i.b16 %v1161_v13, %v1160_v22  ;;  %v1156_v26 = vcombine.high %v1155_v3, %v6191_v8 }
 0x303   : > { %v1532_v50 = vrot.slane %v1525_v39, %v6385_v52  ;;  %v1167_v29 = vshrl.u32 %v1156_v26, 16  ;;  %v1165_v32 = vpack.i.b16 %v1156_v26, %v1131_v42 }
 0x304   : > { %v1421_v30 = vpop.trf.xlu1  ;;  %v1437_v31 = vpop.trf.xlu0 }
 0x305   : > { %v1168_v35 = vpack.i.b16 %v1167_v29, %v1166_v33 }
 0x308   : > { %v1501_v37 = vpop.trf.xlu1  ;;  %v1485_v38 = vpop.trf.xlu0 }
 0x309   : > { %v1533_v40 = vcombine.low %v1437_v31, %v1501_v37  ;;  %v1550_v55 = vcombine.low %v1421_v30, %v1485_v38 }
 0x30b   : > { %v1540_v45 = vrot.slane %v1533_v40, %v6385_v52  ;;  %v1557_v63 = vrot.slane %v1550_v55, %v6385_v52 }
 0x30c   : > { %v1453_v46 = vpop.trf.xlu0 }
 0x30d   : > { %v1541_v54 = vcombine.low %v1532_v50, %v1540_v45  ;;  %v632_v45 = vsel %vm630_vm4, 1, %v6191_v8  ;;  %v6198_v50 = vmov -1e+09  }
 0x30e   : > { %v636_v47 = vrot.slane %v632_v45, %v635_v44 }
 0x30f   : > { %v1548_v62 = vrot.slane %v1541_v54, %v6388_v59 }
 0x310   : > { %v1517_v58 = vpop.trf.xlu0  ;;  %vm637_vm6 = vcmp.eq.s32.totalorder %v636_v47, 1 }
 0x311   : > { %v1558_v60 = vcombine.low %v1453_v46, %v1517_v58  ;;  %v1549_v4 = vcombine.high %v1548_v62, %v6191_v8  ;;  %v1578_v10 = vshrl.u32 %v1548_v62, 16  ;;  %v628_v46 = vand.u32 127, %v625_v43 }
 0x313   : > { %v1565_v0 = vrot.slane %v1558_v60, %v6385_v52  ;;  %v1584_v14 = vshrl.u32 %v1549_v4, 16  ;;  %vm631_vm5 = vcmp.ge.s32.totalorder %v6382_v48, %v628_v46 }
 0x314   : > { %vm638_vm7 = vmand %vm631_vm5, %vm637_vm6 }
 0x315   : > { %v1566_v2 = vcombine.low %v1557_v63, %v1565_v0  ;;  %v6501_v51 = vsel %vm638_vm7, 0.0, %v6198_v50 }
 0x317   : > { %v1573_v6 = vrot.slane %v1566_v2, %v6388_v59 }
 0x318   : > { %v6454_v15 = vpop.permute.xlu1 %1014 }
 0x319   : > { %v1577_v9 = vpack.i.b16 %v1573_v6, %v1548_v62  ;;  %v1579_v11 = vshrl.u32 %v1573_v6, 16  ;;  %v1574_v12 = vcombine.high %v1573_v6, %v6191_v8 }
 0x31b   : > { %v1593_v16 = vsel %vm1591_vm2, %v1577_v9, 0  ;;  %v1580_v17 = vpack.i.b16 %v1579_v11, %v1578_v10  ;;  %v1583_v18 = vpack.i.b16 %v1574_v12, %v1549_v4  ;;  %v1585_v19 = vshrl.u32 %v1574_v12, 16 }
 0x31c   : > { %5854 = vmatpush3.bf16.msra.mxu1 %v1593_v16  ;;  %v6465_v27 = vpop.permute.xlu1 %1020 }
 0x31d   : > { %v1639_v20 = vsel %vm1591_vm2, %v1580_v17, 0  ;;  %5865 = vmatprep.subr.bf16.mxu1 %v6190_v5  ;;  %v1586_v23 = vpack.i.b16 %v1585_v19, %v1584_v14  ;;  %v1685_v24 = vsel %vm1591_vm2, %v1583_v18, 0  ;;  %v1040_v30 = vcombine.high %v6454_v15, %v6465_v27 }
 0x31e   : > { %5860 = vmatpush3.bf16.msra.mxu0 %v1639_v20  ;;  %v1039_v12 = vcombine.low %v6454_v15, %v6465_v27 }
 0x31f   : > { %5856 = vmatmul.mubr.msk.bf16.vlgmr.msra.gmra.mrb[8].mxu1 %vm1587_vm3, %v1159_v21  ;;  %5871 = vmatprep.subr.bf16.mxu0 %v6190_v5  ;;  %v1731_v28 = vsel %vm1591_vm2, %v1586_v23, 0  ;;  %v6479_v37 = vrot.slane %v1040_v30, %v6385_v52 }
 0x320   : > { %5866 = vmatpush3.bf16.msra.mxu1 %v1685_v24  ;;  %5867 = vmatprep.mubr.msk.bf16.mxu1 %vm6192_vm1, %v6190_v5  ;;  %v1047_v14 = vrot.slane %v1039_v12, %v6385_v52 }
 0x321   : > { %5862 = vmatmul.mubr.msk.bf16.vlgmr.msra.gmra.mrb[4].mxu0 %vm1587_vm3, %v1162_v25  ;;  %5877 = vmatprep.subr.bf16.mxu1 %v6190_v5 }
 0x322   : > { %5872 = vmatpush3.bf16.msra.mxu0 %v1731_v28  ;;  %5873 = vmatprep.mubr.msk.bf16.mxu0 %vm6192_vm1, %v6190_v5 }
 0x323   : > { %5883 = vmatprep.subr.bf16.mxu0 %v6190_v5 }
 0x325   : > { %v1018_v31 = vpop.permute.xlu0 %1017 }
 0x326   : > { %v1024_v34 = vcombine.high %v6376_v36, %v1018_v31  ;;  %v1023_v11 = vcombine.low %v6376_v36, %v1018_v31 }
 0x327   : > { %5868 = vmatmul.mubr.msk.bf16.vlgmr.msra.gmra.mrb[12].mxu1 %vm1587_vm3, %v1165_v32 }
 0x328   : > { %v6482_v38 = vrot.slane %v1024_v34, %v6385_v52  ;;  %5879 = vmatprep.mubr.msk.bf16.mxu1 %vm6192_vm1, %v6190_v5  ;;  %v1031_v13 = vrot.slane %v1023_v11, %v6385_v52 }
 0x329   : > { %5874 = vmatmul.mubr.msk.bf16.vlgmr.msra.gmra.mrb[8].mxu0 %vm1587_vm3, %v1168_v35 }
 0x32a   : > { %v1071_v39 = vcombine.low %v6482_v38, %v6479_v37  ;;  %v1072_v40 = vcombine.high %v6482_v38, %v6479_v37  ;;  %5885 = vmatprep.mubr.msk.bf16.mxu0 %vm6192_vm1, %v6190_v5  ;;  %v1055_v16 = vcombine.low %v1031_v13, %v1047_v14  ;;  %v1056_v25 = vcombine.high %v1031_v13, %v1047_v14 }
 0x32c   : > { %v1063_v17 = vrot.slane %v1055_v16, %v6388_v59  ;;  %v1070_v26 = vrot.slane %v1056_v25, %v6388_v59  ;;  %v1079_v28 = vrot.slane %v1071_v39, %v6388_v59  ;;  %v1086_v30 = vrot.slane %v1072_v40, %v6388_v59 }
 0x32e   : > { %v1087_v18 = vcombine.high %v1063_v17, %v6190_v5  ;;  %v1829_v19 = vpack.c.bf16 %v1063_v17, %v1063_v17  ;;  %v1088_v27 = vcombine.high %v1070_v26, %v6190_v5  ;;  %v1089_v29 = vcombine.high %v1079_v28, %v6190_v5 }
 0x32f   : > { %v1831_v31 = vpack.c.bf16 %v1070_v26, %v1070_v26  ;;  %v1090_v33 = vcombine.high %v1086_v30, %v6190_v5  ;;  %v1833_v34 = vpack.c.bf16 %v1079_v28, %v1079_v28  ;;  %v1835_v39 = vpack.c.bf16 %v1086_v30, %v1086_v30 }
 0x330   : > { %v1830_v20 = vpack.c.bf16 %v1087_v18, %v1087_v18  ;;  %v1832_v42 = vpack.c.bf16 %v1088_v27, %v1088_v27  ;;  %v1834_v32 = vpack.c.bf16 %v1089_v29, %v1089_v29 }
 0x331   : > { %v1836_v35 = vpack.c.bf16 %v1090_v33, %v1090_v33 }
 0x3f2   : > { %v1629_v49 = vpop.f32.mrb[8].mxu1 }
 0x3f3   : > { %v1773_v53 = vmul.f32 0.35355338, %v1629_v49  ;;  %v5857_v54 = vpop.f32.mrb[9].mxu1 }
 0x3f4   : > { %v1632_v55 = vpop.f32.mrb[10].mxu1  ;;  %v1675_v56 = vpop.f32.mrb[4].mxu0 }
 0x3f5   : > { %v1774_v57 = vmul.f32 0.35355338, %v1675_v56  ;;  %v5858_v58 = vpop.f32.mrb[11].mxu1  ;;  %v5863_v60 = vpop.f32.mrb[5].mxu0  ;;  %v6504_v61 = vadd.f32 %v1773_v53, %v6501_v51 }
 0x3f6   : > { %v1678_v43 = vpop.f32.mrb[6].mxu0 }
 0x3f7   : > { %v5864_v62 = vpop.f32.mrb[7].mxu0  ;;  %v1781_v48 = vsel %vm1587_vm3, %v6504_v61, -inf  ;;  %v6509_v63 = vadd.f32 %v1774_v57, %v6501_v51 }
 0x3f8   : > { %1782 = vmax.xlane.f32.xlu1 %v1781_v48 }
 0x3f9   : > { %v1784_v0 = vsel %vm1587_vm3, %v6509_v63, -inf }
 0x3fa   : > { %1785 = vmax.xlane.f32.xlu0 %v1784_v0  ;;  %v1721_v1 = vpop.f32.mrb[12].mxu1 }
 0x3fb   : > { %v5869_v2 = vpop.f32.mrb[13].mxu1  ;;  %v1775_v21 = vmul.f32 0.35355338, %v1721_v1 }
 0x3fc   : > { %v1724_v3 = vpop.f32.mrb[14].mxu1  ;;  %v1767_v4 = vpop.f32.mrb[8].mxu0 }
 0x3fd   : > { %v5870_v6 = vpop.f32.mrb[15].mxu1  ;;  %v5875_v7 = vpop.f32.mrb[9].mxu0  ;;  %v1776_v22 = vmul.f32 0.35355338, %v1767_v4  ;;  %v6521_v36 = vadd.f32 %v1775_v21, %v6501_v51 }
 0x3fe   : > { %v1770_v9 = vpop.f32.mrb[10].mxu0 }
 0x3ff   : > { %v5876_v10 = vpop.f32.mrb[11].mxu0  ;;  %v6524_v15 = vadd.f32 %v1776_v22, %v6501_v51  ;;  %v1787_v23 = vsel %vm1587_vm3, %v6521_v36, -inf }
 0x401   : > { %v1790_v24 = vsel %vm1587_vm3, %v6524_v15, -inf }
 0x425   : > { %1837 = vxpose.xlu1.c.b16.start.end [1/1] (short) (narrow) %v1829_v19, 16 }
 0x427   : > { %1853 = vxpose.xlu0.c.b16.start.end [1/1] (short) (narrow) %v1830_v20, 16 }
 0x432   : > { %1788 = vmax.xlane.f32.xlu1 %v1787_v23 }
 0x434   : > { %1791 = vmax.xlane.f32.xlu0 %v1790_v24 }
 0x45f   : > { %1885 = vxpose.xlu1.c.b16.start.end [1/1] (short) (narrow) %v1832_v42, 16 }
 0x461   : > { %1869 = vxpose.xlu0.c.b16.start.end [1/1] (short) (narrow) %v1831_v31, 16 }
 0x463   : > { %1917 = vxpose.xlu1.c.b16.start.end [1/1] (short) (narrow) %v1834_v32, 16 }
 0x465   : > { %1901 = vxpose.xlu0.c.b16.start.end [1/1] (short) (narrow) %v1833_v34, 16 }
 0x467   : > { %1949 = vxpose.xlu1.c.b16.start.end [1/1] (short) (narrow) %v1836_v35, 16 }
 0x469   : > { %1933 = vxpose.xlu0.c.b16.start.end [1/1] (short) (narrow) %v1835_v39, 16 }
 0x485   : > { %v1783_v41 = vpop.xlane.xlu1 %1782 }
 0x486   : > { %v1793_v13 = vsub.f32 %v6504_v61, %v1783_v41 }
 0x487   : > { %v1786_v44 = vpop.xlane.xlu0 %1785 }
 0x488   : > { %v1794_v18 = vsub.f32 %v6509_v63, %v1786_v44  ;;  %v1797_v22 = vmul.f32 1.442695, %v1793_v13 }
 0x48a   : > { %v1799_v26 = vmul.f32 1.442695, %v1794_v18  ;;  %6131 = vpow2.f32 %v1797_v22 }
 0x48b   : > { %v1845_v45 = vpop.trf.xlu1 }
 0x48c   : > { %6133 = vpow2.f32 %v1799_v26 }
 0x48d   : > { %v1861_v46 = vpop.trf.xlu0 }
 0x494   : > { %v6132_v30 = vpop.eup %6131 }
 0x495   : > { %v1805_v31 = vsel %vm1587_vm3, %v6132_v30, 0.0 }
 0x4bf   : > { %v1789_v47 = vpop.xlane.xlu1 %1788 }
 0x4c0   : > { %v1795_v23 = vsub.f32 %v6521_v36, %v1789_v47  ;;  %v6134_v36 = vpop.eup %6133 }
 0x4c1   : > { %v1792_v37 = vpop.xlane.xlu0 %1791 }
 0x4c2   : > { %v1796_v61 = vsub.f32 %v6524_v15, %v1792_v37  ;;  %v1801_v42 = vmul.f32 1.442695, %v1795_v23  ;;  %v1808_v15 = vsel %vm1587_vm3, %v6134_v36, 0.0 }
 0x4c4   : > { %v1803_v29 = vmul.f32 1.442695, %v1796_v61  ;;  %6135 = vpow2.f32 %v1801_v42 }
 0x4c5   : > { %v1893_v38 = vpop.trf.xlu1 }
 0x4c6   : > { %6137 = vpow2.f32 %v1803_v29 }
 0x4c7   : > { %v1877_v40 = vpop.trf.xlu0 }
 0x4c9   : > { %v1925_v49 = vpop.trf.xlu1 }
 0x4ca   : > { %v1999_v53 = vcombine.low %v1861_v46, %v1925_v49 }
 0x4cb   : > { %v1909_v50 = vpop.trf.xlu0 }
 0x4cc   : > { %v1965_v55 = vcombine.low %v1845_v45, %v1909_v50  ;;  %v2006_v58 = vrot.slane %v1999_v53, %v6385_v52 }
 0x4cd   : > { %v1957_v54 = vpop.trf.xlu1 }
 0x4ce   : > { %v2007_v56 = vcombine.low %v1893_v38, %v1957_v54  ;;  %v1972_v62 = vrot.slane %v1965_v55, %v6385_v52  ;;  %v6136_v32 = vpop.eup %6135 }
 0x4cf   : > { %v1941_v57 = vpop.trf.xlu0  ;;  %v1811_v34 = vsel %vm1587_vm3, %v6136_v32, 0.0 }
 0x4d0   : > { %v2014_v60 = vrot.slane %v2007_v56, %v6385_v52  ;;  %v1973_v43 = vcombine.low %v1877_v40, %v1941_v57  ;;  %v6138_v33 = vpop.eup %6137 }
 0x4d1   : > { %v1814_v35 = vsel %vm1587_vm3, %v6138_v33, 0.0 }
 0x4d2   : > { %v2015_v48 = vcombine.low %v2006_v58, %v2014_v60  ;;  %v1980_v0 = vrot.slane %v1973_v43, %v6385_v52  ;;  %v2016_v6 = vcombine.high %v2006_v58, %v2014_v60 }
 0x4d4   : > { %v1981_v1 = vcombine.low %v1972_v62, %v1980_v0  ;;  %v2023_v2 = vrot.slane %v2015_v48, %v6388_v59  ;;  %v1982_v3 = vcombine.high %v1972_v62, %v1980_v0  ;;  %v2030_v21 = vrot.slane %v2016_v6, %v6388_v59 }
 0x4d6   : > { %v1989_v4 = vrot.slane %v1981_v1, %v6388_v59  ;;  %v2038_v7 = vshrl.u32 %v2023_v2, 16  ;;  %v2031_v12 = vcombine.high %v2023_v2, %v6191_v8  ;;  %v1996_v17 = vrot.slane %v1982_v3, %v6388_v59 }
 0x4d7   : > { %v2054_v28 = vshrl.u32 %v2030_v21, 16  ;;  %v2032_v41 = vcombine.high %v2030_v21, %v6191_v8 }
 0x4d8   : > { %v2035_v9 = vpack.i.b16 %v2023_v2, %v1989_v4  ;;  %v2037_v10 = vshrl.u32 %v1989_v4, 16  ;;  %v1997_v11 = vcombine.high %v1989_v4, %v6191_v8  ;;  %v2046_v20 = vshrl.u32 %v2031_v12, 16 }
 0x4d9   : > { %v2053_v25 = vshrl.u32 %v1996_v17, 16  ;;  %v2051_v27 = vpack.i.b16 %v2030_v21, %v1996_v17  ;;  %v1998_v39 = vcombine.high %v1996_v17, %v6191_v8  ;;  %v2062_v46 = vshrl.u32 %v2032_v41, 16 }
 0x4da   : > { %2065 = vxpose.xlu0.c.b16.start.end [1/1] (short) (narrow) %v2035_v9, 16  ;;  %v2039_v14 = vpack.i.b16 %v2038_v7, %v2037_v10  ;;  %v2045_v16 = vshrl.u32 %v1997_v11, 16  ;;  %v2043_v19 = vpack.i.b16 %v2031_v12, %v1997_v11 }
 0x4db   : > { %v2055_v63 = vpack.i.b16 %v2054_v28, %v2053_v25  ;;  %v2061_v44 = vshrl.u32 %v1998_v39, 16  ;;  %v2059_v45 = vpack.i.b16 %v2032_v41, %v1998_v39 }
 0x4dc   : > { %2081 = vxpose.xlu1.c.b16.start.end [1/1] (short) (narrow) %v2039_v14, 16  ;;  %v2047_v24 = vpack.i.b16 %v2046_v20, %v2045_v16 }
 0x4dd   : > { %v2063_v47 = vpack.i.b16 %v2062_v46, %v2061_v44 }
 0x4de   : > { %2097 = vxpose.xlu0.c.b16.start.end [1/1] (short) (narrow) %v2043_v19, 16 }
 0x4e0   : > { %2113 = vxpose.xlu1.c.b16.start.end [1/1] (short) (narrow) %v2047_v24, 16 }
 0x4e2   : > { %2129 = vxpose.xlu0.c.b16.start.end [1/1] (short) (narrow) %v2051_v27, 16 }
 0x4e4   : > { %2145 = vxpose.xlu1.c.b16.start.end [1/1] (short) (narrow) %v2055_v63, 16 }
 0x4ef   : > { %1806 = vadd.xlane.f32.xlu0 %v1805_v31 }
 0x4f1   : > { %1809 = vadd.xlane.f32.xlu1 %v1808_v15 }
 0x4f3   : > { %1812 = vadd.xlane.f32.xlu0 %v1811_v34 }
 0x4f5   : > { %1815 = vadd.xlane.f32.xlu1 %v1814_v35 }
 0x520   : > { %2161 = vxpose.xlu0.c.b16.start.end [1/1] (short) (narrow) %v2059_v45, 16 }
 0x522   : > { %2177 = vxpose.xlu1.c.b16.start.end [1/1] (short) (narrow) %v2063_v47, 16 }
 0x540   : > { %v2073_v37 = vpop.trf.xlu0 }
 0x542   : > { %v2089_v38 = vpop.trf.xlu1 }
 0x544   : > { %v2105_v40 = vpop.trf.xlu0 }
 0x546   : > { %v2121_v49 = vpop.trf.xlu1 }
 0x548   : > { %v2137_v50 = vpop.trf.xlu0 }
 0x549   : > { %v2193_v58 = vcombine.low %v2073_v37, %v2137_v50 }
 0x54a   : > { %v2153_v53 = vpop.trf.xlu1 }
 0x54b   : > { %v2218_v62 = vcombine.low %v2089_v38, %v2153_v53  ;;  %v2200_v3 = vrot.slane %v2193_v58, %v6385_v52 }
 0x54d   : > { %v2225_v11 = vrot.slane %v2218_v62, %v6385_v52 }
 0x57c   : > { %v1807_v54 = vpop.xlane.xlu0 %1806 }
 0x57d   : > { %6139 = vrcp.f32 %v1807_v54 }
 0x57e   : > { %v1810_v55 = vpop.xlane.xlu1 %1809 }
 0x57f   : > { %6141 = vrcp.f32 %v1810_v55 }
 0x580   : > { %v1813_v56 = vpop.xlane.xlu0 %1812 }
 0x581   : > { %6143 = vrcp.f32 %v1813_v56 }
 0x582   : > { %v1816_v57 = vpop.xlane.xlu1 %1815 }
 0x583   : > { %6145 = vrcp.f32 %v1816_v57 }
 0x586   : > { %v2169_v60 = vpop.trf.xlu0 }
 0x587   : > { %v6140_v43 = vpop.eup %6139  ;;  %v2201_v48 = vcombine.low %v2105_v40, %v2169_v60 }
 0x588   : > { %v2185_v0 = vpop.trf.xlu1  ;;  %v1821_v1 = vmul.f32 %v6140_v43, %v6132_v30 }
 0x589   : > { %v6142_v2 = vpop.eup %6141  ;;  %v2208_v4 = vrot.slane %v2201_v48, %v6385_v52  ;;  %v2226_v6 = vcombine.low %v2121_v49, %v2185_v0 }
 0x58a   : > { %v1825_v7 = vpack.c.bf16 %v1821_v1, %v1821_v1  ;;  %v1822_v9 = vmul.f32 %v6142_v2, %v6134_v36 }
 0x58b   : > { %v6144_v10 = vpop.eup %6143  ;;  %v2209_v12 = vcombine.low %v2200_v3, %v2208_v4  ;;  %v2233_v13 = vrot.slane %v2226_v6, %v6385_v52 }
 0x58c   : > { %v2259_v14 = vsel %vm1587_vm3, %v1825_v7, 0  ;;  %v1826_v16 = vpack.c.bf16 %v1822_v9, %v1822_v9  ;;  %v1823_v17 = vmul.f32 %v6144_v10, %v6136_v32  ;;  %v6077_v10 = vld [vmem:[%s7056_s7] sm:$0xff]  }
 0x58d   : > { %v6146_v18 = vpop.eup %6145  ;;  %v2216_v19 = vrot.slane %v2209_v12, %v6388_v59  ;;  %v2234_v20 = vcombine.low %v2225_v11, %v2233_v13  ;;  %5878 = vmatpush3.bf16.xpose.msra.mxu1 %v2259_v14 }
 0x58e   : > { %v2305_v21 = vsel %vm1587_vm3, %v1826_v16, 0  ;;  %5889 = vmatprep.subr.bf16.mxu1 %v6190_v5  ;;  %v1824_v22 = vmul.f32 %v6146_v18, %v6138_v33  ;;  %v1827_v24 = vpack.c.bf16 %v1823_v17, %v1823_v17 }
 0x58f   : > { %v2241_v23 = vrot.slane %v2234_v20, %v6388_v59  ;;  %5884 = vmatpush3.bf16.xpose.msra.mxu0 %v2305_v21  ;;  %v2246_v25 = vshrl.u32 %v2216_v19, 16  ;;  %v2217_v29 = vcombine.high %v2216_v19, %v6191_v8  ;;  %v6078_v20 = vld [vmem:[%s7056_s7 + $0x8] sm:$0xff]  }
 0x590   : > { %5895 = vmatprep.subr.bf16.mxu0 %v6190_v5  ;;  %v1828_v27 = vpack.c.bf16 %v1824_v22, %v1824_v22  ;;  %v2351_v63 = vsel %vm1587_vm3, %v1827_v24, 0 }
 0x591   : > { %v2245_v26 = vpack.i.b16 %v2241_v23, %v2216_v19  ;;  %v2247_v61 = vshrl.u32 %v2241_v23, 16  ;;  %v2242_v42 = vcombine.high %v2241_v23, %v6191_v8  ;;  %v2252_v31 = vshrl.u32 %v2217_v29, 16 }
 0x592   : > { %v2397_v30 = vsel %vm1587_vm3, %v1828_v27, 0 }
 0x593   : > { %v2248_v28 = vpack.i.b16 %v2247_v61, %v2246_v25  ;;  %v2253_v36 = vshrl.u32 %v2242_v42, 16  ;;  %v2251_v32 = vpack.i.b16 %v2242_v42, %v2217_v29 }
 0x594   : > { %5880 = vmatmul.mubr.msk.bf16.vlgmr.msra.gmra.mrb[16].mxu1 %vm1587_vm3, %v2245_v26 }
 0x595   : > { %5890 = vmatpush3.bf16.xpose.msra.mxu1 %v2351_v63  ;;  %5891 = vmatprep.mubr.msk.bf16.mxu1 %vm6192_vm1, %v6190_v5  ;;  %v2254_v15 = vpack.i.b16 %v2253_v36, %v2252_v31 }
 0x596   : > { %5886 = vmatmul.mubr.msk.bf16.vlgmr.msra.gmra.mrb[12].mxu0 %vm1587_vm3, %v2248_v28  ;;  %5901 = vmatprep.subr.bf16.mxu1 %v6190_v5 }
 0x597   : > { %5896 = vmatpush3.bf16.xpose.msra.mxu0 %v2397_v30  ;;  %5897 = vmatprep.mubr.msk.bf16.mxu0 %vm6192_vm1, %v6190_v5 }
 0x59c   : > { %5892 = vmatmul.mubr.msk.bf16.vlgmr.msra.gmra.mrb[20].mxu1 %vm1587_vm3, %v2251_v32 }
 0x59d   : > { %5905 = vmatprep.mubr.msk.bf16.mxu1 %vm6192_vm1, %v6190_v5  ;;  %5902 = vmatpush3.bf16.msra.mxu1 %v6077_v10 }
 0x59e   : > { %5898 = vmatmul.mubr.msk.bf16.vlgmr.msra.gmra.mrb[16].mxu0 %vm1587_vm3, %v2254_v15  ;;  %5903 = vmatprep.subr.bf16.mxu1 %v6190_v5 }
 0x59f   : > { %2857 = vmatprep.mubr.bf16.mxu0 %v6191_v8 }
 0x5a1   : > { %5904 = vmatpush3.bf16.msra.mxu1 %v6078_v20 }
 0x5a2   : > { %5909 = vmatprep.subr.bf16.mxu1 %v6190_v5 }
 0x667   : > { %v2295_v33 = vpop.f32.mrb[16].mxu1 }
 0x668   : > { %2439 = vxpose.xlu0.b32.start.end [1/1] (short) (narrow) %v2295_v33, 8  ;;  %v5881_v34 = vpop.f32.mrb[17].mxu1 }
 0x669   : > { %v2298_v35 = vpop.f32.mrb[18].mxu1  ;;  %v2341_v39 = vpop.f32.mrb[12].mxu0 }
 0x66a   : > { %2471 = vxpose.xlu1.b32.start.end [1/1] (short) (narrow) %v2341_v39, 8  ;;  %v5882_v41 = vpop.f32.mrb[19].mxu1  ;;  %v5887_v44 = vpop.f32.mrb[13].mxu0 }
 0x66b   : > { %v2344_v45 = vpop.f32.mrb[14].mxu0 }
 0x66c   : > { %v5888_v46 = vpop.f32.mrb[15].mxu0 }
 0x66d   : > { %v6179_v46 = vld [vmem:[%s6316_s2] sm:$0xff]  ;;  %s7087_s2 = smov 104  }
 0x66f   : > { %v2387_v47 = vpop.f32.mrb[20].mxu1 }
 0x670   : > { %2503 = vxpose.xlu0.b32.start.end [1/1] (short) (narrow) %v2387_v47, 8  ;;  %v5893_v37 = vpop.f32.mrb[21].mxu1 }
 0x671   : > { %v2390_v38 = vpop.f32.mrb[22].mxu1  ;;  %v2433_v40 = vpop.f32.mrb[16].mxu0 }
 0x672   : > { %v5894_v49 = vpop.f32.mrb[23].mxu1  ;;  %v5899_v50 = vpop.f32.mrb[17].mxu0 }
 0x673   : > { %v2436_v53 = vpop.f32.mrb[18].mxu0 }
 0x674   : > { %v5900_v54 = vpop.f32.mrb[19].mxu0  ;;  %2535 = vxpose.xlu0.b32.start.end [1/1] (short) (narrow) %v2433_v40, 8  ;;  %v6081_v53 = vld [vmem:[%s7058_s9 + $0x4] ss:$8 sps:$4 sm:$0xff]  }
 0x675   : > { %v6079_v54 = vld [vmem:[%s7058_s9] ss:$8 sps:$4 sm:$0xff]   ;;  %2825 = vmatprep.subr.bf16.mxu0 %v6081_v53 }
 0x676   : > { %2826 = vmatpush1.bf16.msra.mxu0 %v6079_v54  ;;  %v6181_v53 = vld [vmem:[%s7084_s3] sm:$0xff] }
 0x6e8   : > { %v2455_v55 = vpop.trf.xlu0 }
 0x6ea   : > { %v2487_v57 = vpop.trf.xlu1 }
 0x6f0   : > { %v2519_v56 = vpop.trf.xlu0 }
 0x6f1   : > { %v2567_v58 = vcombine.low %v2455_v55, %v2519_v56  ;;  %v2568_v60 = vcombine.high %v2455_v55, %v2519_v56  ;;  %v6082_v55 = vld [vmem:[%s7058_s9 + $0x10] ss:$8 sps:$4 sm:$0xff]   ;;  %v6084_v56 = vld [vmem:[%s7058_s9 + $0x14] ss:$8 sps:$4 sm:$0xff]  }
 0x6f2   : > { %2827 = vmatprep.subr.bf16.mxu0 %v6084_v56 }
 0x6f3   : > { %v2575_v0 = vrot.slane %v2567_v58, %v6385_v52  ;;  %v2582_v1 = vrot.slane %v2568_v60, %v6385_v52  ;;  %2828 = vmatpush1.bf16.msra.mxu0 %v6082_v55 }
 0x6f4   : > { %v2551_v43 = vpop.trf.xlu0 }
 0x6f5   : > { %v2583_v62 = vcombine.low %v2487_v57, %v2551_v43  ;;  %v2584_v48 = vcombine.high %v2487_v57, %v2551_v43 }
 0x6f7   : > { %v2591_v2 = vrot.slane %v2583_v62, %v6385_v52  ;;  %v2598_v3 = vrot.slane %v2584_v48, %v6385_v52  ;;  %v5670_v62 = vld [vmem:[%s7057_s8] ss:$0 sm:$0xff] }
 0x6f9   : > { %v2599_v4 = vcombine.low %v2575_v0, %v2591_v2  ;;  %v2600_v6 = vcombine.high %v2575_v0, %v2591_v2  ;;  %v2615_v7 = vcombine.low %v2582_v1, %v2598_v3  ;;  %v2616_v9 = vcombine.high %v2582_v1, %v2598_v3  ;;  %v6085_v2 = vld [vmem:[%s7059_s10] sm:$0xff]   ;;  %v6086_v3 = vld [vmem:[%s7059_s10 + $0x8] sm:$0xff]  }
 0x6fb   : > { %v2607_v11 = vrot.slane %v2599_v4, %v6388_v59  ;;  %v2614_v12 = vrot.slane %v2600_v6, %v6388_v59  ;;  %v2623_v13 = vrot.slane %v2615_v7, %v6388_v59  ;;  %v2630_v14 = vrot.slane %v2616_v9, %v6388_v59  ;;  %v6087_v4 = vld [vmem:[%s7059_s10 + $0x10] sm:$0xff]   ;;  %v6088_v6 = vld [vmem:[%s7059_s10 + $0x18] sm:$0xff]  }
 0x6fd   : > { %v2635_v16 = vcombine.low %v2607_v11, %v2614_v12  ;;  %v5665_v17 = vcombine.high %v2607_v11, %v2614_v12  ;;  %v2651_v18 = vcombine.low %v2623_v13, %v2630_v14  ;;  %v5666_v19 = vcombine.high %v2623_v13, %v2630_v14 }
 0x6ff   : > { %v2642_v21 = vrot.slane %v2635_v16, %v6385_v52  ;;  %v2650_v22 = vrot.slane %v5665_v17, %v6385_v52  ;;  %v2658_v23 = vrot.slane %v2651_v18, %v6385_v52  ;;  %v2666_v24 = vrot.slane %v5666_v19, %v6385_v52 }
 0x701   : > { %v2668_v25 = vcombine.high %v2642_v21, %v2650_v22  ;;  %v2684_v26 = vcombine.high %v2658_v23, %v2666_v24  ;;  %v2667_v61 = vcombine.low %v2642_v21, %v2650_v22  ;;  %v2683_v27 = vcombine.low %v2658_v23, %v2666_v24 }
 0x703   : > { %v2682_v28 = vrot.slane %v2668_v25, %v6388_v59  ;;  %v2698_v42 = vrot.slane %v2684_v26, %v6388_v59  ;;  %v2675_v63 = vrot.slane %v2667_v61, %v6388_v59  ;;  %v2691_v29 = vrot.slane %v2683_v27, %v6388_v59  ;;  %v6091_v27 = vld [vmem:[%s7055_s6 + $0x54] ss:$20 sps:$4 sm:$0xff]  }
 0x704   : > { %3037 = vmatprep.subr.bf16.mxu0 %v6091_v27 }
 0x705   : > { %v2701_v30 = vcombine.low %v2682_v28, %v2698_v42  ;;  %v2700_v36 = vcombine.high %v2675_v63, %v2691_v29  ;;  %v2699_v31 = vcombine.low %v2675_v63, %v2691_v29  ;;  %v2702_v32 = vcombine.high %v2682_v28, %v2698_v42  ;;  %v6089_v28 = vld [vmem:[%s7055_s6 + $0x50] ss:$20 sps:$4 sm:$0xff]   ;;  %v6092_v42 = vld [vmem:[%s7055_s6 + $0x60] ss:$20 sps:$4 sm:$0xff]   ;;  %v6093_v63 = vld [vmem:[%s7055_s6 + $0x78] ss:$20 sps:$4 sm:$0xff]  }
 0x706   : > { %v6095_v29 = vld [vmem:[%s7055_s6 + $0x7c] ss:$20 sps:$4 sm:$0xff]  }
 0x707   : > { %2708 = vrot.lane.b32.xlu1 %v2701_v30, %s7073_s20  ;;  %2704 = vrot.lane.b32.xlu0 %v2700_v36, %s7072_s21  ;;  %v6096_v30 = vld [vmem:[%s7055_s6 + $0x88] ss:$20 sps:$4 sm:$0xff]   ;;  %s7088_s21 = smov 16  }
 0x708   : > { %v6099_v36 = vld [vmem:[%s7055_s6 + $0x5c] ss:$20 sps:$4 sm:$0xff]  }
 0x70b   : > { %2712 = vrot.lane.b32.xlu1 %v2702_v32, %s7071_s1  ;;  %s7089_s1 = smov 8  }
 0x779   : > { %v2709_v15 = vpop.permute.xlu1 %2708  ;;  %v2705_v33 = vpop.permute.xlu0 %2704 }
 0x77a   : > { %v2715_v34 = vsel %vm1587_vm3, %v2699_v31, %v2705_v33 }
 0x77b   : > { %v2717_v39 = vsel %vm2716_vm8, %v2715_v34, %v2709_v15  ;;  %v5682_v34 = vld [vmem:[%s7054_s5 + $0x1] ss:$0 sm:$0xff] }
 0x77d   : > { %v2713_v35 = vpop.permute.xlu1 %2712 }
 0x77e   : > { %v2719_v41 = vsel %vm2718_vm9, %v2717_v39, %v2713_v35 }
 0x77f   : > { %v2720_v44 = vpack.c.bf16 %v2719_v41, %v2719_v41  ;;  %v6097_v41 = vld [vmem:[%s7055_s6 + $0x58] ss:$20 sps:$4 sm:$0xff]  }
 0x781   : > { %5906 = vmatmul.mubr.msk.bf16.vlgmr.msra.gmra.mrb[24].mxu1 %vm645_vm0, %v2720_v44 }
 0x782   : > { %5917 = vmatprep.mubr.msk.bf16.mxu1 %vm6192_vm1, %v6190_v5  ;;  %5910 = vmatpush3.bf16.msra.mxu1 %v6085_v2 }
 0x783   : > { %5911 = vmatprep.subr.bf16.mxu1 %v6190_v5 }
 0x786   : > { %5912 = vmatpush3.bf16.msra.mxu1 %v6086_v3 }
 0x787   : > { %5913 = vmatprep.subr.bf16.mxu1 %v6190_v5 }
 0x78a   : > { %5914 = vmatpush3.bf16.msra.mxu1 %v6087_v4 }
 0x78b   : > { %5915 = vmatprep.subr.bf16.mxu1 %v6190_v5 }
 0x78e   : > { %5916 = vmatpush3.bf16.msra.mxu1 %v6088_v6 }
 0x78f   : > { %5921 = vmatprep.subr.bf16.mxu1 %v6190_v5 }
 0x854   : > { %v2774_v45 = vpop.f32.mrb[24].mxu1 }
 0x855   : > { %v2780_v47 = vadd.f32 %v6179_v46, %v2774_v45  ;;  %v5907_v37 = vpop.f32.mrb[25].mxu1  ;;  %v6102_v45 = vld [vmem:[%s7055_s6 + $0x84] ss:$20 sps:$4 sm:$0xff]   ;;  %v6100_v46 = vld [vmem:[%s7055_s6 + $0x80] ss:$20 sps:$4 sm:$0xff]  }
 0x856   : > { %v2777_v38 = vpop.f32.mrb[26].mxu1 }
 0x857   : > { %v5908_v40 = vpop.f32.mrb[27].mxu1  ;;  %v2782_v49 = vmul.f32 %v2780_v47, %v2780_v47  ;;  %v6180_v38 = vld [vmem:[%s7083_s23] sm:$0xff] }
 0x859   : > { %v2783_v50 = vsel %vm645_vm0, %v2782_v49, 0.0 }
 0x85a   : > { %2784 = vadd.xlane.f32.xlu1 %v2783_v50 }
 0x8e7   : > { %v2785_v57 = vpop.xlane.xlu1 %2784 }
 0x8e8   : > { %v2786_v58 = vmul.f32 0.03125, %v2785_v57 }
 0x8ea   : > { %v2787_v60 = vadd.f32 1e-05, %v2786_v58 }
 0x8ec   : > { %6147 = vrsqrt.f32 %v2787_v60 }
 0x8f6   : > { %v6148_v43 = vpop.eup %6147 }
 0x8f7   : > { %v2789_v48 = vmul.f32 %v6148_v43, %v2780_v47 }
 0x8f9   : > { %v2796_v0 = vmul.f32 %v5670_v62, %v2789_v48 }
 0x8fb   : > { %v2797_v1 = vpack.c.bf16 %v2796_v0, %v2796_v0 }
 0x8fd   : > { %5675 = vmatmul.mubr.msk.bf16.vlgmr.msra.gmra.mrb[20].mxu0 %vm645_vm0, %v2797_v1 }
 0x8fe   : > { %3069 = vmatprep.mubr.bf16.mxu0 %v6191_v8  ;;  %3038 = vmatpush1.bf16.msra.mxu0 %v6089_v28 }
 0x8ff   : > { %3039 = vmatprep.subr.bf16.mxu0 %v6095_v29 }
 0x902   : > { %3040 = vmatpush1.bf16.msra.mxu0 %v6093_v63 }
 0x903   : > { %3078 = vmatprep.subr.bf16.mxu0 %v6099_v36 }
 0x9d0   : > { %v2859_v7 = vpop.f32.mrb[20].mxu0 }
 0x9d1   : > { %v2866_v9 = vsub.f32 0.0, %v2859_v7  ;;  %v2861_v10 = vpop.f32.mrb[21].mxu0 }
 0x9d2   : > { %v2863_v11 = vpop.f32.mrb[22].mxu0 }
 0x9d3   : > { %v2867_v12 = vmul.f32 1.442695, %v2866_v9  ;;  %v2864_v13 = vpop.f32.mrb[23].mxu0 }
 0x9d5   : > { %6149 = vpow2.f32 %v2867_v12 }
 0x9df   : > { %v6150_v14 = vpop.eup %6149 }
 0x9e0   : > { %v2869_v16 = vadd.f32 1.0, %v6150_v14 }
 0x9e2   : > { %6151 = vrcp.f32 %v2869_v16 }
 0x9ec   : > { %v6152_v17 = vpop.eup %6151 }
 0x9ed   : > { %v2871_v18 = vmul.f32 %v6152_v17, %v2859_v7 }
 0x9ef   : > { %v2872_v19 = vmul.f32 %v2871_v18, %v2861_v10 }
 0x9f1   : > { %v2873_v20 = vpack.c.bf16 %v2872_v19, %v2872_v19 }
 0x9f3   : > { %5918 = vmatmul.mubr.msk.bf16.vlgmr.msra.gmra.mrb[28].mxu1 %vm2906_vm10, %v2873_v20 }
 0x9f4   : > { %5925 = vmatprep.mubr.msk.bf16.mxu1 %vm6192_vm1, %v6190_v5  ;;  %5922 = vmatpush3.bf16.msra.mxu1 %v6092_v42 }
 0x9f5   : > { %5923 = vmatprep.subr.bf16.mxu1 %v6190_v5 }
 0x9f8   : > { %5924 = vmatpush3.bf16.msra.mxu1 %v6096_v30 }
 0x9f9   : > { %5935 = vmatprep.subr.bf16.mxu1 %v6190_v5 }
 0xac6   : > { %v2944_v21 = vpop.f32.mrb[28].mxu1 }
 0xac7   : > { %v6656_v22 = vadd.f32 %v2944_v21, %v2780_v47  ;;  %v5919_v23 = vpop.f32.mrb[29].mxu1 }
 0xac8   : > { %v2947_v24 = vpop.f32.mrb[30].mxu1 }
 0xac9   : > { %v5920_v25 = vpop.f32.mrb[31].mxu1  ;;  %v2953_v26 = vmul.f32 %v6656_v22, %v6656_v22 }
 0xacb   : > { %v2954_v61 = vsel %vm645_vm0, %v2953_v26, 0.0 }
 0xacc   : > { %2955 = vadd.xlane.f32.xlu0 %v2954_v61 }
 0xb59   : > { %v2956_v31 = vpop.xlane.xlu0 %2955 }
 0xb5a   : > { %v2957_v32 = vmul.f32 0.03125, %v2956_v31 }
 0xb5c   : > { %v2958_v15 = vadd.f32 1e-05, %v2957_v32 }
 0xb5e   : > { %6153 = vrsqrt.f32 %v2958_v15 }
 0xb68   : > { %v6154_v33 = vpop.eup %6153 }
 0xb69   : > { %v2960_v35 = vmul.f32 %v6154_v33, %v6656_v22 }
 0xb6b   : > { %v2967_v39 = vmul.f32 %v5682_v34, %v2960_v35 }
 0xb6d   : > { %v2968_v44 = vpack.c.bf16 %v2967_v39, %v2967_v39 }
 0xb6f   : > { %5705 = vmatmul.mubr.msk.bf16.vlgmr.msra.gmra.mrb[24].mxu0 %vm645_vm0, %v2968_v44  ;;  %5926 = vmatmul.mubr.msk.bf16.vlgmr.msra.gmra.mrb[32].mxu1 %vm645_vm0, %v2968_v44 }
 0xb70   : > { %3079 = vmatpush1.bf16.msra.mxu0 %v6097_v41  ;;  %3110 = vmatprep.mubr.bf16.mxu0 %v6191_v8 }
 0xb71   : > { %3080 = vmatprep.subr.bf16.mxu0 %v6102_v45  ;;  %5937 = vmatprep.mubr.msk.bf16.mxu1 %vm6192_vm1, %v6190_v5 }
 0xb74   : > { %3081 = vmatpush1.bf16.msra.mxu0 %v6100_v46 }
 0xb75   : > { %5929 = vmatprep.subr.bf16.mxu0 %v6190_v5 }
 0xb77   : > { %5706 = vmatmul.mubr.msk.bf16.vlgmr.msra.gmra.mrb[28].mxu0 %vm645_vm0, %v2968_v44 }
 0xb78   : > { %5931 = vmatprep.mubr.msk.bf16.mxu0 %vm6192_vm1, %v6190_v5 }
 0xc42   : > { %v3071_v47 = vpop.f32.mrb[24].mxu0  ;;  %v3153_v37 = vpop.f32.mrb[32].mxu1 }
 0xc43   : > { %v3163_v40 = vmul.f32 %v6180_v38, %v3153_v37  ;;  %v3073_v49 = vpop.f32.mrb[25].mxu0  ;;  %v5927_v50 = vpop.f32.mrb[33].mxu1  ;;  %v3159_v48 = vmul.f32 %v6181_v53, %v3071_v47 }
 0xc44   : > { %v3162_v54 = vmul.f32 %v6181_v53, %v3073_v49  ;;  %v3075_v55 = vpop.f32.mrb[26].mxu0  ;;  %v3156_v56 = vpop.f32.mrb[34].mxu1 }
 0xc45   : > { %v3076_v57 = vpop.f32.mrb[27].mxu0  ;;  %v5928_v58 = vpop.f32.mrb[35].mxu1 }
 0xc46   : > { %v3164_v60 = vadd.f32 %v3163_v40, %v3162_v54 }
 0xc48   : > { %3247 = vrot.lane.b32.xlu0 %v3164_v60, %s6193_s26  ;;  %3244 = vrot.lane.b32.xlu1 %v3164_v60, %s7086_s29 }
 0xc4a   : > { %v6714_v43 = vpop.f32.mrb[28].mxu0 }
 0xc4b   : > { %v3114_v62 = vpop.f32.mrb[29].mxu0 }
 0xc4c   : > { %v3160_v0 = vmul.f32 %v6180_v38, %v3114_v62  ;;  %v3116_v1 = vpop.f32.mrb[30].mxu0  ;;  %3250 = vrot.lane.b32.xlu1 %v3164_v60, %s7087_s2 }
 0xc4d   : > { %v3117_v2 = vpop.f32.mrb[31].mxu0 }
 0xc4e   : > { %v6717_v3 = vadd.f32 %v3160_v0, %v3159_v48 }
 0xcba   : > { %v3248_v4 = vpop.permute.xlu0 %3247  ;;  %v3245_v6 = vpop.permute.xlu1 %3244 }
 0xcbb   : > { %v3253_v7 = vcombine.low %v3164_v60, %v3248_v4  ;;  %v3254_v9 = vcombine.high %v3164_v60, %v3248_v4 }
 0xcbd   : > { %v3261_v13 = vrot.slane %v3253_v7, %v6385_v52  ;;  %v3268_v14 = vrot.slane %v3254_v9, %v6385_v52 }
 0xcbe   : > { %v3251_v10 = vpop.permute.xlu1 %3250 }
 0xcbf   : > { %v3269_v11 = vcombine.low %v3245_v6, %v3251_v10  ;;  %v3270_v12 = vcombine.high %v3245_v6, %v3251_v10 }
 0xcc1   : > { %v3277_v16 = vrot.slane %v3269_v11, %v6385_v52  ;;  %v3284_v17 = vrot.slane %v3270_v12, %v6385_v52 }
 0xcc3   : > { %v3285_v18 = vcombine.low %v3261_v13, %v3277_v16  ;;  %v3286_v19 = vcombine.high %v3261_v13, %v3277_v16  ;;  %v3301_v20 = vcombine.low %v3268_v14, %v3284_v17  ;;  %v3302_v24 = vcombine.high %v3268_v14, %v3284_v17 }
 0xcc5   : > { %v3300_v21 = vrot.slane %v3286_v19, %v6388_v59  ;;  %v3293_v23 = vrot.slane %v3285_v18, %v6388_v59  ;;  %v3309_v61 = vrot.slane %v3301_v20, %v6388_v59  ;;  %v3316_v63 = vrot.slane %v3302_v24, %v6388_v59 }
 0xcc7   : > { %v3409_v25 = vpack.c.bf16 %v3300_v21, %v3300_v21  ;;  %v3407_v26 = vpack.c.bf16 %v3293_v23, %v3293_v23  ;;  %v3318_v27 = vcombine.high %v3300_v21, %v6190_v5  ;;  %v3411_v28 = vpack.c.bf16 %v3309_v61, %v3309_v61 }
 0xcc8   : > { %v3319_v29 = vcombine.high %v3309_v61, %v6190_v5  ;;  %v3413_v30 = vpack.c.bf16 %v3316_v63, %v3316_v63  ;;  %v3320_v31 = vcombine.high %v3316_v63, %v6190_v5  ;;  %v3317_v32 = vcombine.high %v3293_v23, %v6190_v5 }
 0xcc9   : > { %3509 = vxpose.xlu0.c.b16.start.end [1/1] (short) (narrow) %v3409_v25, 16  ;;  %3477 = vxpose.xlu1.c.b16.start.end [1/1] (short) (narrow) %v3407_v26, 16  ;;  %v3410_v42 = vpack.c.bf16 %v3318_v27, %v3318_v27 }
 0xcca   : > { %v3412_v36 = vpack.c.bf16 %v3319_v29, %v3319_v29  ;;  %v3414_v15 = vpack.c.bf16 %v3320_v31, %v3320_v31  ;;  %v3408_v33 = vpack.c.bf16 %v3317_v32, %v3317_v32 }
 0xccd   : > { %3541 = vxpose.xlu0.c.b16.start.end [1/1] (short) (narrow) %v3411_v28, 16  ;;  %3525 = vxpose.xlu1.c.b16.start.end [1/1] (short) (narrow) %v3410_v42, 16 }
 0xcd1   : > { %3573 = vxpose.xlu0.c.b16.start.end [1/1] (short) (narrow) %v3413_v30, 16  ;;  %3557 = vxpose.xlu1.c.b16.start.end [1/1] (short) (narrow) %v3412_v36, 16 }
 0xcd5   : > { %3589 = vxpose.xlu1.c.b16.start.end [1/1] (short) (narrow) %v3414_v15, 16  ;;  %3493 = vxpose.xlu0.c.b16.start.end [1/1] (short) (narrow) %v3408_v33, 16 }
 0xcd9   : > { %3169 = vrot.lane.b32.xlu1 %v6717_v3, %s6193_s26 }
 0xcdd   : > { %3172 = vrot.lane.b32.xlu1 %v6717_v3, %s7087_s2 }
 0xcde   : > { %3166 = vrot.lane.b32.xlu0 %v6717_v3, %s7086_s29 }
 0xd2f   : > { %v3517_v34 = vpop.trf.xlu0  ;;  %v3485_v35 = vpop.trf.xlu1 }
 0xd33   : > { %v3549_v39 = vpop.trf.xlu0  ;;  %v3533_v41 = vpop.trf.xlu1 }
 0xd34   : > { %v3605_v46 = vcombine.low %v3485_v35, %v3549_v39 }
 0xd36   : > { %v3612_v49 = vrot.slane %v3605_v46, %v6385_v52 }
 0xd37   : > { %v3581_v44 = vpop.trf.xlu0  ;;  %v3565_v45 = vpop.trf.xlu1 }
 0xd38   : > { %v3613_v47 = vcombine.low %v3517_v34, %v3581_v44 }
 0xd3a   : > { %v3620_v37 = vrot.slane %v3613_v47, %v6385_v52 }
 0xd3b   : > { %v3597_v38 = vpop.trf.xlu1  ;;  %v3501_v40 = vpop.trf.xlu0 }
 0xd3c   : > { %v3647_v50 = vcombine.low %v3533_v41, %v3597_v38  ;;  %v3639_v53 = vcombine.low %v3501_v40, %v3565_v45  ;;  %v3621_v54 = vcombine.low %v3612_v49, %v3620_v37  ;;  %v3622_v55 = vcombine.high %v3612_v49, %v3620_v37 }
 0xd3e   : > { %v3654_v56 = vrot.slane %v3647_v50, %v6385_v52  ;;  %v3646_v57 = vrot.slane %v3639_v53, %v6385_v52  ;;  %v3629_v62 = vrot.slane %v3621_v54, %v6388_v59  ;;  %v3636_v48 = vrot.slane %v3622_v55, %v6388_v59 }
 0xd40   : > { %v3655_v58 = vcombine.low %v3646_v57, %v3654_v56  ;;  %v3656_v60 = vcombine.high %v3646_v57, %v3654_v56  ;;  %v3677_v9 = vshrl.u32 %v3629_v62, 16  ;;  %v3637_v10 = vcombine.high %v3629_v62, %v6191_v8 }
 0xd41   : > { %v3638_v16 = vcombine.high %v3636_v48, %v6191_v8  ;;  %v3693_v17 = vshrl.u32 %v3636_v48, 16 }
 0xd42   : > { %v3663_v0 = vrot.slane %v3655_v58, %v6388_v59  ;;  %v3670_v1 = vrot.slane %v3656_v60, %v6388_v59  ;;  %v3685_v21 = vshrl.u32 %v3637_v10, 16 }
 0xd43   : > { %v3701_v25 = vshrl.u32 %v3638_v16, 16 }
 0xd44   : > { %v3691_v2 = vpack.i.b16 %v3670_v1, %v3636_v48  ;;  %v3675_v4 = vpack.i.b16 %v3663_v0, %v3629_v62  ;;  %v3678_v6 = vshrl.u32 %v3663_v0, 16  ;;  %v3671_v7 = vcombine.high %v3663_v0, %v6191_v8 }
 0xd45   : > { %v3672_v13 = vcombine.high %v3670_v1, %v6191_v8  ;;  %v3694_v14 = vshrl.u32 %v3670_v1, 16 }
 0xd46   : > { %3769 = vxpose.xlu1.c.b16.start.end [1/1] (short) (narrow) %v3691_v2, 16  ;;  %3705 = vxpose.xlu0.c.b16.start.end [1/1] (short) (narrow) %v3675_v4, 16  ;;  %v3679_v11 = vpack.i.b16 %v3678_v6, %v3677_v9  ;;  %v3683_v12 = vpack.i.b16 %v3671_v7, %v3637_v10  ;;  %v3686_v20 = vshrl.u32 %v3671_v7, 16 }
 0xd47   : > { %v3699_v18 = vpack.i.b16 %v3672_v13, %v3638_v16  ;;  %v3695_v19 = vpack.i.b16 %v3694_v14, %v3693_v17  ;;  %v3702_v24 = vshrl.u32 %v3672_v13, 16 }
 0xd48   : > { %v3687_v23 = vpack.i.b16 %v3686_v20, %v3685_v21 }
 0xd49   : > { %v3703_v26 = vpack.i.b16 %v3702_v24, %v3701_v25 }
 0xd4a   : > { %3721 = vxpose.xlu1.c.b16.start.end [1/1] (short) (narrow) %v3679_v11, 16  ;;  %3737 = vxpose.xlu0.c.b16.start.end [1/1] (short) (narrow) %v3683_v12, 16 }
 0xd4b   : > { %v3170_v61 = vpop.permute.xlu1 %3169 }
 0xd4c   : > { %v3175_v29 = vcombine.low %v6717_v3, %v3170_v61  ;;  %v3176_v30 = vcombine.high %v6717_v3, %v3170_v61 }
 0xd4e   : > { %3801 = vxpose.xlu1.c.b16.start.end [1/1] (short) (narrow) %v3699_v18, 16  ;;  %3785 = vxpose.xlu0.c.b16.start.end [1/1] (short) (narrow) %v3695_v19, 16  ;;  %v3183_v32 = vrot.slane %v3175_v29, %v6385_v52  ;;  %v3190_v15 = vrot.slane %v3176_v30, %v6385_v52 }
 0xd4f   : > { %v3173_v27 = vpop.permute.xlu1 %3172 }
 0xd50   : > { %v3167_v28 = vpop.permute.xlu0 %3166 }
 0xd51   : > { %v3191_v42 = vcombine.low %v3167_v28, %v3173_v27  ;;  %v3192_v63 = vcombine.high %v3167_v28, %v3173_v27 }
 0xd52   : > { %3322 = vrot.lane.b32.xlu1 %v6714_v43, %s7086_s29  ;;  %3753 = vxpose.xlu0.c.b16.start.end [1/1] (short) (narrow) %v3687_v23, 16 }
 0xd53   : > { %v3199_v36 = vrot.slane %v3191_v42, %v6385_v52  ;;  %v3206_v31 = vrot.slane %v3192_v63, %v6385_v52 }
 0xd55   : > { %v3207_v33 = vcombine.low %v3183_v32, %v3199_v36  ;;  %v3208_v34 = vcombine.high %v3183_v32, %v3199_v36  ;;  %v3223_v35 = vcombine.low %v3190_v15, %v3206_v31  ;;  %v3224_v39 = vcombine.high %v3190_v15, %v3206_v31 }
 0xd56   : > { %3328 = vrot.lane.b32.xlu1 %v6714_v43, %s7087_s2  ;;  %3817 = vxpose.xlu0.c.b16.start.end [1/1] (short) (narrow) %v3703_v26, 16 }
 0xd57   : > { %v3215_v45 = vrot.slane %v3207_v33, %v6388_v59  ;;  %v3222_v46 = vrot.slane %v3208_v34, %v6388_v59  ;;  %v3231_v3 = vrot.slane %v3223_v35, %v6388_v59  ;;  %v3238_v47 = vrot.slane %v3224_v39, %v6388_v59 }
 0xd59   : > { %v3239_v40 = vcombine.high %v3215_v45, %v6190_v5  ;;  %v3240_v49 = vcombine.high %v3222_v46, %v6190_v5  ;;  %v3241_v50 = vcombine.high %v3231_v3, %v6190_v5  ;;  %v3242_v53 = vcombine.high %v3238_v47, %v6190_v5 }
 0xd5a   : > { %v5708_v62 = vpack.c.bf16 %v3231_v3, %v3215_v45  ;;  %v5709_v48 = vpack.c.bf16 %v3238_v47, %v3222_v46 }
 0xd5b   : > { %v5710_v57 = vpack.c.bf16 %v3241_v50, %v3239_v40  ;;  %v5711_v58 = vpack.c.bf16 %v3242_v53, %v3240_v49 }
 0xd5c   : > { %v3422_v9 = vrot.slane %v5708_v62, %v6385_v52  ;;  %v3430_v10 = vrot.slane %v5709_v48, %v6385_v52 }
 0xd5d   : > { %v3447_v2 = vrot.slane %v5710_v57, %v6385_v52  ;;  %v3455_v4 = vrot.slane %v5711_v58, %v6385_v52 }
 0xd5e   : > { %v3431_v18 = vcombine.low %v3422_v9, %v3430_v10 }
 0xd5f   : > { %3325 = vrot.lane.b32.xlu0 %v6714_v43, %s6193_s26  ;;  %v3456_v14 = vcombine.low %v3447_v2, %v3455_v4 }
 0xd60   : > { %v3438_v24 = vrot.slane %v3431_v18, %v6388_v59 }
 0xd61   : > { %v3463_v21 = vrot.slane %v3456_v14, %v6388_v59 }
 0xd62   : > { %v3468_v34 = vshrl.u32 %v3438_v24, 16  ;;  %v3439_v3 = vcombine.high %v3438_v24, %v6191_v8 }
 0xd63   : > { %v3469_v42 = vshrl.u32 %v3463_v21, 16  ;;  %v3467_v33 = vpack.i.b16 %v3463_v21, %v3438_v24 }
 0xd64   : > { %v3474_v49 = vshrl.u32 %v3439_v3, 16 }
 0xdac   : > { %v3777_v41 = vpop.trf.xlu1  ;;  %v3713_v44 = vpop.trf.xlu0 }
 0xdad   : > { %v3833_v60 = vcombine.low %v3713_v44, %v3777_v41  ;;  %v3470_v41 = vpack.i.b16 %v3469_v42, %v3468_v34  ;;  %v3464_v44 = vcombine.high %v3463_v21, %v6191_v8 }
 0xdaf   : > { %v3840_v6 = vrot.slane %v3833_v60, %v6385_v52  ;;  %v3475_v47 = vshrl.u32 %v3464_v44, 16  ;;  %v3473_v40 = vpack.i.b16 %v3464_v44, %v3439_v3 }
 0xdb0   : > { %v3729_v37 = vpop.trf.xlu1  ;;  %v3745_v38 = vpop.trf.xlu0 }
 0xdb1   : > { %v3476_v53 = vpack.i.b16 %v3475_v47, %v3474_v49 }
 0xdb4   : > { %v3809_v54 = vpop.trf.xlu1  ;;  %v3793_v55 = vpop.trf.xlu0 }
 0xdb5   : > { %v3841_v56 = vcombine.low %v3745_v38, %v3809_v54  ;;  %v3858_v7 = vcombine.low %v3729_v37, %v3793_v55 }
 0xdb7   : > { %v3848_v0 = vrot.slane %v3841_v56, %v6385_v52  ;;  %v3865_v16 = vrot.slane %v3858_v7, %v6385_v52 }
 0xdb8   : > { %v3761_v1 = vpop.trf.xlu0 }
 0xdb9   : > { %v3849_v11 = vcombine.low %v3840_v6, %v3848_v0 }
 0xdbb   : > { %v3856_v19 = vrot.slane %v3849_v11, %v6388_v59 }
 0xdbc   : > { %v3825_v12 = vpop.trf.xlu0 }
 0xdbd   : > { %v3866_v13 = vcombine.low %v3761_v1, %v3825_v12  ;;  %v3857_v25 = vcombine.high %v3856_v19, %v6191_v8  ;;  %v3886_v61 = vshrl.u32 %v3856_v19, 16 }
 0xdbf   : > { %v3873_v17 = vrot.slane %v3866_v13, %v6385_v52  ;;  %v3892_v32 = vshrl.u32 %v3857_v25, 16 }
 0xdc1   : > { %v3874_v20 = vcombine.low %v3865_v16, %v3873_v17 }
 0xdc3   : > { %v3881_v23 = vrot.slane %v3874_v20, %v6388_v59 }
 0xdc4   : > { %v6783_v63 = vpop.permute.xlu1 %3322 }
 0xdc5   : > { %v3885_v26 = vpack.i.b16 %v3881_v23, %v3856_v19  ;;  %v3887_v27 = vshrl.u32 %v3881_v23, 16  ;;  %v3882_v28 = vcombine.high %v3881_v23, %v6191_v8 }
 0xdc7   : > { %v3899_v29 = vsel %vm1591_vm2, %v3885_v26, 0  ;;  %v3888_v30 = vpack.i.b16 %v3887_v27, %v3886_v61  ;;  %v3891_v36 = vpack.i.b16 %v3882_v28, %v3857_v25  ;;  %v3893_v31 = vshrl.u32 %v3882_v28, 16 }
 0xdc8   : > { %5930 = vmatpush3.bf16.msra.mxu0 %v3899_v29  ;;  %v3329_v45 = vpop.permute.xlu1 %3328 }
 0xdc9   : > { %v3945_v15 = vsel %vm1591_vm2, %v3888_v30, 0  ;;  %5941 = vmatprep.subr.bf16.mxu0 %v6190_v5  ;;  %v3894_v35 = vpack.i.b16 %v3893_v31, %v3892_v32  ;;  %v3991_v39 = vsel %vm1591_vm2, %v3891_v36, 0  ;;  %v3348_v37 = vcombine.high %v6783_v63, %v3329_v45 }
 0xdca   : > { %5936 = vmatpush3.bf16.msra.mxu1 %v3945_v15  ;;  %v3347_v24 = vcombine.low %v6783_v63, %v3329_v45 }
 0xdcb   : > { %5932 = vmatmul.mubr.msk.bf16.vlgmr.msra.gmra.mrb[32].mxu0 %vm1587_vm3, %v3467_v33  ;;  %5947 = vmatprep.subr.bf16.mxu1 %v6190_v5  ;;  %v4037_v46 = vsel %vm1591_vm2, %v3894_v35, 0  ;;  %v3362_v54 = vrot.slane %v3348_v37, %v6385_v52 }
 0xdcc   : > { %5942 = vmatpush3.bf16.msra.mxu0 %v3991_v39  ;;  %5943 = vmatprep.mubr.msk.bf16.mxu0 %vm6192_vm1, %v6190_v5  ;;  %v3355_v26 = vrot.slane %v3347_v24, %v6385_v52 }
 0xdcd   : > { %5938 = vmatmul.mubr.msk.bf16.vlgmr.msra.gmra.mrb[36].mxu1 %vm1587_vm3, %v3470_v41  ;;  %5953 = vmatprep.subr.bf16.mxu0 %v6190_v5 }
 0xdce   : > { %5948 = vmatpush3.bf16.msra.mxu1 %v4037_v46  ;;  %5949 = vmatprep.mubr.msk.bf16.mxu1 %vm6192_vm1, %v6190_v5 }
 0xdcf   : > { %5959 = vmatprep.subr.bf16.mxu1 %v6190_v5 }
 0xdd1   : > { %v3326_v38 = vpop.permute.xlu0 %3325 }
 0xdd2   : > { %v3332_v50 = vcombine.high %v6714_v43, %v3326_v38  ;;  %v3331_v23 = vcombine.low %v6714_v43, %v3326_v38 }
 0xdd3   : > { %5944 = vmatmul.mubr.msk.bf16.vlgmr.msra.gmra.mrb[36].mxu0 %vm1587_vm3, %v3473_v40 }
 0xdd4   : > { %v3346_v55 = vrot.slane %v3332_v50, %v6385_v52  ;;  %5955 = vmatprep.mubr.msk.bf16.mxu0 %vm6192_vm1, %v6190_v5  ;;  %v3339_v25 = vrot.slane %v3331_v23, %v6385_v52 }
 0xdd5   : > { %5950 = vmatmul.mubr.msk.bf16.vlgmr.msra.gmra.mrb[40].mxu1 %vm1587_vm3, %v3476_v53 }
 0xdd6   : > { %v3379_v56 = vcombine.low %v3346_v55, %v3362_v54  ;;  %v3380_v57 = vcombine.high %v3346_v55, %v3362_v54  ;;  %5961 = vmatprep.mubr.msk.bf16.mxu1 %vm6192_vm1, %v6190_v5  ;;  %v3363_v61 = vcombine.low %v3339_v25, %v3355_v26  ;;  %v3364_v15 = vcombine.high %v3339_v25, %v3355_v26 }
 0xdd8   : > { %v3371_v27 = vrot.slane %v3363_v61, %v6388_v59  ;;  %v3378_v33 = vrot.slane %v3364_v15, %v6388_v59  ;;  %v3387_v35 = vrot.slane %v3379_v56, %v6388_v59 }
 0xdda   : > { %v3395_v28 = vcombine.high %v3371_v27, %v6190_v5  ;;  %v4135_v42 = vpack.c.bf16 %v3371_v27, %v3371_v27  ;;  %v3396_v34 = vcombine.high %v3378_v33, %v6190_v5  ;;  %v3397_v41 = vcombine.high %v3387_v35, %v6190_v5 }
 0xddb   : > { %v4137_v44 = vpack.c.bf16 %v3378_v33, %v3378_v33  ;;  %v4139_v3 = vpack.c.bf16 %v3387_v35, %v3387_v35 }
 0xddc   : > { %v4136_v29 = vpack.c.bf16 %v3395_v28, %v3395_v28  ;;  %v4138_v39 = vpack.c.bf16 %v3396_v34, %v3396_v34  ;;  %v4140_v45 = vpack.c.bf16 %v3397_v41, %v3397_v41 }
 0xe9e   : > { %v3935_v58 = vpop.f32.mrb[32].mxu0 }
 0xe9f   : > { %v4079_v60 = vmul.f32 0.35355338, %v3935_v58  ;;  %v5933_v62 = vpop.f32.mrb[33].mxu0 }
 0xea0   : > { %v3938_v48 = vpop.f32.mrb[34].mxu0  ;;  %v3981_v0 = vpop.f32.mrb[36].mxu1 }
 0xea1   : > { %v4080_v1 = vmul.f32 0.35355338, %v3981_v0  ;;  %v5934_v2 = vpop.f32.mrb[35].mxu0  ;;  %v5939_v4 = vpop.f32.mrb[37].mxu1  ;;  %v6812_v6 = vadd.f32 %v4079_v60, %v6501_v51 }
 0xea2   : > { %v3984_v7 = vpop.f32.mrb[38].mxu1 }
 0xea3   : > { %v5940_v9 = vpop.f32.mrb[39].mxu1  ;;  %v4087_v10 = vsel %vm1587_vm3, %v6812_v6, -inf  ;;  %v6817_v11 = vadd.f32 %v4080_v1, %v6501_v51 }
 0xea4   : > { %4088 = vmax.xlane.f32.xlu1 %v4087_v10 }
 0xea5   : > { %v4090_v12 = vsel %vm1587_vm3, %v6817_v11, -inf }
 0xea6   : > { %v4027_v13 = vpop.f32.mrb[36].mxu0  ;;  %4091 = vmax.xlane.f32.xlu0 %v4090_v12 }
 0xea7   : > { %v5945_v14 = vpop.f32.mrb[37].mxu0  ;;  %v4081_v30 = vmul.f32 0.35355338, %v4027_v13 }
 0xea8   : > { %v4030_v16 = vpop.f32.mrb[38].mxu0  ;;  %v4073_v17 = vpop.f32.mrb[40].mxu1 }
 0xea9   : > { %v5946_v18 = vpop.f32.mrb[39].mxu0  ;;  %v5951_v19 = vpop.f32.mrb[41].mxu1  ;;  %v4082_v36 = vmul.f32 0.35355338, %v4073_v17  ;;  %v6828_v31 = vadd.f32 %v4081_v30, %v6501_v51 }
 0xeaa   : > { %v4076_v20 = vpop.f32.mrb[42].mxu1 }
 0xeab   : > { %v5952_v21 = vpop.f32.mrb[43].mxu1  ;;  %v6831_v43 = vadd.f32 %v4082_v36, %v6501_v51  ;;  %v4093_v63 = vsel %vm1587_vm3, %v6828_v31, -inf  ;;  %v3394_v51 = vrot.slane %v3380_v57, %v6388_v59 }
 0xead   : > { %v4096_v32 = vsel %vm1587_vm3, %v6831_v43, -inf  ;;  %v3398_v46 = vcombine.high %v3394_v51, %v6190_v5  ;;  %v4141_v37 = vpack.c.bf16 %v3394_v51, %v3394_v51 }
 0xeaf   : > { %v4142_v47 = vpack.c.bf16 %v3398_v46, %v3398_v46 }
 0xed1   : > { %4143 = vxpose.xlu1.c.b16.start.end [1/1] (short) (narrow) %v4135_v42, 16 }
 0xed3   : > { %4159 = vxpose.xlu0.c.b16.start.end [1/1] (short) (narrow) %v4136_v29, 16 }
 0xede   : > { %4094 = vmax.xlane.f32.xlu1 %v4093_v63 }
 0xee0   : > { %4097 = vmax.xlane.f32.xlu0 %v4096_v32 }
 0xf0b   : > { %4191 = vxpose.xlu1.c.b16.start.end [1/1] (short) (narrow) %v4138_v39, 16 }
 0xf0d   : > { %4175 = vxpose.xlu0.c.b16.start.end [1/1] (short) (narrow) %v4137_v44, 16 }
 0xf0f   : > { %4223 = vxpose.xlu1.c.b16.start.end [1/1] (short) (narrow) %v4140_v45, 16 }
 0xf11   : > { %4207 = vxpose.xlu0.c.b16.start.end [1/1] (short) (narrow) %v4139_v3, 16 }
 0xf13   : > { %4255 = vxpose.xlu1.c.b16.start.end [1/1] (short) (narrow) %v4142_v47, 16 }
 0xf15   : > { %4239 = vxpose.xlu0.c.b16.start.end [1/1] (short) (narrow) %v4141_v37, 16 }
 0xf31   : > { %v4089_v38 = vpop.xlane.xlu1 %4088 }
 0xf32   : > { %v4099_v25 = vsub.f32 %v6812_v6, %v4089_v38 }
 0xf33   : > { %v4092_v40 = vpop.xlane.xlu0 %4091 }
 0xf34   : > { %v4100_v28 = vsub.f32 %v6817_v11, %v4092_v40  ;;  %v4103_v36 = vmul.f32 1.442695, %v4099_v25 }
 0xf36   : > { %v4105_v33 = vmul.f32 1.442695, %v4100_v28  ;;  %6155 = vpow2.f32 %v4103_v36 }
 0xf37   : > { %v4151_v49 = vpop.trf.xlu1 }
 0xf38   : > { %6157 = vpow2.f32 %v4105_v33 }
 0xf39   : > { %v4167_v50 = vpop.trf.xlu0 }
 0xf40   : > { %v6156_v51 = vpop.eup %6155 }
 0xf41   : > { %v4111_v44 = vsel %vm1587_vm3, %v6156_v51, 0.0 }
 0xf6b   : > { %v4095_v53 = vpop.xlane.xlu1 %4094 }
 0xf6c   : > { %v4101_v63 = vsub.f32 %v6828_v31, %v4095_v53  ;;  %v6158_v31 = vpop.eup %6157 }
 0xf6d   : > { %v4098_v54 = vpop.xlane.xlu0 %4097 }
 0xf6e   : > { %v4102_v6 = vsub.f32 %v6831_v43, %v4098_v54  ;;  %v4107_v39 = vmul.f32 1.442695, %v4101_v63  ;;  %v4114_v43 = vsel %vm1587_vm3, %v6158_v31, 0.0 }
 0xf70   : > { %v4109_v41 = vmul.f32 1.442695, %v4102_v6  ;;  %6159 = vpow2.f32 %v4107_v39 }
 0xf71   : > { %v4199_v55 = vpop.trf.xlu1 }
 0xf72   : > { %6161 = vpow2.f32 %v4109_v41 }
 0xf73   : > { %v4183_v56 = vpop.trf.xlu0 }
 0xf75   : > { %v4231_v57 = vpop.trf.xlu1 }
 0xf76   : > { %v4305_v60 = vcombine.low %v4167_v50, %v4231_v57 }
 0xf77   : > { %v4215_v58 = vpop.trf.xlu0 }
 0xf78   : > { %v4271_v48 = vcombine.low %v4151_v49, %v4215_v58  ;;  %v4312_v2 = vrot.slane %v4305_v60, %v6385_v52 }
 0xf79   : > { %v4263_v62 = vpop.trf.xlu1 }
 0xf7a   : > { %v4313_v0 = vcombine.low %v4199_v55, %v4263_v62  ;;  %v4278_v9 = vrot.slane %v4271_v48, %v6385_v52  ;;  %v6160_v45 = vpop.eup %6159 }
 0xf7b   : > { %v4247_v1 = vpop.trf.xlu0  ;;  %v4117_v3 = vsel %vm1587_vm3, %v6160_v45, 0.0 }
 0xf7c   : > { %v4320_v4 = vrot.slane %v4313_v0, %v6385_v52  ;;  %v4279_v7 = vcombine.low %v4183_v56, %v4247_v1  ;;  %v6162_v46 = vpop.eup %6161 }
 0xf7d   : > { %v4120_v47 = vsel %vm1587_vm3, %v6162_v46, 0.0 }
 0xf7e   : > { %v4321_v10 = vcombine.low %v4312_v2, %v4320_v4  ;;  %v4286_v12 = vrot.slane %v4279_v7, %v6385_v52  ;;  %v4322_v18 = vcombine.high %v4312_v2, %v4320_v4 }
 0xf80   : > { %v4287_v13 = vcombine.low %v4278_v9, %v4286_v12  ;;  %v4329_v14 = vrot.slane %v4321_v10, %v6388_v59  ;;  %v4288_v16 = vcombine.high %v4278_v9, %v4286_v12  ;;  %v4336_v30 = vrot.slane %v4322_v18, %v6388_v59 }
 0xf82   : > { %v4295_v17 = vrot.slane %v4287_v13, %v6388_v59  ;;  %v4344_v19 = vshrl.u32 %v4329_v14, 16  ;;  %v4337_v24 = vcombine.high %v4329_v14, %v6191_v8  ;;  %v4302_v27 = vrot.slane %v4288_v16, %v6388_v59 }
 0xf83   : > { %v4360_v35 = vshrl.u32 %v4336_v30, 16  ;;  %v4338_v38 = vcombine.high %v4336_v30, %v6191_v8 }
 0xf84   : > { %v4341_v20 = vpack.i.b16 %v4329_v14, %v4295_v17  ;;  %v4343_v21 = vshrl.u32 %v4295_v17, 16  ;;  %v4303_v23 = vcombine.high %v4295_v17, %v6191_v8  ;;  %v4352_v29 = vshrl.u32 %v4337_v24, 16 }
 0xf85   : > { %v4359_v15 = vshrl.u32 %v4302_v27, 16  ;;  %v4357_v34 = vpack.i.b16 %v4336_v30, %v4302_v27  ;;  %v4304_v37 = vcombine.high %v4302_v27, %v6191_v8  ;;  %v4368_v50 = vshrl.u32 %v4338_v38, 16 }
 0xf86   : > { %4371 = vxpose.xlu0.c.b16.start.end [1/1] (short) (narrow) %v4341_v20, 16  ;;  %v4345_v26 = vpack.i.b16 %v4344_v19, %v4343_v21  ;;  %v4351_v61 = vshrl.u32 %v4303_v23, 16  ;;  %v4349_v42 = vpack.i.b16 %v4337_v24, %v4303_v23 }
 0xf87   : > { %v4361_v11 = vpack.i.b16 %v4360_v35, %v4359_v15  ;;  %v4367_v40 = vshrl.u32 %v4304_v37, 16  ;;  %v4365_v49 = vpack.i.b16 %v4338_v38, %v4304_v37 }
 0xf88   : > { %4387 = vxpose.xlu1.c.b16.start.end [1/1] (short) (narrow) %v4345_v26, 16  ;;  %v4353_v32 = vpack.i.b16 %v4352_v29, %v4351_v61 }
 0xf89   : > { %v4369_v53 = vpack.i.b16 %v4368_v50, %v4367_v40 }
 0xf8a   : > { %4403 = vxpose.xlu0.c.b16.start.end [1/1] (short) (narrow) %v4349_v42, 16 }
 0xf8c   : > { %4419 = vxpose.xlu1.c.b16.start.end [1/1] (short) (narrow) %v4353_v32, 16 }
 0xf8e   : > { %4435 = vxpose.xlu0.c.b16.start.end [1/1] (short) (narrow) %v4357_v34, 16 }
 0xf90   : > { %4451 = vxpose.xlu1.c.b16.start.end [1/1] (short) (narrow) %v4361_v11, 16 }
 0xf9b   : > { %4112 = vadd.xlane.f32.xlu0 %v4111_v44 }
 0xf9d   : > { %4115 = vadd.xlane.f32.xlu1 %v4114_v43 }
 0xf9f   : > { %4118 = vadd.xlane.f32.xlu0 %v4117_v3 }
 0xfa1   : > { %4121 = vadd.xlane.f32.xlu1 %v4120_v47 }
 0xfcc   : > { %4467 = vxpose.xlu0.c.b16.start.end [1/1] (short) (narrow) %v4365_v49, 16 }
 0xfce   : > { %4483 = vxpose.xlu1.c.b16.start.end [1/1] (short) (narrow) %v4369_v53, 16 }
 0xfec   : > { %v4379_v54 = vpop.trf.xlu0 }
 0xfee   : > { %v4395_v55 = vpop.trf.xlu1 }
 0xff0   : > { %v4411_v56 = vpop.trf.xlu0 }
 0xff2   : > { %v4427_v57 = vpop.trf.xlu1 }
 0xff4   : > { %v4443_v58 = vpop.trf.xlu0 }
 0xff5   : > { %v4499_v2 = vcombine.low %v4379_v54, %v4443_v58 }
 0xff6   : > { %v4459_v60 = vpop.trf.xlu1 }
 0xff7   : > { %v4524_v9 = vcombine.low %v4395_v55, %v4459_v60  ;;  %v4506_v16 = vrot.slane %v4499_v2, %v6385_v52 }
 0xff9   : > { %v4531_v23 = vrot.slane %v4524_v9, %v6385_v52 }
0x1028   : > { %v4113_v62 = vpop.xlane.xlu0 %4112 }
0x1029   : > { %6163 = vrcp.f32 %v4113_v62 }
0x102a   : > { %v4116_v48 = vpop.xlane.xlu1 %4115 }
0x102b   : > { %6165 = vrcp.f32 %v4116_v48 }
0x102c   : > { %v4119_v0 = vpop.xlane.xlu0 %4118 }
0x102d   : > { %6167 = vrcp.f32 %v4119_v0 }
0x102e   : > { %v4122_v1 = vpop.xlane.xlu1 %4121 }
0x102f   : > { %6169 = vrcp.f32 %v4122_v1 }
0x1032   : > { %v4475_v4 = vpop.trf.xlu0 }
0x1033   : > { %v6164_v7 = vpop.eup %6163  ;;  %v4507_v10 = vcombine.low %v4411_v56, %v4475_v4 }
0x1034   : > { %v4491_v12 = vpop.trf.xlu1  ;;  %v4127_v13 = vmul.f32 %v6164_v7, %v6156_v51 }
0x1035   : > { %v6166_v14 = vpop.eup %6165  ;;  %v4514_v17 = vrot.slane %v4507_v10, %v6385_v52  ;;  %v4532_v18 = vcombine.low %v4427_v57, %v4491_v12 }
0x1036   : > { %v4131_v19 = vpack.c.bf16 %v4127_v13, %v4127_v13  ;;  %v4128_v20 = vmul.f32 %v6166_v14, %v6158_v31 }
0x1037   : > { %v6168_v21 = vpop.eup %6167  ;;  %v4515_v24 = vcombine.low %v4506_v16, %v4514_v17  ;;  %v4539_v25 = vrot.slane %v4532_v18, %v6385_v52 }
0x1038   : > { %v4565_v26 = vsel %vm1587_vm3, %v4131_v19, 0  ;;  %v4132_v61 = vpack.c.bf16 %v4128_v20, %v4128_v20  ;;  %v4129_v27 = vmul.f32 %v6168_v21, %v6160_v45  ;;  %v6103_v20 = vld [vmem:[%s7056_s7 + $0x10] sm:$0xff]  }
0x1039   : > { %v6170_v28 = vpop.eup %6169  ;;  %v4522_v42 = vrot.slane %v4515_v24, %v6388_v59  ;;  %v4540_v29 = vcombine.low %v4531_v23, %v4539_v25  ;;  %5954 = vmatpush3.bf16.xpose.msra.mxu0 %v4565_v26 }
0x103a   : > { %v4611_v30 = vsel %vm1587_vm3, %v4132_v61, 0  ;;  %5965 = vmatprep.subr.bf16.mxu0 %v6190_v5  ;;  %v4130_v36 = vmul.f32 %v6170_v28, %v6162_v46  ;;  %v4133_v32 = vpack.c.bf16 %v4129_v27, %v4129_v27 }
0x103b   : > { %v4547_v63 = vrot.slane %v4540_v29, %v6388_v59  ;;  %5960 = vmatpush3.bf16.xpose.msra.mxu1 %v4611_v30  ;;  %v4552_v15 = vshrl.u32 %v4522_v42, 16  ;;  %v4523_v41 = vcombine.high %v4522_v42, %v6191_v8 }
0x103c   : > { %5971 = vmatprep.subr.bf16.mxu1 %v6190_v5  ;;  %v4134_v34 = vpack.c.bf16 %v4130_v36, %v4130_v36  ;;  %v4657_v11 = vsel %vm1587_vm3, %v4133_v32, 0 }
0x103d   : > { %v4551_v33 = vpack.i.b16 %v4547_v63, %v4522_v42  ;;  %v4553_v6 = vshrl.u32 %v4547_v63, 16  ;;  %v4548_v39 = vcombine.high %v4547_v63, %v6191_v8  ;;  %v4558_v44 = vshrl.u32 %v4523_v41, 16  ;;  %v6104_v42 = vld [vmem:[%s7056_s7 + $0x18] sm:$0xff]  }
0x103e   : > { %v4703_v51 = vsel %vm1587_vm3, %v4134_v34, 0 }
0x103f   : > { %v4554_v35 = vpack.i.b16 %v4553_v6, %v4552_v15  ;;  %v4559_v31 = vshrl.u32 %v4548_v39, 16  ;;  %v4557_v45 = vpack.i.b16 %v4548_v39, %v4523_v41 }
0x1040   : > { %5956 = vmatmul.mubr.msk.bf16.vlgmr.msra.gmra.mrb[40].mxu0 %vm1587_vm3, %v4551_v33 }
0x1041   : > { %5966 = vmatpush3.bf16.xpose.msra.mxu0 %v4657_v11  ;;  %5967 = vmatprep.mubr.msk.bf16.mxu0 %vm6192_vm1, %v6190_v5  ;;  %v4560_v43 = vpack.i.b16 %v4559_v31, %v4558_v44 }
0x1042   : > { %5962 = vmatmul.mubr.msk.bf16.vlgmr.msra.gmra.mrb[44].mxu1 %vm1587_vm3, %v4554_v35  ;;  %5977 = vmatprep.subr.bf16.mxu0 %v6190_v5 }
0x1043   : > { %5972 = vmatpush3.bf16.xpose.msra.mxu1 %v4703_v51  ;;  %5973 = vmatprep.mubr.msk.bf16.mxu1 %vm6192_vm1, %v6190_v5 }
0x1048   : > { %5968 = vmatmul.mubr.msk.bf16.vlgmr.msra.gmra.mrb[44].mxu0 %vm1587_vm3, %v4557_v45 }
0x1049   : > { %5981 = vmatprep.mubr.msk.bf16.mxu0 %vm6192_vm1, %v6190_v5  ;;  %5978 = vmatpush3.bf16.msra.mxu0 %v6103_v20 }
0x104a   : > { %5974 = vmatmul.mubr.msk.bf16.vlgmr.msra.gmra.mrb[48].mxu1 %vm1587_vm3, %v4560_v43  ;;  %5979 = vmatprep.subr.bf16.mxu0 %v6190_v5 }
0x104b   : > { %5164 = vmatprep.mubr.bf16.mxu1 %v6191_v8 }
0x104d   : > { %5980 = vmatpush3.bf16.msra.mxu0 %v6104_v42 }
0x104e   : > { %5985 = vmatprep.subr.bf16.mxu0 %v6190_v5 }
0x1113   : > { %v4601_v46 = vpop.f32.mrb[40].mxu0 }
0x1114   : > { %4745 = vxpose.xlu0.b32.start.end [1/1] (short) (narrow) %v4601_v46, 8  ;;  %v5957_v3 = vpop.f32.mrb[41].mxu0 }
0x1115   : > { %v4604_v47 = vpop.f32.mrb[42].mxu0  ;;  %v4647_v37 = vpop.f32.mrb[44].mxu1 }
0x1116   : > { %v5958_v38 = vpop.f32.mrb[43].mxu0  ;;  %4777 = vxpose.xlu1.b32.start.end [1/1] (short) (narrow) %v4647_v37, 8  ;;  %v5963_v40 = vpop.f32.mrb[45].mxu1 }
0x1117   : > { %v4650_v49 = vpop.f32.mrb[46].mxu1 }
0x1118   : > { %v5964_v50 = vpop.f32.mrb[47].mxu1 }
0x111b   : > { %v4693_v53 = vpop.f32.mrb[44].mxu0 }
0x111c   : > { %4809 = vxpose.xlu0.b32.start.end [1/1] (short) (narrow) %v4693_v53, 8  ;;  %v5969_v54 = vpop.f32.mrb[45].mxu0 }
0x111d   : > { %v4696_v55 = vpop.f32.mrb[46].mxu0  ;;  %v4739_v56 = vpop.f32.mrb[48].mxu1 }
0x111e   : > { %v5970_v57 = vpop.f32.mrb[47].mxu0  ;;  %v5975_v58 = vpop.f32.mrb[49].mxu1  ;;  %v6107_v55 = vld [vmem:[%s7058_s9 + $0x24] ss:$8 sps:$4 sm:$0xff]  }
0x111f   : > { %v4742_v60 = vpop.f32.mrb[50].mxu1  ;;  %5132 = vmatprep.subr.bf16.mxu1 %v6107_v55  ;;  %v6110_v57 = vld [vmem:[%s7058_s9 + $0x34] ss:$8 sps:$4 sm:$0xff]  }
0x1120   : > { %4841 = vxpose.xlu0.b32.start.end [1/1] (short) (narrow) %v4739_v56, 8  ;;  %v5976_v8 = vpop.f32.mrb[51].mxu1  ;;  %v6105_v56 = vld [vmem:[%s7058_s9 + $0x20] ss:$8 sps:$4 sm:$0xff]  }
0x1121   : > { %5133 = vmatpush1.bf16.msra.mxu1 %v6105_v56  ;;  %v5380_v56 = vld [vmem:[%s7063_s14] sm:$0x1] }
0x1122   : > { %5134 = vmatprep.subr.bf16.mxu1 %v6110_v57 }
0x1194   : > { %v4761_v62 = vpop.trf.xlu0 }
0x1196   : > { %v4793_v0 = vpop.trf.xlu1 }
0x119c   : > { %v4825_v48 = vpop.trf.xlu0 }
0x119d   : > { %v4873_v1 = vcombine.low %v4761_v62, %v4825_v48  ;;  %v4874_v2 = vcombine.high %v4761_v62, %v4825_v48  ;;  %v5730_v48 = vld [vmem:[%s7057_s8 + $0x1] ss:$0 sm:$0xff] }
0x119f   : > { %v4881_v10 = vrot.slane %v4873_v1, %v6385_v52  ;;  %v4888_v12 = vrot.slane %v4874_v2, %v6385_v52 }
0x11a0   : > { %v4857_v4 = vpop.trf.xlu0 }
0x11a1   : > { %v4889_v7 = vcombine.low %v4793_v0, %v4857_v4  ;;  %v4890_v9 = vcombine.high %v4793_v0, %v4857_v4  ;;  %v6111_v4 = vld [vmem:[%s7059_s10 + $0x20] sm:$0xff]  }
0x11a3   : > { %v4897_v13 = vrot.slane %v4889_v7, %v6385_v52  ;;  %v4904_v14 = vrot.slane %v4890_v9, %v6385_v52  ;;  %v6112_v7 = vld [vmem:[%s7059_s10 + $0x28] sm:$0xff]   ;;  %v6113_v9 = vld [vmem:[%s7059_s10 + $0x30] sm:$0xff]  }
0x11a5   : > { %v4905_v16 = vcombine.low %v4881_v10, %v4897_v13  ;;  %v4906_v17 = vcombine.high %v4881_v10, %v4897_v13  ;;  %v4921_v18 = vcombine.low %v4888_v12, %v4904_v14  ;;  %v4922_v19 = vcombine.high %v4888_v12, %v4904_v14  ;;  %v6114_v10 = vld [vmem:[%s7059_s10 + $0x38] sm:$0xff]  }
0x11a7   : > { %v4913_v21 = vrot.slane %v4905_v16, %v6388_v59  ;;  %v4920_v23 = vrot.slane %v4906_v17, %v6388_v59  ;;  %v4929_v24 = vrot.slane %v4921_v18, %v6388_v59  ;;  %v4936_v25 = vrot.slane %v4922_v19, %v6388_v59 }
0x11a9   : > { %v4941_v26 = vcombine.low %v4913_v21, %v4920_v23  ;;  %v5720_v61 = vcombine.high %v4913_v21, %v4920_v23  ;;  %v4957_v27 = vcombine.low %v4929_v24, %v4936_v25  ;;  %v5721_v28 = vcombine.high %v4929_v24, %v4936_v25 }
0x11ab   : > { %v4948_v29 = vrot.slane %v4941_v26, %v6385_v52  ;;  %v4956_v30 = vrot.slane %v5720_v61, %v6385_v52  ;;  %v4964_v36 = vrot.slane %v4957_v27, %v6385_v52  ;;  %v4972_v63 = vrot.slane %v5721_v28, %v6385_v52 }
0x11ad   : > { %v4974_v32 = vcombine.high %v4948_v29, %v4956_v30  ;;  %v4990_v15 = vcombine.high %v4964_v36, %v4972_v63  ;;  %v4973_v33 = vcombine.low %v4948_v29, %v4956_v30  ;;  %v4989_v6 = vcombine.low %v4964_v36, %v4972_v63  ;;  %v5276_v36 = vld [vmem:[%s7062_s13] sm:$0x3] }
0x11ae   : > { %v5283_v63 = vsel %vm5281_vm12, %v5276_v36, 0 }
0x11af   : > { %v4988_v34 = vrot.slane %v4974_v32, %v6388_v59  ;;  %v5004_v35 = vrot.slane %v4990_v15, %v6388_v59  ;;  %v4981_v39 = vrot.slane %v4973_v33, %v6388_v59  ;;  %v4997_v11 = vrot.slane %v4989_v6, %v6388_v59  ;;  %v5274_v32 = vld [vmem:[%s620_s27] sm:$0x1]  ;;  %v6116_v6 = vld [vmem:[%s7061_s12 + $0x8] sm:$0xff]  }
0x11b0   : > { %v5275_v15 = vpack.c.bf16 %v5274_v32, %v5274_v32  ;;  %v6115_v33 = vld [vmem:[%s7061_s12] sm:$0xff]  }
0x11b1   : > { %v5007_v41 = vcombine.low %v4988_v34, %v5004_v35  ;;  %v5006_v51 = vcombine.high %v4981_v39, %v4997_v11  ;;  %v5005_v31 = vcombine.low %v4981_v39, %v4997_v11  ;;  %v5008_v52 = vcombine.high %v4988_v34, %v5004_v35  ;;  %v6117_v34 = vld [vmem:[%s7064_s15] sm:$0xff]   ;;  %v6118_v35 = vld [vmem:[%s7064_s15 + $0x8] sm:$0xff]   ;;  %v6119_v39 = vld [vmem:[%s7064_s15 + $0x10] sm:$0xff]  }
0x11b2   : > { %v6120_v11 = vld [vmem:[%s7064_s15 + $0x18] sm:$0xff]  }
0x11b3   : > { %5014 = vrot.lane.b32.xlu1 %v5007_v41, %s7088_s21  ;;  %5010 = vrot.lane.b32.xlu0 %v5006_v51, %s7089_s1  ;;  %v6121_v41 = vld [vmem:[%s7064_s15 + $0x20] sm:$0xff]   ;;  %v6122_v51 = vld [vmem:[%s7064_s15 + $0x28] sm:$0xff]  }
0x11b7   : > { %5018 = vrot.lane.b32.xlu1 %v5008_v52, %s7090_s25 }
0x1225   : > { %v5015_v44 = vpop.permute.xlu1 %5014  ;;  %v5011_v45 = vpop.permute.xlu0 %5010 }
0x1226   : > { %v5021_v43 = vsel %vm1587_vm3, %v5005_v31, %v5011_v45 }
0x1227   : > { %v5022_v3 = vsel %vm2716_vm8, %v5021_v43, %v5015_v44  ;;  %v5258_v43 = vld [vmem:[%s7060_s11] sm:$0x1] }
0x1229   : > { %v5019_v46 = vpop.permute.xlu1 %5018 }
0x122a   : > { %v5023_v47 = vsel %vm2718_vm9, %v5022_v3, %v5019_v46 }
0x122b   : > { %v5024_v59 = vpack.c.bf16 %v5023_v47, %v5023_v47 }
0x122d   : > { %5982 = vmatmul.mubr.msk.bf16.vlgmr.msra.gmra.mrb[48].mxu0 %vm645_vm0, %v5024_v59 }
0x122e   : > { %5993 = vmatprep.mubr.msk.bf16.mxu0 %vm6192_vm1, %v6190_v5  ;;  %5986 = vmatpush3.bf16.msra.mxu0 %v6111_v4 }
0x122f   : > { %5987 = vmatprep.subr.bf16.mxu0 %v6190_v5 }
0x1232   : > { %5988 = vmatpush3.bf16.msra.mxu0 %v6112_v7 }
0x1233   : > { %5989 = vmatprep.subr.bf16.mxu0 %v6190_v5 }
0x1236   : > { %5990 = vmatpush3.bf16.msra.mxu0 %v6113_v9 }
0x1237   : > { %5991 = vmatprep.subr.bf16.mxu0 %v6190_v5 }
0x123a   : > { %5992 = vmatpush3.bf16.msra.mxu0 %v6114_v10 }
0x123b   : > { %6011 = vmatprep.subr.bf16.mxu0 %v6190_v5 }
0x1300   : > { %v5079_v37 = vpop.f32.mrb[48].mxu0 }
0x1301   : > { %v5085_v38 = vadd.f32 %v5079_v37, %v6656_v22  ;;  %v5983_v40 = vpop.f32.mrb[49].mxu0  ;;  %v6108_v22 = vld [vmem:[%s7058_s9 + $0x30] ss:$8 sps:$4 sm:$0xff]  }
0x1302   : > { %v5082_v49 = vpop.f32.mrb[50].mxu0  ;;  %5135 = vmatpush1.bf16.msra.mxu1 %v6108_v22 }
0x1303   : > { %v5984_v50 = vpop.f32.mrb[51].mxu0  ;;  %v5088_v53 = vmul.f32 %v5085_v38, %v5085_v38  ;;  %5997 = vmatprep.subr.bf16.mxu1 %v6190_v5  ;;  %v6123_v49 = vld [vmem:[%s7064_s15 + $0x30] sm:$0xff]  }
0x1304   : > { %v6124_v50 = vld [vmem:[%s7064_s15 + $0x38] sm:$0xff]  }
0x1305   : > { %v5089_v54 = vsel %vm645_vm0, %v5088_v53, 0.0  ;;  %v6125_v53 = vld [vmem:[%s7066_s17] sm:$0xff]  }
0x1306   : > { %5090 = vadd.xlane.f32.xlu1 %v5089_v54  ;;  %v6126_v54 = vld [vmem:[%s7066_s17 + $0x8] sm:$0xff]  }
0x1393   : > { %v5091_v58 = vpop.xlane.xlu1 %5090 }
0x1394   : > { %v5092_v60 = vmul.f32 0.03125, %v5091_v58 }
0x1396   : > { %v5093_v8 = vadd.f32 1e-05, %v5092_v60 }
0x1398   : > { %6171 = vrsqrt.f32 %v5093_v8 }
0x13a2   : > { %v6172_v62 = vpop.eup %6171 }
0x13a3   : > { %v5095_v0 = vmul.f32 %v6172_v62, %v5085_v38 }
0x13a5   : > { %v5102_v1 = vmul.f32 %v5730_v48, %v5095_v0  ;;  %v6127_v0 = vld [vmem:[%s7066_s17 + $0x10] sm:$0xff]  }
0x13a7   : > { %v5103_v2 = vpack.c.bf16 %v5102_v1, %v5102_v1  ;;  %v6128_v1 = vld [vmem:[%s7066_s17 + $0x18] sm:$0xff]  }
0x13a9   : > { %5739 = vmatmul.mubr.msk.bf16.vlgmr.msra.gmra.mrb[52].mxu1 %vm645_vm0, %v5103_v2  ;;  %v5400_v2 = vld [vmem:[%s7065_s16] sm:$0x1] }
0x13aa   : > { %5999 = vmatprep.mubr.msk.bf16.mxu1 %vm6192_vm1, %v6190_v5  ;;  %5998 = vmatpush3.bf16.msra.mxu1 %v5283_v63 }
0x13ab   : > { %6003 = vmatprep.subr.bf16.mxu1 %v6190_v5 }
0x13b1   : > { %6000 = vmatmul.mubr.msk.bf16.vlgmr.msra.gmra.mrb[56].mxu1 %vm5277_vm13, %v5275_v15 }
0x13b2   : > { %6007 = vmatprep.mubr.msk.bf16.mxu1 %vm6192_vm1, %v6190_v5  ;;  %6004 = vmatpush3.bf16.msra.mxu1 %v6115_v33 }
0x13b3   : > { %6005 = vmatprep.subr.bf16.mxu1 %v6190_v5 }
0x13b6   : > { %6006 = vmatpush3.bf16.msra.mxu1 %v6116_v6 }
0x13b7   : > { %6031 = vmatprep.subr.bf16.mxu1 %v6190_v5 }
0x147c   : > { %v5166_v12 = vpop.f32.mrb[52].mxu1 }
0x147d   : > { %v5173_v13 = vsub.f32 0.0, %v5166_v12  ;;  %v5168_v14 = vpop.f32.mrb[53].mxu1 }
0x147e   : > { %v5170_v16 = vpop.f32.mrb[54].mxu1 }
0x147f   : > { %v5174_v17 = vmul.f32 1.442695, %v5173_v13  ;;  %v5171_v18 = vpop.f32.mrb[55].mxu1 }
0x1481   : > { %6173 = vpow2.f32 %v5174_v17 }
0x1484   : > { %v5319_v59 = vpop.f32.mrb[56].mxu1 }
0x1485   : > { %v6001_v37 = vpop.f32.mrb[57].mxu1 }
0x148b   : > { %v6174_v19 = vpop.eup %6173 }
0x148c   : > { %v5176_v20 = vadd.f32 1.0, %v6174_v19 }
0x148e   : > { %6175 = vrcp.f32 %v5176_v20 }
0x1498   : > { %v6176_v21 = vpop.eup %6175 }
0x1499   : > { %v5178_v23 = vmul.f32 %v6176_v21, %v5166_v12 }
0x149b   : > { %v5179_v24 = vmul.f32 %v5178_v23, %v5168_v14 }
0x149d   : > { %v5180_v25 = vpack.c.bf16 %v5179_v24, %v5179_v24 }
0x149f   : > { %5994 = vmatmul.mubr.msk.bf16.vlgmr.msra.gmra.mrb[52].mxu0 %vm2906_vm10, %v5180_v25 }
0x14a0   : > { %6027 = vmatprep.mubr.msk.bf16.mxu0 %vm6192_vm1, %v6190_v5  ;;  %6012 = vmatpush3.bf16.msra.mxu0 %v6117_v34 }
0x14a1   : > { %6013 = vmatprep.subr.bf16.mxu0 %v6190_v5 }
0x14a4   : > { %6014 = vmatpush3.bf16.msra.mxu0 %v6118_v35 }
0x14a5   : > { %6015 = vmatprep.subr.bf16.mxu0 %v6190_v5 }
0x14a8   : > { %6016 = vmatpush3.bf16.msra.mxu0 %v6119_v39 }
0x14a9   : > { %6017 = vmatprep.subr.bf16.mxu0 %v6190_v5 }
0x14ac   : > { %6018 = vmatpush3.bf16.msra.mxu0 %v6120_v11 }
0x14ad   : > { %6019 = vmatprep.subr.bf16.mxu0 %v6190_v5 }
0x14b0   : > { %6020 = vmatpush3.bf16.msra.mxu0 %v6121_v41 }
0x14b1   : > { %6021 = vmatprep.subr.bf16.mxu0 %v6190_v5 }
0x14b4   : > { %6022 = vmatpush3.bf16.msra.mxu0 %v6122_v51 }
0x14b5   : > { %6023 = vmatprep.subr.bf16.mxu0 %v6190_v5 }
0x14b8   : > { %6024 = vmatpush3.bf16.msra.mxu0 %v6123_v49 }
0x14b9   : > { %6025 = vmatprep.subr.bf16.mxu0 %v6190_v5 }
0x14bc   : > { %6026 = vmatpush3.bf16.msra.mxu0 %v6124_v50 }
0x1572   : > { %v5251_v26 = vpop.f32.mrb[52].mxu0 }
0x1573   : > { %v5257_v61 = vadd.f32 %v5251_v26, %v5085_v38  ;;  %v5995_v27 = vpop.f32.mrb[53].mxu0  ;;  %v5322_v38 = vpop.f32.mrb[58].mxu1 }
0x1574   : > { %v5254_v28 = vpop.f32.mrb[54].mxu0  ;;  %v6002_v40 = vpop.f32.mrb[59].mxu1 }
0x1575   : > { %v5259_v42 = vmul.f32 %v5257_v61, %v5257_v61  ;;  %v5996_v29 = vpop.f32.mrb[55].mxu0 }
0x1577   : > { %v5261_v30 = vsel %vm5260_vm11, %v5259_v42, 0.0 }
0x1578   : > { %5262 = vadd.xlane.f32.xlu0 %v5261_v30 }
0x1605   : > { %v5263_v31 = vpop.xlane.xlu0 %5262 }
0x1606   : > { %v5264_v52 = vmul.f32 0.03125, %v5263_v31 }
0x1608   : > { %v5265_v44 = vadd.f32 1e-05, %v5264_v52 }
0x160a   : > { %6177 = vrsqrt.f32 %v5265_v44 }
0x1614   : > { %v6178_v45 = vpop.eup %6177 }
0x1615   : > { %v5267_v46 = vmul.f32 %v6178_v45, %v5257_v61 }
0x1617   : > { %v5268_v3 = vmul.f32 %v5267_v46, %v5258_v43 }
0x1619   : > { %v5269_v47 = vpack.c.bf16 %v5268_v3, %v5268_v3 }
0x161b   : > { %6008 = vmatmul.mubr.msk.bf16.vlgmr.msra.gmra.mrb[60].mxu1 %vm645_vm0, %v5269_v47 }
0x161c   : > { %6039 = vmatprep.mubr.msk.bf16.mxu1 %vm6192_vm1, %v6190_v5  ;;  %6032 = vmatpush3.bf16.msra.mxu1 %v6125_v53 }
0x161d   : > { %6033 = vmatprep.subr.bf16.mxu1 %v6190_v5 }
0x1620   : > { %6034 = vmatpush3.bf16.msra.mxu1 %v6126_v54 }
0x1621   : > { %6035 = vmatprep.subr.bf16.mxu1 %v6190_v5 }
0x1624   : > { %6036 = vmatpush3.bf16.msra.mxu1 %v6127_v0 }
0x1625   : > { %6037 = vmatprep.subr.bf16.mxu1 %v6190_v5  ;;  %v5499_v5 = vld [vmem:[%s7067_s18] sm:$0x1] }
0x1628   : > { %6038 = vmatpush3.bf16.msra.mxu1 %v6128_v1 }
0x16ee   : > { %v5374_v55 = vpop.f32.mrb[60].mxu1 }
0x16ef   : > { %v5375_v22 = vadd.f32 %v5374_v55, %v5319_v59  ;;  %v6009_v57 = vpop.f32.mrb[61].mxu1 }
0x16f0   : > { %v5377_v58 = vpop.f32.mrb[62].mxu1 }
0x16f1   : > { %v5381_v60 = vadd.f32 %v5380_v56, %v5375_v22  ;;  %v6010_v8 = vpop.f32.mrb[63].mxu1 }
0x16f3   : > { %v5382_v62 = vmax.f32 %v5381_v60, 0.0 }
0x16f5   : > { %v5383_v48 = vpack.c.bf16 %v5382_v62, %v5382_v62 }
0x16f7   : > { %6028 = vmatmul.mubr.bf16.vlgmr.msra.gmra.mrb[56].mxu0 %v5383_v48 }
0x17ca   : > { %v5483_v4 = vpop.f32.mrb[56].mxu0 }
0x17cb   : > { %v5484_v7 = vadd.f32 %v5483_v4, %v5400_v2  ;;  %v6029_v9 = vpop.f32.mrb[57].mxu0 }
0x17cc   : > { %v5486_v10 = vpop.f32.mrb[58].mxu0 }
0x17cd   : > { %v5489_v12 = vmax.f32 %v5484_v7, 0.0  ;;  %v6030_v13 = vpop.f32.mrb[59].mxu0 }
0x17cf   : > { %v5490_v14 = vpack.c.bf16 %v5489_v12, %v5489_v12 }
0x17d1   : > { %6040 = vmatmul.mubr.msk.bf16.vlgmr.msra.gmra.mrb[64].mxu1 %vm2906_vm10, %v5490_v14 }
0x18a4   : > { %v5561_v16 = vpop.f32.mrb[64].mxu1 }
0x18a5   : > { %v5562_v17 = vadd.f32 %v5561_v16, %v5499_v5  ;;  %v6041_v18 = vpop.f32.mrb[65].mxu1 }
0x18a6   : > { %v5564_v19 = vpop.f32.mrb[66].mxu1 }
0x18a7   : > { %5567 = vst [vmem:[%s623_s24] sm:$0x1] %v5562_v17  ;;  %v6042_v20 = vpop.f32.mrb[67].mxu1 }
0x18a8 PF: > { %s29_s0 = sadd.s32 1, %s6188_s0  }
0x18a9   : > { %p26_p4 = scmp.ge.s32.totalorder %s29_s0, 4  }
0x18ab   :  { %28 = sbr.rel (!%p26_p4) target bundleno = 5 (0x5), region = 138 }

</bundles_post_ra>
